<compile_context>
chip_gen: v7x
topology: tpu7x:2x2x1
jax: 0.10.0
libtpu: 0.0.40
codegen_flags: <defaults>
</compile_context>

<pallas_src>
import functools

import jax
import jax.numpy as jnp
from jax import lax
from jax.experimental import pallas as pl
from jax.experimental.pallas import tpu as pltpu


# ----------------------------------------------------------------------------
# In-kernel helpers
# ----------------------------------------------------------------------------

def _layernorm(x, g, b, eps=1e-5):
    """LayerNorm over the last dim (PyTorch default eps)."""
    mu = jnp.mean(x, axis=-1, keepdims=True)
    xc = x - mu
    var = jnp.mean(xc * xc, axis=-1, keepdims=True)
    return xc * lax.rsqrt(var + eps) * g + b


def _mm(a, b):
    """MXU matmul with bf16 operands and f32 accumulation."""
    return jnp.dot(a.astype(jnp.bfloat16), b.astype(jnp.bfloat16),
                   preferred_element_type=jnp.float32)


# ----------------------------------------------------------------------------
# Single fused kernel: LSTM stack + transformer block + pooling + classifier
# ----------------------------------------------------------------------------

def make_fused_kernel(num_layers, hidden_size, nhead):
    H = hidden_size
    D = 2 * H

    def kernel(*refs):
        # ---- unpack refs: inputs..., outputs..., scratch
        n_lstm = 3 * num_layers
        idx = 0
        x_ref = refs[idx]; idx += 1
        lstm_refs = refs[idx:idx + n_lstm]; idx += n_lstm
        (ln0_g, ln0_b, wqkv, bqkv, wo, bo, n1_g, n1_b,
         w1, b1, w2, b2, n2_g, n2_b) = refs[idx:idx + 14]; idx += 14
        (pw1, pb1, pw2, pb2,
         cw1, cb1, cw2, cb2, cw3, cb3) = refs[idx:idx + 10]; idx += 10
        out_ref = refs[idx]; idx += 1
        attnw_ref = refs[idx]; idx += 1
        hs_ref = refs[idx]                     # (B, T, 2H) VMEM scratch

        B, T, _ = x_ref.shape

        # ================= Stage 1: bidirectional multi-layer LSTM =========
        h_seq = x_ref[...]                                   # (B, T, Din)
        for l in range(num_layers):
            wih = lstm_refs[3 * l][...]      # (Din, 8H)  [fwd i,f,g,o | bwd i,f,g,o]
            whh = lstm_refs[3 * l + 1][...]  # (H, 8H)    [whh_fwd | whh_bwd]
            bias = lstm_refs[3 * l + 2][...]  # (1, 8H)    b_ih + b_hh, both dirs
            Din = h_seq.shape[-1]

            # Hoisted input projection: one MXU matmul covers every timestep
            # and BOTH directions (lane-dense 8H-wide output).
            gx = _mm(h_seq.reshape(B * T, Din), wih) + bias
            gx = gx.reshape(B, T, 8 * H)

            whh_bf = whh.astype(jnp.bfloat16)
            h_fb = jnp.zeros((2 * B, H), jnp.float32)        # rows 0:B fwd, B:2B bwd
            c_fb = jnp.zeros((2 * B, H), jnp.float32)

            # TODO(synk): for large T switch to lax.fori_loop (modest unroll)
            # carrying (h_fb, c_fb) with pl.ds-indexed scratch writes.
            for t in range(T):
                rt = T - 1 - t
                # One fused MXU push for both directions' recurrent matmul.
                raw = jnp.dot(h_fb.astype(jnp.bfloat16), whh_bf,
                              preferred_element_type=jnp.float32)   # (2B, 8H)
                g_f = gx[:, t, 0:4 * H] + raw[0:B, 0:4 * H]
                g_b = gx[:, rt, 4 * H:8 * H] + raw[B:2 * B, 4 * H:8 * H]
                gates = jnp.concatenate([g_f, g_b], axis=0)          # (2B, 4H)

                # One full-width sigmoid; tanh only on the g slice (PyTorch
                # gate order i, f, g, o).
                sig = jax.nn.sigmoid(gates)
                i_g = sig[:, 0 * H:1 * H]
                f_g = sig[:, 1 * H:2 * H]
                o_g = sig[:, 3 * H:4 * H]
                g_g = jnp.tanh(gates[:, 2 * H:3 * H])
                c_fb = f_g * c_fb + i_g * g_g
                h_fb = o_g * jnp.tanh(c_fb)

                # Write straight into the final [fwd | bwd] 2H layout.
                hs_ref[:, t, 0:H] = h_fb[0:B]
                hs_ref[:, rt, H:2 * H] = h_fb[B:2 * B]

            h_seq = hs_ref[...]                               # (B, T, 2H) in VMEM

        # ============ Stage 2: LayerNorm + TransformerEncoderLayer =========
        x2 = h_seq.reshape(B * T, D)
        h = _layernorm(x2, ln0_g[...], ln0_b[...])            # ln_before_transformer

        # Fused QKV projection: one (BT, D) x (D, 3D) MXU matmul.
        qkv = _mm(h, wqkv[...]) + bqkv[...]
        q = qkv[:, 0:D].reshape(B, T, D).astype(jnp.bfloat16)
        k = qkv[:, D:2 * D].reshape(B, T, D).astype(jnp.bfloat16)
        v = qkv[:, 2 * D:3 * D].reshape(B, T, D).astype(jnp.bfloat16)

        dh = D // nhead
        scale = 1.0 / float(dh) ** 0.5
        heads = []
        # TODO(synk): a single all-head 4-D contraction (dh=16) risks Mosaic
        # relayouts; per-head 3-D batched matmuls kept for lowering safety.
        for hd in range(nhead):
            sl = slice(hd * dh, (hd + 1) * dh)
            qh, kh, vh = q[:, :, sl], k[:, :, sl], v[:, :, sl]
            s = jnp.einsum("bqd,bkd->bqk", qh, kh,
                           preferred_element_type=jnp.float32) * scale
            s = s - jnp.max(s, axis=-1, keepdims=True)
            p = jnp.exp(s)
            p = p * pl.reciprocal(jnp.sum(p, axis=-1, keepdims=True), approx=True)
            heads.append(jnp.einsum("bqk,bkd->bqd", p.astype(jnp.bfloat16), vh,
                                    preferred_element_type=jnp.float32))
        attn = jnp.concatenate(heads, axis=-1).reshape(B * T, D)

        attn = _mm(attn, wo[...]) + bo[...]
        y1 = _layernorm(h + attn, n1_g[...], n1_b[...])       # residual + norm1

        ff = _mm(y1, w1[...]) + b1[...]
        # TODO(synk): PyTorch F.gelu is erf-exact; tanh-approx GELU used here
        # (max abs diff ~1e-3) to stay on well-supported Mosaic lowerings.
        ff = jax.nn.gelu(ff, approximate=True)
        ff = _mm(ff, w2[...]) + b2[...]
        y2 = _layernorm(y1 + ff, n2_g[...], n2_b[...])        # residual + norm2

        # ============ Stage 3: attention pooling + classifier ==============
        y3 = y2.reshape(B, T, D)

        # AttentionLayer: Linear(D->D//2) -> Tanh -> Linear(D//2->1) -> softmax(T)
        a = jnp.tanh(_mm(y2, pw1[...]) + pb1[...])            # (BT, D//2)
        a = a.reshape(B, T, D // 2)
        # pw2 stored transposed as (1, D//2): lane-reduce instead of an N=1
        # masked matmul output.
        score = jnp.sum(a * pw2[...], axis=-1) + pb2[...]     # (B, T)
        score = score - jnp.max(score, axis=-1, keepdims=True)
        e = jnp.exp(score)
        w = e * pl.reciprocal(jnp.sum(e, axis=-1, keepdims=True), approx=True)
        attnw_ref[...] = w                                    # (B, T)

        # context = sum_t w[b,t] * y3[b,t,:]  (rank-3 batched matmul, M=1)
        ctx = jnp.einsum("bmt,btd->bmd", w.reshape(B, 1, T), y3,
                         preferred_element_type=jnp.float32).reshape(B, D)

        # Classifier: D->H ReLU -> H->H//2 ReLU -> H//2->1 (dropout = identity)
        c1 = jnp.maximum(_mm(ctx, cw1[...]) + cb1[...], 0.0)
        c2 = jnp.maximum(_mm(c1, cw2[...]) + cb2[...], 0.0)
        # cw3 stored transposed as (1, H//2).
        out_ref[...] = jnp.sum(c2 * cw3[...], axis=-1, keepdims=True) + cb3[...]

    return kernel


# ----------------------------------------------------------------------------
# Parameters (deterministic synthetic init; shapes follow the PyTorch module,
# with QKV / LSTM weights pre-fused for single-matmul use).
# When importing real PyTorch weights: wih = [W_ih_fwd.T | W_ih_bwd.T],
# whh = [W_hh_fwd.T | W_hh_bwd.T], b = [(b_ih+b_hh)_fwd | (b_ih+b_hh)_bwd].
# ----------------------------------------------------------------------------

def init_params(key, input_size, hidden_size, num_layers, nhead):
    H = hidden_size
    D = 2 * H          # bidirectional LSTM output / transformer d_model
    FF = 4 * H         # dim_feedforward
    keys = iter(jax.random.split(key, 64))

    def w(shape, scale=0.1):
        return jax.random.normal(next(keys), shape, jnp.float32) * scale

    def zeros(shape):
        return jnp.zeros(shape, jnp.float32)

    def ones(shape):
        return jnp.ones(shape, jnp.float32)

    params = {}

    lstm = []
    in_dim = input_size
    for _ in range(num_layers):
        lstm.append(dict(
            wih=w((in_dim, 8 * H)),           # [fwd i,f,g,o | bwd i,f,g,o]
            whh=w((H, 8 * H)),                # [whh_fwd (H,4H) | whh_bwd (H,4H)]
            b=zeros((1, 8 * H)),
        ))
        in_dim = D
    params["lstm"] = lstm

    params["tfm"] = dict(
        ln0_g=ones((1, D)), ln0_b=zeros((1, D)),
        wqkv=w((D, 3 * D)), bqkv=zeros((1, 3 * D)),
        wo=w((D, D)), bo=zeros((1, D)),
        n1_g=ones((1, D)), n1_b=zeros((1, D)),
        w1=w((D, FF)), b1=zeros((1, FF)),
        w2=w((FF, D)), b2=zeros((1, D)),
        n2_g=ones((1, D)), n2_b=zeros((1, D)),
    )

    params["head"] = dict(
        pw1=w((D, H)), pb1=zeros((1, H)),
        pw2=w((1, H)), pb2=zeros((1, 1)),       # Linear(H -> 1), transposed
        cw1=w((D, H)), cb1=zeros((1, H)),
        cw2=w((H, H // 2)), cb2=zeros((1, H // 2)),
        cw3=w((1, H // 2)), cb3=zeros((1, 1)),  # Linear(H//2 -> 1), transposed
    )
    return params


# ----------------------------------------------------------------------------
# Forward pass (mirrors LSTMAttentionModel.forward, eval mode) — 1 launch
# ----------------------------------------------------------------------------

def forward(params, x, *, hidden_size, num_layers, nhead):
    B, T, _ = x.shape
    H = hidden_size

    args = [x]
    for layer in params["lstm"]:
        args += [layer["wih"], layer["whh"], layer["b"]]
    tp = params["tfm"]
    args += [tp["ln0_g"], tp["ln0_b"], tp["wqkv"], tp["bqkv"], tp["wo"], tp["bo"],
             tp["n1_g"], tp["n1_b"], tp["w1"], tp["b1"], tp["w2"], tp["b2"],
             tp["n2_g"], tp["n2_b"]]
    hp = params["head"]
    args += [hp["pw1"], hp["pb1"], hp["pw2"], hp["pb2"],
             hp["cw1"], hp["cb1"], hp["cw2"], hp["cb2"], hp["cw3"], hp["cb3"]]

    out, attn_w = pl.pallas_call(
        make_fused_kernel(num_layers, H, nhead),
        out_shape=(jax.ShapeDtypeStruct((B, 1), jnp.float32),
                   jax.ShapeDtypeStruct((B, T), jnp.float32)),
        scratch_shapes=[pltpu.VMEM((B, T, 2 * H), jnp.float32)],
    )(*args)

    return out, attn_w[..., None]                 # (B, 1), (B, T, 1)


# ----------------------------------------------------------------------------
# Main
# ----------------------------------------------------------------------------

if __name__ == "__main__":
    input_size = 8
    hidden_size = 32
    num_layers = 2
    nhead = 4
    B, T = 2, 8

    key = jax.random.PRNGKey(0)
    pkey, xkey = jax.random.split(key)
    params = init_params(pkey, input_size, hidden_size, num_layers, nhead)
    x = jax.random.normal(xkey, (B, T, input_size), jnp.float32)

    fwd = jax.jit(functools.partial(forward, hidden_size=hidden_size,
                                    num_layers=num_layers, nhead=nhead))
    out, attn_w = fwd(params, x)
    jax.block_until_ready((out, attn_w))

    assert out.shape == (B, 1), out.shape
    assert attn_w.shape == (B, T, 1), attn_w.shape
    assert bool(jnp.all(jnp.isfinite(out))) and bool(jnp.all(jnp.isfinite(attn_w)))
    print("KERNEL_OK")
</pallas_src>

<mosaic_0001>
module attributes {stable_mosaic.version = 11 : i64} {
  func.func @kernel(%arg0: memref<2x8x8xf32, #tpu.memory_space<vmem>>, %arg1: memref<8x256xf32, #tpu.memory_space<vmem>>, %arg2: memref<32x256xf32, #tpu.memory_space<vmem>>, %arg3: memref<1x256xf32, #tpu.memory_space<vmem>>, %arg4: memref<64x256xf32, #tpu.memory_space<vmem>>, %arg5: memref<32x256xf32, #tpu.memory_space<vmem>>, %arg6: memref<1x256xf32, #tpu.memory_space<vmem>>, %arg7: memref<1x64xf32, #tpu.memory_space<vmem>>, %arg8: memref<1x64xf32, #tpu.memory_space<vmem>>, %arg9: memref<64x192xf32, #tpu.memory_space<vmem>>, %arg10: memref<1x192xf32, #tpu.memory_space<vmem>>, %arg11: memref<64x64xf32, #tpu.memory_space<vmem>>, %arg12: memref<1x64xf32, #tpu.memory_space<vmem>>, %arg13: memref<1x64xf32, #tpu.memory_space<vmem>>, %arg14: memref<1x64xf32, #tpu.memory_space<vmem>>, %arg15: memref<64x128xf32, #tpu.memory_space<vmem>>, %arg16: memref<1x128xf32, #tpu.memory_space<vmem>>, %arg17: memref<128x64xf32, #tpu.memory_space<vmem>>, %arg18: memref<1x64xf32, #tpu.memory_space<vmem>>, %arg19: memref<1x64xf32, #tpu.memory_space<vmem>>, %arg20: memref<1x64xf32, #tpu.memory_space<vmem>>, %arg21: memref<64x32xf32, #tpu.memory_space<vmem>>, %arg22: memref<1x32xf32, #tpu.memory_space<vmem>>, %arg23: memref<1x32xf32, #tpu.memory_space<vmem>>, %arg24: memref<1x1xf32, #tpu.memory_space<vmem>>, %arg25: memref<64x32xf32, #tpu.memory_space<vmem>>, %arg26: memref<1x32xf32, #tpu.memory_space<vmem>>, %arg27: memref<32x16xf32, #tpu.memory_space<vmem>>, %arg28: memref<1x16xf32, #tpu.memory_space<vmem>>, %arg29: memref<1x16xf32, #tpu.memory_space<vmem>>, %arg30: memref<1x1xf32, #tpu.memory_space<vmem>>, %arg31: memref<2x1xf32, #tpu.memory_space<vmem>>, %arg32: memref<2x8xf32, #tpu.memory_space<vmem>>, %arg33: memref<2x8x64xf32, #tpu.memory_space<vmem>>) attributes {dimension_semantics = [], scalar_prefetch = 0 : i64, scratch_operands = 1 : i64, tpu.core_type = #tpu.core_type<tc>} {
    %c0 = arith.constant 0 : index
    %c0_0 = arith.constant 0 : index
    %c0_1 = arith.constant 0 : index
    %0 = vector.load %arg0[%c0, %c0_0, %c0_1] : memref<2x8x8xf32, #tpu.memory_space<vmem>>, vector<2x8x8xf32>
    %c0_2 = arith.constant 0 : index
    %c0_3 = arith.constant 0 : index
    %1 = vector.load %arg1[%c0_2, %c0_3] : memref<8x256xf32, #tpu.memory_space<vmem>>, vector<8x256xf32>
    %c0_4 = arith.constant 0 : index
    %c0_5 = arith.constant 0 : index
    %2 = vector.load %arg2[%c0_4, %c0_5] : memref<32x256xf32, #tpu.memory_space<vmem>>, vector<32x256xf32>
    %c0_6 = arith.constant 0 : index
    %c0_7 = arith.constant 0 : index
    %3 = vector.load %arg3[%c0_6, %c0_7] : memref<1x256xf32, #tpu.memory_space<vmem>>, vector<1x256xf32>
    %4 = vector.shape_cast %0 : vector<2x8x8xf32> to vector<16x8xf32>
    %5 = arith.truncf %4 : vector<16x8xf32> to vector<16x8xbf16>
    %6 = arith.truncf %1 : vector<8x256xf32> to vector<8x256xbf16>
    %cst = arith.constant dense<0.000000e+00> : vector<16x256xf32>
    %7 = tpu.matmul %5, %6, %cst {dimension_numbers = #tpu.dot_dimension_numbers<[1], [0], [0], [1], [0, 0, 1, 1], [], []>} : vector<16x8xbf16>, vector<8x256xbf16>, vector<16x256xf32> -> vector<16x256xf32>
    %8 = vector.broadcast %3 : vector<1x256xf32> to vector<16x256xf32>
    %9 = arith.addf %7, %8 : vector<16x256xf32>
    %10 = vector.shape_cast %9 : vector<16x256xf32> to vector<2x8x256xf32>
    %11 = arith.truncf %2 : vector<32x256xf32> to vector<32x256xbf16>
    %cst_8 = arith.constant 0.000000e+00 : f32
    %12 = vector.broadcast %cst_8 : f32 to vector<4x32xf32>
    %cst_9 = arith.constant 0.000000e+00 : f32
    %13 = vector.broadcast %cst_9 : f32 to vector<4x32xf32>
    %14 = arith.truncf %12 : vector<4x32xf32> to vector<4x32xbf16>
    %cst_10 = arith.constant dense<0.000000e+00> : vector<4x256xf32>
    %15 = tpu.matmul %14, %11, %cst_10 {dimension_numbers = #tpu.dot_dimension_numbers<[1], [0], [0], [1], [0, 0, 1, 1], [], []>} : vector<4x32xbf16>, vector<32x256xbf16>, vector<4x256xf32> -> vector<4x256xf32>
    %16 = vector.extract_strided_slice %10 {offsets = [0, 0, 0], sizes = [2, 1, 128], strides = [1, 1, 1]} : vector<2x8x256xf32> to vector<2x1x128xf32>
    %17 = vector.shape_cast %16 : vector<2x1x128xf32> to vector<2x128xf32>
    %18 = vector.extract_strided_slice %15 {offsets = [0, 0], sizes = [2, 128], strides = [1, 1]} : vector<4x256xf32> to vector<2x128xf32>
    %19 = arith.addf %17, %18 : vector<2x128xf32>
    %20 = vector.extract_strided_slice %10 {offsets = [0, 7, 128], sizes = [2, 1, 128], strides = [1, 1, 1]} : vector<2x8x256xf32> to vector<2x1x128xf32>
    %21 = vector.shape_cast %20 : vector<2x1x128xf32> to vector<2x128xf32>
    %22 = vector.extract_strided_slice %15 {offsets = [2, 128], sizes = [2, 128], strides = [1, 1]} : vector<4x256xf32> to vector<2x128xf32>
    %23 = arith.addf %21, %22 : vector<2x128xf32>
    %24 = tpu.concatenate %19, %23 in 0 : vector<2x128xf32>, vector<2x128xf32> -> vector<4x128xf32>
    %25 = arith.negf %24 : vector<4x128xf32>
    %26 = math.exp %25 : vector<4x128xf32>
    %cst_11 = arith.constant 1.000000e+00 : f32
    %27 = vector.broadcast %cst_11 : f32 to vector<4x128xf32>
    %28 = arith.addf %27, %26 : vector<4x128xf32>
    %29 = arith.divf %27, %28 : vector<4x128xf32>
    %30 = vector.extract_strided_slice %29 {offsets = [0, 0], sizes = [4, 32], strides = [1, 1]} : vector<4x128xf32> to vector<4x32xf32>
    %31 = vector.extract_strided_slice %29 {offsets = [0, 32], sizes = [4, 32], strides = [1, 1]} : vector<4x128xf32> to vector<4x32xf32>
    %32 = vector.extract_strided_slice %29 {offsets = [0, 96], sizes = [4, 32], strides = [1, 1]} : vector<4x128xf32> to vector<4x32xf32>
    %33 = vector.extract_strided_slice %24 {offsets = [0, 64], sizes = [4, 32], strides = [1, 1]} : vector<4x128xf32> to vector<4x32xf32>
    %34 = math.tanh %33 : vector<4x32xf32>
    %35 = arith.mulf %31, %13 : vector<4x32xf32>
    %36 = arith.mulf %30, %34 : vector<4x32xf32>
    %37 = arith.addf %35, %36 : vector<4x32xf32>
    %38 = math.tanh %37 : vector<4x32xf32>
    %39 = arith.mulf %32, %38 : vector<4x32xf32>
    %40 = vector.extract_strided_slice %39 {offsets = [0, 0], sizes = [2, 32], strides = [1, 1]} : vector<4x32xf32> to vector<2x32xf32>
    %c0_12 = arith.constant 0 : index
    %c0_13 = arith.constant 0 : index
    %c0_14 = arith.constant 0 : index
    %41 = vector.load %arg33[%c0_12, %c0_13, %c0_14] : memref<2x8x64xf32, #tpu.memory_space<vmem>>, vector<2x1x32xf32>
    %42 = vector.shape_cast %41 : vector<2x1x32xf32> to vector<2x32xf32>
    %43 = vector.shape_cast %40 : vector<2x32xf32> to vector<2x1x32xf32>
    tpu.vector_store %arg33[%c0_12, %c0_13, %c0_14], %43 {strides = array<i32>} : memref<2x8x64xf32, #tpu.memory_space<vmem>>, vector<2x1x32xf32>,
    %44 = vector.extract_strided_slice %39 {offsets = [2, 0], sizes = [2, 32], strides = [1, 1]} : vector<4x32xf32> to vector<2x32xf32>
    %c0_15 = arith.constant 0 : index
    %c7 = arith.constant 7 : index
    %c32 = arith.constant 32 : index
    %45 = vector.load %arg33[%c0_15, %c7, %c32] : memref<2x8x64xf32, #tpu.memory_space<vmem>>, vector<2x1x32xf32>
    %46 = vector.shape_cast %45 : vector<2x1x32xf32> to vector<2x32xf32>
    %47 = vector.shape_cast %44 : vector<2x32xf32> to vector<2x1x32xf32>
    tpu.vector_store %arg33[%c0_15, %c7, %c32], %47 {strides = array<i32>} : memref<2x8x64xf32, #tpu.memory_space<vmem>>, vector<2x1x32xf32>,
    %48 = arith.truncf %39 : vector<4x32xf32> to vector<4x32xbf16>
    %cst_16 = arith.constant dense<0.000000e+00> : vector<4x256xf32>
    %49 = tpu.matmul %48, %11, %cst_16 {dimension_numbers = #tpu.dot_dimension_numbers<[1], [0], [0], [1], [0, 0, 1, 1], [], []>} : vector<4x32xbf16>, vector<32x256xbf16>, vector<4x256xf32> -> vector<4x256xf32>
    %50 = vector.extract_strided_slice %10 {offsets = [0, 1, 0], sizes = [2, 1, 128], strides = [1, 1, 1]} : vector<2x8x256xf32> to vector<2x1x128xf32>
    %51 = vector.shape_cast %50 : vector<2x1x128xf32> to vector<2x128xf32>
    %52 = vector.extract_strided_slice %49 {offsets = [0, 0], sizes = [2, 128], strides = [1, 1]} : vector<4x256xf32> to vector<2x128xf32>
    %53 = arith.addf %51, %52 : vector<2x128xf32>
    %54 = vector.extract_strided_slice %10 {offsets = [0, 6, 128], sizes = [2, 1, 128], strides = [1, 1, 1]} : vector<2x8x256xf32> to vector<2x1x128xf32>
    %55 = vector.shape_cast %54 : vector<2x1x128xf32> to vector<2x128xf32>
    %56 = vector.extract_strided_slice %49 {offsets = [2, 128], sizes = [2, 128], strides = [1, 1]} : vector<4x256xf32> to vector<2x128xf32>
    %57 = arith.addf %55, %56 : vector<2x128xf32>
    %58 = tpu.concatenate %53, %57 in 0 : vector<2x128xf32>, vector<2x128xf32> -> vector<4x128xf32>
    %59 = arith.negf %58 : vector<4x128xf32>
    %60 = math.exp %59 : vector<4x128xf32>
    %cst_17 = arith.constant 1.000000e+00 : f32
    %61 = vector.broadcast %cst_17 : f32 to vector<4x128xf32>
    %62 = arith.addf %61, %60 : vector<4x128xf32>
    %63 = arith.divf %61, %62 : vector<4x128xf32>
    %64 = vector.extract_strided_slice %63 {offsets = [0, 0], sizes = [4, 32], strides = [1, 1]} : vector<4x128xf32> to vector<4x32xf32>
    %65 = vector.extract_strided_slice %63 {offsets = [0, 32], sizes = [4, 32], strides = [1, 1]} : vector<4x128xf32> to vector<4x32xf32>
    %66 = vector.extract_strided_slice %63 {offsets = [0, 96], sizes = [4, 32], strides = [1, 1]} : vector<4x128xf32> to vector<4x32xf32>
    %67 = vector.extract_strided_slice %58 {offsets = [0, 64], sizes = [4, 32], strides = [1, 1]} : vector<4x128xf32> to vector<4x32xf32>
    %68 = math.tanh %67 : vector<4x32xf32>
    %69 = arith.mulf %65, %37 : vector<4x32xf32>
    %70 = arith.mulf %64, %68 : vector<4x32xf32>
    %71 = arith.addf %69, %70 : vector<4x32xf32>
    %72 = math.tanh %71 : vector<4x32xf32>
    %73 = arith.mulf %66, %72 : vector<4x32xf32>
    %74 = vector.extract_strided_slice %73 {offsets = [0, 0], sizes = [2, 32], strides = [1, 1]} : vector<4x32xf32> to vector<2x32xf32>
    %c0_18 = arith.constant 0 : index
    %c1 = arith.constant 1 : index
    %c0_19 = arith.constant 0 : index
    %75 = vector.load %arg33[%c0_18, %c1, %c0_19] : memref<2x8x64xf32, #tpu.memory_space<vmem>>, vector<2x1x32xf32>
    %76 = vector.shape_cast %75 : vector<2x1x32xf32> to vector<2x32xf32>
    %77 = vector.shape_cast %74 : vector<2x32xf32> to vector<2x1x32xf32>
    tpu.vector_store %arg33[%c0_18, %c1, %c0_19], %77 {strides = array<i32>} : memref<2x8x64xf32, #tpu.memory_space<vmem>>, vector<2x1x32xf32>,
    %78 = vector.extract_strided_slice %73 {offsets = [2, 0], sizes = [2, 32], strides = [1, 1]} : vector<4x32xf32> to vector<2x32xf32>
    %c0_20 = arith.constant 0 : index
    %c6 = arith.constant 6 : index
    %c32_21 = arith.constant 32 : index
    %79 = vector.load %arg33[%c0_20, %c6, %c32_21] : memref<2x8x64xf32, #tpu.memory_space<vmem>>, vector<2x1x32xf32>
    %80 = vector.shape_cast %79 : vector<2x1x32xf32> to vector<2x32xf32>
    %81 = vector.shape_cast %78 : vector<2x32xf32> to vector<2x1x32xf32>
    tpu.vector_store %arg33[%c0_20, %c6, %c32_21], %81 {strides = array<i32>} : memref<2x8x64xf32, #tpu.memory_space<vmem>>, vector<2x1x32xf32>,
    %82 = arith.truncf %73 : vector<4x32xf32> to vector<4x32xbf16>
    %cst_22 = arith.constant dense<0.000000e+00> : vector<4x256xf32>
    %83 = tpu.matmul %82, %11, %cst_22 {dimension_numbers = #tpu.dot_dimension_numbers<[1], [0], [0], [1], [0, 0, 1, 1], [], []>} : vector<4x32xbf16>, vector<32x256xbf16>, vector<4x256xf32> -> vector<4x256xf32>
    %84 = vector.extract_strided_slice %10 {offsets = [0, 2, 0], sizes = [2, 1, 128], strides = [1, 1, 1]} : vector<2x8x256xf32> to vector<2x1x128xf32>
    %85 = vector.shape_cast %84 : vector<2x1x128xf32> to vector<2x128xf32>
    %86 = vector.extract_strided_slice %83 {offsets = [0, 0], sizes = [2, 128], strides = [1, 1]} : vector<4x256xf32> to vector<2x128xf32>
    %87 = arith.addf %85, %86 : vector<2x128xf32>
    %88 = vector.extract_strided_slice %10 {offsets = [0, 5, 128], sizes = [2, 1, 128], strides = [1, 1, 1]} : vector<2x8x256xf32> to vector<2x1x128xf32>
    %89 = vector.shape_cast %88 : vector<2x1x128xf32> to vector<2x128xf32>
    %90 = vector.extract_strided_slice %83 {offsets = [2, 128], sizes = [2, 128], strides = [1, 1]} : vector<4x256xf32> to vector<2x128xf32>
    %91 = arith.addf %89, %90 : vector<2x128xf32>
    %92 = tpu.concatenate %87, %91 in 0 : vector<2x128xf32>, vector<2x128xf32> -> vector<4x128xf32>
    %93 = arith.negf %92 : vector<4x128xf32>
    %94 = math.exp %93 : vector<4x128xf32>
    %cst_23 = arith.constant 1.000000e+00 : f32
    %95 = vector.broadcast %cst_23 : f32 to vector<4x128xf32>
    %96 = arith.addf %95, %94 : vector<4x128xf32>
    %97 = arith.divf %95, %96 : vector<4x128xf32>
    %98 = vector.extract_strided_slice %97 {offsets = [0, 0], sizes = [4, 32], strides = [1, 1]} : vector<4x128xf32> to vector<4x32xf32>
    %99 = vector.extract_strided_slice %97 {offsets = [0, 32], sizes = [4, 32], strides = [1, 1]} : vector<4x128xf32> to vector<4x32xf32>
    %100 = vector.extract_strided_slice %97 {offsets = [0, 96], sizes = [4, 32], strides = [1, 1]} : vector<4x128xf32> to vector<4x32xf32>
    %101 = vector.extract_strided_slice %92 {offsets = [0, 64], sizes = [4, 32], strides = [1, 1]} : vector<4x128xf32> to vector<4x32xf32>
    %102 = math.tanh %101 : vector<4x32xf32>
    %103 = arith.mulf %99, %71 : vector<4x32xf32>
    %104 = arith.mulf %98, %102 : vector<4x32xf32>
    %105 = arith.addf %103, %104 : vector<4x32xf32>
    %106 = math.tanh %105 : vector<4x32xf32>
    %107 = arith.mulf %100, %106 : vector<4x32xf32>
    %108 = vector.extract_strided_slice %107 {offsets = [0, 0], sizes = [2, 32], strides = [1, 1]} : vector<4x32xf32> to vector<2x32xf32>
    %c0_24 = arith.constant 0 : index
    %c2 = arith.constant 2 : index
    %c0_25 = arith.constant 0 : index
    %109 = vector.load %arg33[%c0_24, %c2, %c0_25] : memref<2x8x64xf32, #tpu.memory_space<vmem>>, vector<2x1x32xf32>
    %110 = vector.shape_cast %109 : vector<2x1x32xf32> to vector<2x32xf32>
    %111 = vector.shape_cast %108 : vector<2x32xf32> to vector<2x1x32xf32>
    tpu.vector_store %arg33[%c0_24, %c2, %c0_25], %111 {strides = array<i32>} : memref<2x8x64xf32, #tpu.memory_space<vmem>>, vector<2x1x32xf32>,
    %112 = vector.extract_strided_slice %107 {offsets = [2, 0], sizes = [2, 32], strides = [1, 1]} : vector<4x32xf32> to vector<2x32xf32>
    %c0_26 = arith.constant 0 : index
    %c5 = arith.constant 5 : index
    %c32_27 = arith.constant 32 : index
    %113 = vector.load %arg33[%c0_26, %c5, %c32_27] : memref<2x8x64xf32, #tpu.memory_space<vmem>>, vector<2x1x32xf32>
    %114 = vector.shape_cast %113 : vector<2x1x32xf32> to vector<2x32xf32>
    %115 = vector.shape_cast %112 : vector<2x32xf32> to vector<2x1x32xf32>
    tpu.vector_store %arg33[%c0_26, %c5, %c32_27], %115 {strides = array<i32>} : memref<2x8x64xf32, #tpu.memory_space<vmem>>, vector<2x1x32xf32>,
    %116 = arith.truncf %107 : vector<4x32xf32> to vector<4x32xbf16>
    %cst_28 = arith.constant dense<0.000000e+00> : vector<4x256xf32>
    %117 = tpu.matmul %116, %11, %cst_28 {dimension_numbers = #tpu.dot_dimension_numbers<[1], [0], [0], [1], [0, 0, 1, 1], [], []>} : vector<4x32xbf16>, vector<32x256xbf16>, vector<4x256xf32> -> vector<4x256xf32>
    %118 = vector.extract_strided_slice %10 {offsets = [0, 3, 0], sizes = [2, 1, 128], strides = [1, 1, 1]} : vector<2x8x256xf32> to vector<2x1x128xf32>
    %119 = vector.shape_cast %118 : vector<2x1x128xf32> to vector<2x128xf32>
    %120 = vector.extract_strided_slice %117 {offsets = [0, 0], sizes = [2, 128], strides = [1, 1]} : vector<4x256xf32> to vector<2x128xf32>
    %121 = arith.addf %119, %120 : vector<2x128xf32>
    %122 = vector.extract_strided_slice %10 {offsets = [0, 4, 128], sizes = [2, 1, 128], strides = [1, 1, 1]} : vector<2x8x256xf32> to vector<2x1x128xf32>
    %123 = vector.shape_cast %122 : vector<2x1x128xf32> to vector<2x128xf32>
    %124 = vector.extract_strided_slice %117 {offsets = [2, 128], sizes = [2, 128], strides = [1, 1]} : vector<4x256xf32> to vector<2x128xf32>
    %125 = arith.addf %123, %124 : vector<2x128xf32>
    %126 = tpu.concatenate %121, %125 in 0 : vector<2x128xf32>, vector<2x128xf32> -> vector<4x128xf32>
    %127 = arith.negf %126 : vector<4x128xf32>
    %128 = math.exp %127 : vector<4x128xf32>
    %cst_29 = arith.constant 1.000000e+00 : f32
    %129 = vector.broadcast %cst_29 : f32 to vector<4x128xf32>
    %130 = arith.addf %129, %128 : vector<4x128xf32>
    %131 = arith.divf %129, %130 : vector<4x128xf32>
    %132 = vector.extract_strided_slice %131 {offsets = [0, 0], sizes = [4, 32], strides = [1, 1]} : vector<4x128xf32> to vector<4x32xf32>
    %133 = vector.extract_strided_slice %131 {offsets = [0, 32], sizes = [4, 32], strides = [1, 1]} : vector<4x128xf32> to vector<4x32xf32>
    %134 = vector.extract_strided_slice %131 {offsets = [0, 96], sizes = [4, 32], strides = [1, 1]} : vector<4x128xf32> to vector<4x32xf32>
    %135 = vector.extract_strided_slice %126 {offsets = [0, 64], sizes = [4, 32], strides = [1, 1]} : vector<4x128xf32> to vector<4x32xf32>
    %136 = math.tanh %135 : vector<4x32xf32>
    %137 = arith.mulf %133, %105 : vector<4x32xf32>
    %138 = arith.mulf %132, %136 : vector<4x32xf32>
    %139 = arith.addf %137, %138 : vector<4x32xf32>
    %140 = math.tanh %139 : vector<4x32xf32>
    %141 = arith.mulf %134, %140 : vector<4x32xf32>
    %142 = vector.extract_strided_slice %141 {offsets = [0, 0], sizes = [2, 32], strides = [1, 1]} : vector<4x32xf32> to vector<2x32xf32>
    %c0_30 = arith.constant 0 : index
    %c3 = arith.constant 3 : index
    %c0_31 = arith.constant 0 : index
    %143 = vector.load %arg33[%c0_30, %c3, %c0_31] : memref<2x8x64xf32, #tpu.memory_space<vmem>>, vector<2x1x32xf32>
    %144 = vector.shape_cast %143 : vector<2x1x32xf32> to vector<2x32xf32>
    %145 = vector.shape_cast %142 : vector<2x32xf32> to vector<2x1x32xf32>
    tpu.vector_store %arg33[%c0_30, %c3, %c0_31], %145 {strides = array<i32>} : memref<2x8x64xf32, #tpu.memory_space<vmem>>, vector<2x1x32xf32>,
    %146 = vector.extract_strided_slice %141 {offsets = [2, 0], sizes = [2, 32], strides = [1, 1]} : vector<4x32xf32> to vector<2x32xf32>
    %c0_32 = arith.constant 0 : index
    %c4 = arith.constant 4 : index
    %c32_33 = arith.constant 32 : index
    %147 = vector.load %arg33[%c0_32, %c4, %c32_33] : memref<2x8x64xf32, #tpu.memory_space<vmem>>, vector<2x1x32xf32>
    %148 = vector.shape_cast %147 : vector<2x1x32xf32> to vector<2x32xf32>
    %149 = vector.shape_cast %146 : vector<2x32xf32> to vector<2x1x32xf32>
    tpu.vector_store %arg33[%c0_32, %c4, %c32_33], %149 {strides = array<i32>} : memref<2x8x64xf32, #tpu.memory_space<vmem>>, vector<2x1x32xf32>,
    %150 = arith.truncf %141 : vector<4x32xf32> to vector<4x32xbf16>
    %cst_34 = arith.constant dense<0.000000e+00> : vector<4x256xf32>
    %151 = tpu.matmul %150, %11, %cst_34 {dimension_numbers = #tpu.dot_dimension_numbers<[1], [0], [0], [1], [0, 0, 1, 1], [], []>} : vector<4x32xbf16>, vector<32x256xbf16>, vector<4x256xf32> -> vector<4x256xf32>
    %152 = vector.extract_strided_slice %10 {offsets = [0, 4, 0], sizes = [2, 1, 128], strides = [1, 1, 1]} : vector<2x8x256xf32> to vector<2x1x128xf32>
    %153 = vector.shape_cast %152 : vector<2x1x128xf32> to vector<2x128xf32>
    %154 = vector.extract_strided_slice %151 {offsets = [0, 0], sizes = [2, 128], strides = [1, 1]} : vector<4x256xf32> to vector<2x128xf32>
    %155 = arith.addf %153, %154 : vector<2x128xf32>
    %156 = vector.extract_strided_slice %10 {offsets = [0, 3, 128], sizes = [2, 1, 128], strides = [1, 1, 1]} : vector<2x8x256xf32> to vector<2x1x128xf32>
    %157 = vector.shape_cast %156 : vector<2x1x128xf32> to vector<2x128xf32>
    %158 = vector.extract_strided_slice %151 {offsets = [2, 128], sizes = [2, 128], strides = [1, 1]} : vector<4x256xf32> to vector<2x128xf32>
    %159 = arith.addf %157, %158 : vector<2x128xf32>
    %160 = tpu.concatenate %155, %159 in 0 : vector<2x128xf32>, vector<2x128xf32> -> vector<4x128xf32>
    %161 = arith.negf %160 : vector<4x128xf32>
    %162 = math.exp %161 : vector<4x128xf32>
    %cst_35 = arith.constant 1.000000e+00 : f32
    %163 = vector.broadcast %cst_35 : f32 to vector<4x128xf32>
    %164 = arith.addf %163, %162 : vector<4x128xf32>
    %165 = arith.divf %163, %164 : vector<4x128xf32>
    %166 = vector.extract_strided_slice %165 {offsets = [0, 0], sizes = [4, 32], strides = [1, 1]} : vector<4x128xf32> to vector<4x32xf32>
    %167 = vector.extract_strided_slice %165 {offsets = [0, 32], sizes = [4, 32], strides = [1, 1]} : vector<4x128xf32> to vector<4x32xf32>
    %168 = vector.extract_strided_slice %165 {offsets = [0, 96], sizes = [4, 32], strides = [1, 1]} : vector<4x128xf32> to vector<4x32xf32>
    %169 = vector.extract_strided_slice %160 {offsets = [0, 64], sizes = [4, 32], strides = [1, 1]} : vector<4x128xf32> to vector<4x32xf32>
    %170 = math.tanh %169 : vector<4x32xf32>
    %171 = arith.mulf %167, %139 : vector<4x32xf32>
    %172 = arith.mulf %166, %170 : vector<4x32xf32>
    %173 = arith.addf %171, %172 : vector<4x32xf32>
    %174 = math.tanh %173 : vector<4x32xf32>
    %175 = arith.mulf %168, %174 : vector<4x32xf32>
    %176 = vector.extract_strided_slice %175 {offsets = [0, 0], sizes = [2, 32], strides = [1, 1]} : vector<4x32xf32> to vector<2x32xf32>
    %c0_36 = arith.constant 0 : index
    %c4_37 = arith.constant 4 : index
    %c0_38 = arith.constant 0 : index
    %177 = vector.load %arg33[%c0_36, %c4_37, %c0_38] : memref<2x8x64xf32, #tpu.memory_space<vmem>>, vector<2x1x32xf32>
    %178 = vector.shape_cast %177 : vector<2x1x32xf32> to vector<2x32xf32>
    %179 = vector.shape_cast %176 : vector<2x32xf32> to vector<2x1x32xf32>
    tpu.vector_store %arg33[%c0_36, %c4_37, %c0_38], %179 {strides = array<i32>} : memref<2x8x64xf32, #tpu.memory_space<vmem>>, vector<2x1x32xf32>,
    %180 = vector.extract_strided_slice %175 {offsets = [2, 0], sizes = [2, 32], strides = [1, 1]} : vector<4x32xf32> to vector<2x32xf32>
    %c0_39 = arith.constant 0 : index
    %c3_40 = arith.constant 3 : index
    %c32_41 = arith.constant 32 : index
    %181 = vector.load %arg33[%c0_39, %c3_40, %c32_41] : memref<2x8x64xf32, #tpu.memory_space<vmem>>, vector<2x1x32xf32>
    %182 = vector.shape_cast %181 : vector<2x1x32xf32> to vector<2x32xf32>
    %183 = vector.shape_cast %180 : vector<2x32xf32> to vector<2x1x32xf32>
    tpu.vector_store %arg33[%c0_39, %c3_40, %c32_41], %183 {strides = array<i32>} : memref<2x8x64xf32, #tpu.memory_space<vmem>>, vector<2x1x32xf32>,
    %184 = arith.truncf %175 : vector<4x32xf32> to vector<4x32xbf16>
    %cst_42 = arith.constant dense<0.000000e+00> : vector<4x256xf32>
    %185 = tpu.matmul %184, %11, %cst_42 {dimension_numbers = #tpu.dot_dimension_numbers<[1], [0], [0], [1], [0, 0, 1, 1], [], []>} : vector<4x32xbf16>, vector<32x256xbf16>, vector<4x256xf32> -> vector<4x256xf32>
    %186 = vector.extract_strided_slice %10 {offsets = [0, 5, 0], sizes = [2, 1, 128], strides = [1, 1, 1]} : vector<2x8x256xf32> to vector<2x1x128xf32>
    %187 = vector.shape_cast %186 : vector<2x1x128xf32> to vector<2x128xf32>
    %188 = vector.extract_strided_slice %185 {offsets = [0, 0], sizes = [2, 128], strides = [1, 1]} : vector<4x256xf32> to vector<2x128xf32>
    %189 = arith.addf %187, %188 : vector<2x128xf32>
    %190 = vector.extract_strided_slice %10 {offsets = [0, 2, 128], sizes = [2, 1, 128], strides = [1, 1, 1]} : vector<2x8x256xf32> to vector<2x1x128xf32>
    %191 = vector.shape_cast %190 : vector<2x1x128xf32> to vector<2x128xf32>
    %192 = vector.extract_strided_slice %185 {offsets = [2, 128], sizes = [2, 128], strides = [1, 1]} : vector<4x256xf32> to vector<2x128xf32>
    %193 = arith.addf %191, %192 : vector<2x128xf32>
    %194 = tpu.concatenate %189, %193 in 0 : vector<2x128xf32>, vector<2x128xf32> -> vector<4x128xf32>
    %195 = arith.negf %194 : vector<4x128xf32>
    %196 = math.exp %195 : vector<4x128xf32>
    %cst_43 = arith.constant 1.000000e+00 : f32
    %197 = vector.broadcast %cst_43 : f32 to vector<4x128xf32>
    %198 = arith.addf %197, %196 : vector<4x128xf32>
    %199 = arith.divf %197, %198 : vector<4x128xf32>
    %200 = vector.extract_strided_slice %199 {offsets = [0, 0], sizes = [4, 32], strides = [1, 1]} : vector<4x128xf32> to vector<4x32xf32>
    %201 = vector.extract_strided_slice %199 {offsets = [0, 32], sizes = [4, 32], strides = [1, 1]} : vector<4x128xf32> to vector<4x32xf32>
    %202 = vector.extract_strided_slice %199 {offsets = [0, 96], sizes = [4, 32], strides = [1, 1]} : vector<4x128xf32> to vector<4x32xf32>
    %203 = vector.extract_strided_slice %194 {offsets = [0, 64], sizes = [4, 32], strides = [1, 1]} : vector<4x128xf32> to vector<4x32xf32>
    %204 = math.tanh %203 : vector<4x32xf32>
    %205 = arith.mulf %201, %173 : vector<4x32xf32>
    %206 = arith.mulf %200, %204 : vector<4x32xf32>
    %207 = arith.addf %205, %206 : vector<4x32xf32>
    %208 = math.tanh %207 : vector<4x32xf32>
    %209 = arith.mulf %202, %208 : vector<4x32xf32>
    %210 = vector.extract_strided_slice %209 {offsets = [0, 0], sizes = [2, 32], strides = [1, 1]} : vector<4x32xf32> to vector<2x32xf32>
    %c0_44 = arith.constant 0 : index
    %c5_45 = arith.constant 5 : index
    %c0_46 = arith.constant 0 : index
    %211 = vector.load %arg33[%c0_44, %c5_45, %c0_46] : memref<2x8x64xf32, #tpu.memory_space<vmem>>, vector<2x1x32xf32>
    %212 = vector.shape_cast %211 : vector<2x1x32xf32> to vector<2x32xf32>
    %213 = vector.shape_cast %210 : vector<2x32xf32> to vector<2x1x32xf32>
    tpu.vector_store %arg33[%c0_44, %c5_45, %c0_46], %213 {strides = array<i32>} : memref<2x8x64xf32, #tpu.memory_space<vmem>>, vector<2x1x32xf32>,
    %214 = vector.extract_strided_slice %209 {offsets = [2, 0], sizes = [2, 32], strides = [1, 1]} : vector<4x32xf32> to vector<2x32xf32>
    %c0_47 = arith.constant 0 : index
    %c2_48 = arith.constant 2 : index
    %c32_49 = arith.constant 32 : index
    %215 = vector.load %arg33[%c0_47, %c2_48, %c32_49] : memref<2x8x64xf32, #tpu.memory_space<vmem>>, vector<2x1x32xf32>
    %216 = vector.shape_cast %215 : vector<2x1x32xf32> to vector<2x32xf32>
    %217 = vector.shape_cast %214 : vector<2x32xf32> to vector<2x1x32xf32>
    tpu.vector_store %arg33[%c0_47, %c2_48, %c32_49], %217 {strides = array<i32>} : memref<2x8x64xf32, #tpu.memory_space<vmem>>, vector<2x1x32xf32>,
    %218 = arith.truncf %209 : vector<4x32xf32> to vector<4x32xbf16>
    %cst_50 = arith.constant dense<0.000000e+00> : vector<4x256xf32>
    %219 = tpu.matmul %218, %11, %cst_50 {dimension_numbers = #tpu.dot_dimension_numbers<[1], [0], [0], [1], [0, 0, 1, 1], [], []>} : vector<4x32xbf16>, vector<32x256xbf16>, vector<4x256xf32> -> vector<4x256xf32>
    %220 = vector.extract_strided_slice %10 {offsets = [0, 6, 0], sizes = [2, 1, 128], strides = [1, 1, 1]} : vector<2x8x256xf32> to vector<2x1x128xf32>
    %221 = vector.shape_cast %220 : vector<2x1x128xf32> to vector<2x128xf32>
    %222 = vector.extract_strided_slice %219 {offsets = [0, 0], sizes = [2, 128], strides = [1, 1]} : vector<4x256xf32> to vector<2x128xf32>
    %223 = arith.addf %221, %222 : vector<2x128xf32>
    %224 = vector.extract_strided_slice %10 {offsets = [0, 1, 128], sizes = [2, 1, 128], strides = [1, 1, 1]} : vector<2x8x256xf32> to vector<2x1x128xf32>
    %225 = vector.shape_cast %224 : vector<2x1x128xf32> to vector<2x128xf32>
    %226 = vector.extract_strided_slice %219 {offsets = [2, 128], sizes = [2, 128], strides = [1, 1]} : vector<4x256xf32> to vector<2x128xf32>
    %227 = arith.addf %225, %226 : vector<2x128xf32>
    %228 = tpu.concatenate %223, %227 in 0 : vector<2x128xf32>, vector<2x128xf32> -> vector<4x128xf32>
    %229 = arith.negf %228 : vector<4x128xf32>
    %230 = math.exp %229 : vector<4x128xf32>
    %cst_51 = arith.constant 1.000000e+00 : f32
    %231 = vector.broadcast %cst_51 : f32 to vector<4x128xf32>
    %232 = arith.addf %231, %230 : vector<4x128xf32>
    %233 = arith.divf %231, %232 : vector<4x128xf32>
    %234 = vector.extract_strided_slice %233 {offsets = [0, 0], sizes = [4, 32], strides = [1, 1]} : vector<4x128xf32> to vector<4x32xf32>
    %235 = vector.extract_strided_slice %233 {offsets = [0, 32], sizes = [4, 32], strides = [1, 1]} : vector<4x128xf32> to vector<4x32xf32>
    %236 = vector.extract_strided_slice %233 {offsets = [0, 96], sizes = [4, 32], strides = [1, 1]} : vector<4x128xf32> to vector<4x32xf32>
    %237 = vector.extract_strided_slice %228 {offsets = [0, 64], sizes = [4, 32], strides = [1, 1]} : vector<4x128xf32> to vector<4x32xf32>
    %238 = math.tanh %237 : vector<4x32xf32>
    %239 = arith.mulf %235, %207 : vector<4x32xf32>
    %240 = arith.mulf %234, %238 : vector<4x32xf32>
    %241 = arith.addf %239, %240 : vector<4x32xf32>
    %242 = math.tanh %241 : vector<4x32xf32>
    %243 = arith.mulf %236, %242 : vector<4x32xf32>
    %244 = vector.extract_strided_slice %243 {offsets = [0, 0], sizes = [2, 32], strides = [1, 1]} : vector<4x32xf32> to vector<2x32xf32>
    %c0_52 = arith.constant 0 : index
    %c6_53 = arith.constant 6 : index
    %c0_54 = arith.constant 0 : index
    %245 = vector.load %arg33[%c0_52, %c6_53, %c0_54] : memref<2x8x64xf32, #tpu.memory_space<vmem>>, vector<2x1x32xf32>
    %246 = vector.shape_cast %245 : vector<2x1x32xf32> to vector<2x32xf32>
    %247 = vector.shape_cast %244 : vector<2x32xf32> to vector<2x1x32xf32>
    tpu.vector_store %arg33[%c0_52, %c6_53, %c0_54], %247 {strides = array<i32>} : memref<2x8x64xf32, #tpu.memory_space<vmem>>, vector<2x1x32xf32>,
    %248 = vector.extract_strided_slice %243 {offsets = [2, 0], sizes = [2, 32], strides = [1, 1]} : vector<4x32xf32> to vector<2x32xf32>
    %c0_55 = arith.constant 0 : index
    %c1_56 = arith.constant 1 : index
    %c32_57 = arith.constant 32 : index
    %249 = vector.load %arg33[%c0_55, %c1_56, %c32_57] : memref<2x8x64xf32, #tpu.memory_space<vmem>>, vector<2x1x32xf32>
    %250 = vector.shape_cast %249 : vector<2x1x32xf32> to vector<2x32xf32>
    %251 = vector.shape_cast %248 : vector<2x32xf32> to vector<2x1x32xf32>
    tpu.vector_store %arg33[%c0_55, %c1_56, %c32_57], %251 {strides = array<i32>} : memref<2x8x64xf32, #tpu.memory_space<vmem>>, vector<2x1x32xf32>,
    %252 = arith.truncf %243 : vector<4x32xf32> to vector<4x32xbf16>
    %cst_58 = arith.constant dense<0.000000e+00> : vector<4x256xf32>
    %253 = tpu.matmul %252, %11, %cst_58 {dimension_numbers = #tpu.dot_dimension_numbers<[1], [0], [0], [1], [0, 0, 1, 1], [], []>} : vector<4x32xbf16>, vector<32x256xbf16>, vector<4x256xf32> -> vector<4x256xf32>
    %254 = vector.extract_strided_slice %10 {offsets = [0, 7, 0], sizes = [2, 1, 128], strides = [1, 1, 1]} : vector<2x8x256xf32> to vector<2x1x128xf32>
    %255 = vector.shape_cast %254 : vector<2x1x128xf32> to vector<2x128xf32>
    %256 = vector.extract_strided_slice %253 {offsets = [0, 0], sizes = [2, 128], strides = [1, 1]} : vector<4x256xf32> to vector<2x128xf32>
    %257 = arith.addf %255, %256 : vector<2x128xf32>
    %258 = vector.extract_strided_slice %10 {offsets = [0, 0, 128], sizes = [2, 1, 128], strides = [1, 1, 1]} : vector<2x8x256xf32> to vector<2x1x128xf32>
    %259 = vector.shape_cast %258 : vector<2x1x128xf32> to vector<2x128xf32>
    %260 = vector.extract_strided_slice %253 {offsets = [2, 128], sizes = [2, 128], strides = [1, 1]} : vector<4x256xf32> to vector<2x128xf32>
    %261 = arith.addf %259, %260 : vector<2x128xf32>
    %262 = tpu.concatenate %257, %261 in 0 : vector<2x128xf32>, vector<2x128xf32> -> vector<4x128xf32>
    %263 = arith.negf %262 : vector<4x128xf32>
    %264 = math.exp %263 : vector<4x128xf32>
    %cst_59 = arith.constant 1.000000e+00 : f32
    %265 = vector.broadcast %cst_59 : f32 to vector<4x128xf32>
    %266 = arith.addf %265, %264 : vector<4x128xf32>
    %267 = arith.divf %265, %266 : vector<4x128xf32>
    %268 = vector.extract_strided_slice %267 {offsets = [0, 0], sizes = [4, 32], strides = [1, 1]} : vector<4x128xf32> to vector<4x32xf32>
    %269 = vector.extract_strided_slice %267 {offsets = [0, 32], sizes = [4, 32], strides = [1, 1]} : vector<4x128xf32> to vector<4x32xf32>
    %270 = vector.extract_strided_slice %267 {offsets = [0, 96], sizes = [4, 32], strides = [1, 1]} : vector<4x128xf32> to vector<4x32xf32>
    %271 = vector.extract_strided_slice %262 {offsets = [0, 64], sizes = [4, 32], strides = [1, 1]} : vector<4x128xf32> to vector<4x32xf32>
    %272 = math.tanh %271 : vector<4x32xf32>
    %273 = arith.mulf %269, %241 : vector<4x32xf32>
    %274 = arith.mulf %268, %272 : vector<4x32xf32>
    %275 = arith.addf %273, %274 : vector<4x32xf32>
    %276 = math.tanh %275 : vector<4x32xf32>
    %277 = arith.mulf %270, %276 : vector<4x32xf32>
    %278 = vector.extract_strided_slice %277 {offsets = [0, 0], sizes = [2, 32], strides = [1, 1]} : vector<4x32xf32> to vector<2x32xf32>
    %c0_60 = arith.constant 0 : index
    %c7_61 = arith.constant 7 : index
    %c0_62 = arith.constant 0 : index
    %279 = vector.load %arg33[%c0_60, %c7_61, %c0_62] : memref<2x8x64xf32, #tpu.memory_space<vmem>>, vector<2x1x32xf32>
    %280 = vector.shape_cast %279 : vector<2x1x32xf32> to vector<2x32xf32>
    %281 = vector.shape_cast %278 : vector<2x32xf32> to vector<2x1x32xf32>
    tpu.vector_store %arg33[%c0_60, %c7_61, %c0_62], %281 {strides = array<i32>} : memref<2x8x64xf32, #tpu.memory_space<vmem>>, vector<2x1x32xf32>,
    %282 = vector.extract_strided_slice %277 {offsets = [2, 0], sizes = [2, 32], strides = [1, 1]} : vector<4x32xf32> to vector<2x32xf32>
    %c0_63 = arith.constant 0 : index
    %c0_64 = arith.constant 0 : index
    %c32_65 = arith.constant 32 : index
    %283 = vector.load %arg33[%c0_63, %c0_64, %c32_65] : memref<2x8x64xf32, #tpu.memory_space<vmem>>, vector<2x1x32xf32>
    %284 = vector.shape_cast %283 : vector<2x1x32xf32> to vector<2x32xf32>
    %285 = vector.shape_cast %282 : vector<2x32xf32> to vector<2x1x32xf32>
    tpu.vector_store %arg33[%c0_63, %c0_64, %c32_65], %285 {strides = array<i32>} : memref<2x8x64xf32, #tpu.memory_space<vmem>>, vector<2x1x32xf32>,
    %c0_66 = arith.constant 0 : index
    %c0_67 = arith.constant 0 : index
    %c0_68 = arith.constant 0 : index
    %286 = vector.load %arg33[%c0_66, %c0_67, %c0_68] : memref<2x8x64xf32, #tpu.memory_space<vmem>>, vector<2x8x64xf32>
    %c0_69 = arith.constant 0 : index
    %c0_70 = arith.constant 0 : index
    %287 = vector.load %arg4[%c0_69, %c0_70] : memref<64x256xf32, #tpu.memory_space<vmem>>, vector<64x256xf32>
    %c0_71 = arith.constant 0 : index
    %c0_72 = arith.constant 0 : index
    %288 = vector.load %arg5[%c0_71, %c0_72] : memref<32x256xf32, #tpu.memory_space<vmem>>, vector<32x256xf32>
    %c0_73 = arith.constant 0 : index
    %c0_74 = arith.constant 0 : index
    %289 = vector.load %arg6[%c0_73, %c0_74] : memref<1x256xf32, #tpu.memory_space<vmem>>, vector<1x256xf32>
    %290 = vector.shape_cast %286 : vector<2x8x64xf32> to vector<16x64xf32>
    %291 = arith.truncf %290 : vector<16x64xf32> to vector<16x64xbf16>
    %292 = arith.truncf %287 : vector<64x256xf32> to vector<64x256xbf16>
    %cst_75 = arith.constant dense<0.000000e+00> : vector<16x256xf32>
    %293 = tpu.matmul %291, %292, %cst_75 {dimension_numbers = #tpu.dot_dimension_numbers<[1], [0], [0], [1], [0, 0, 1, 1], [], []>} : vector<16x64xbf16>, vector<64x256xbf16>, vector<16x256xf32> -> vector<16x256xf32>
    %294 = vector.broadcast %289 : vector<1x256xf32> to vector<16x256xf32>
    %295 = arith.addf %293, %294 : vector<16x256xf32>
    %296 = vector.shape_cast %295 : vector<16x256xf32> to vector<2x8x256xf32>
    %297 = arith.truncf %288 : vector<32x256xf32> to vector<32x256xbf16>
    %cst_76 = arith.constant 0.000000e+00 : f32
    %298 = vector.broadcast %cst_76 : f32 to vector<4x32xf32>
    %cst_77 = arith.constant 0.000000e+00 : f32
    %299 = vector.broadcast %cst_77 : f32 to vector<4x32xf32>
    %300 = arith.truncf %298 : vector<4x32xf32> to vector<4x32xbf16>
    %cst_78 = arith.constant dense<0.000000e+00> : vector<4x256xf32>
    %301 = tpu.matmul %300, %297, %cst_78 {dimension_numbers = #tpu.dot_dimension_numbers<[1], [0], [0], [1], [0, 0, 1, 1], [], []>} : vector<4x32xbf16>, vector<32x256xbf16>, vector<4x256xf32> -> vector<4x256xf32>
    %302 = vector.extract_strided_slice %296 {offsets = [0, 0, 0], sizes = [2, 1, 128], strides = [1, 1, 1]} : vector<2x8x256xf32> to vector<2x1x128xf32>
    %303 = vector.shape_cast %302 : vector<2x1x128xf32> to vector<2x128xf32>
    %304 = vector.extract_strided_slice %301 {offsets = [0, 0], sizes = [2, 128], strides = [1, 1]} : vector<4x256xf32> to vector<2x128xf32>
    %305 = arith.addf %303, %304 : vector<2x128xf32>
    %306 = vector.extract_strided_slice %296 {offsets = [0, 7, 128], sizes = [2, 1, 128], strides = [1, 1, 1]} : vector<2x8x256xf32> to vector<2x1x128xf32>
    %307 = vector.shape_cast %306 : vector<2x1x128xf32> to vector<2x128xf32>
    %308 = vector.extract_strided_slice %301 {offsets = [2, 128], sizes = [2, 128], strides = [1, 1]} : vector<4x256xf32> to vector<2x128xf32>
    %309 = arith.addf %307, %308 : vector<2x128xf32>
    %310 = tpu.concatenate %305, %309 in 0 : vector<2x128xf32>, vector<2x128xf32> -> vector<4x128xf32>
    %311 = arith.negf %310 : vector<4x128xf32>
    %312 = math.exp %311 : vector<4x128xf32>
    %cst_79 = arith.constant 1.000000e+00 : f32
    %313 = vector.broadcast %cst_79 : f32 to vector<4x128xf32>
    %314 = arith.addf %313, %312 : vector<4x128xf32>
    %315 = arith.divf %313, %314 : vector<4x128xf32>
    %316 = vector.extract_strided_slice %315 {offsets = [0, 0], sizes = [4, 32], strides = [1, 1]} : vector<4x128xf32> to vector<4x32xf32>
    %317 = vector.extract_strided_slice %315 {offsets = [0, 32], sizes = [4, 32], strides = [1, 1]} : vector<4x128xf32> to vector<4x32xf32>
    %318 = vector.extract_strided_slice %315 {offsets = [0, 96], sizes = [4, 32], strides = [1, 1]} : vector<4x128xf32> to vector<4x32xf32>
    %319 = vector.extract_strided_slice %310 {offsets = [0, 64], sizes = [4, 32], strides = [1, 1]} : vector<4x128xf32> to vector<4x32xf32>
    %320 = math.tanh %319 : vector<4x32xf32>
    %321 = arith.mulf %317, %299 : vector<4x32xf32>
    %322 = arith.mulf %316, %320 : vector<4x32xf32>
    %323 = arith.addf %321, %322 : vector<4x32xf32>
    %324 = math.tanh %323 : vector<4x32xf32>
    %325 = arith.mulf %318, %324 : vector<4x32xf32>
    %326 = vector.extract_strided_slice %325 {offsets = [0, 0], sizes = [2, 32], strides = [1, 1]} : vector<4x32xf32> to vector<2x32xf32>
    %c0_80 = arith.constant 0 : index
    %c0_81 = arith.constant 0 : index
    %c0_82 = arith.constant 0 : index
    %327 = vector.load %arg33[%c0_80, %c0_81, %c0_82] : memref<2x8x64xf32, #tpu.memory_space<vmem>>, vector<2x1x32xf32>
    %328 = vector.shape_cast %327 : vector<2x1x32xf32> to vector<2x32xf32>
    %329 = vector.shape_cast %326 : vector<2x32xf32> to vector<2x1x32xf32>
    tpu.vector_store %arg33[%c0_80, %c0_81, %c0_82], %329 {strides = array<i32>} : memref<2x8x64xf32, #tpu.memory_space<vmem>>, vector<2x1x32xf32>,
    %330 = vector.extract_strided_slice %325 {offsets = [2, 0], sizes = [2, 32], strides = [1, 1]} : vector<4x32xf32> to vector<2x32xf32>
    %c0_83 = arith.constant 0 : index
    %c7_84 = arith.constant 7 : index
    %c32_85 = arith.constant 32 : index
    %331 = vector.load %arg33[%c0_83, %c7_84, %c32_85] : memref<2x8x64xf32, #tpu.memory_space<vmem>>, vector<2x1x32xf32>
    %332 = vector.shape_cast %331 : vector<2x1x32xf32> to vector<2x32xf32>
    %333 = vector.shape_cast %330 : vector<2x32xf32> to vector<2x1x32xf32>
    tpu.vector_store %arg33[%c0_83, %c7_84, %c32_85], %333 {strides = array<i32>} : memref<2x8x64xf32, #tpu.memory_space<vmem>>, vector<2x1x32xf32>,
    %334 = arith.truncf %325 : vector<4x32xf32> to vector<4x32xbf16>
    %cst_86 = arith.constant dense<0.000000e+00> : vector<4x256xf32>
    %335 = tpu.matmul %334, %297, %cst_86 {dimension_numbers = #tpu.dot_dimension_numbers<[1], [0], [0], [1], [0, 0, 1, 1], [], []>} : vector<4x32xbf16>, vector<32x256xbf16>, vector<4x256xf32> -> vector<4x256xf32>
    %336 = vector.extract_strided_slice %296 {offsets = [0, 1, 0], sizes = [2, 1, 128], strides = [1, 1, 1]} : vector<2x8x256xf32> to vector<2x1x128xf32>
    %337 = vector.shape_cast %336 : vector<2x1x128xf32> to vector<2x128xf32>
    %338 = vector.extract_strided_slice %335 {offsets = [0, 0], sizes = [2, 128], strides = [1, 1]} : vector<4x256xf32> to vector<2x128xf32>
    %339 = arith.addf %337, %338 : vector<2x128xf32>
    %340 = vector.extract_strided_slice %296 {offsets = [0, 6, 128], sizes = [2, 1, 128], strides = [1, 1, 1]} : vector<2x8x256xf32> to vector<2x1x128xf32>
    %341 = vector.shape_cast %340 : vector<2x1x128xf32> to vector<2x128xf32>
    %342 = vector.extract_strided_slice %335 {offsets = [2, 128], sizes = [2, 128], strides = [1, 1]} : vector<4x256xf32> to vector<2x128xf32>
    %343 = arith.addf %341, %342 : vector<2x128xf32>
    %344 = tpu.concatenate %339, %343 in 0 : vector<2x128xf32>, vector<2x128xf32> -> vector<4x128xf32>
    %345 = arith.negf %344 : vector<4x128xf32>
    %346 = math.exp %345 : vector<4x128xf32>
    %cst_87 = arith.constant 1.000000e+00 : f32
    %347 = vector.broadcast %cst_87 : f32 to vector<4x128xf32>
    %348 = arith.addf %347, %346 : vector<4x128xf32>
    %349 = arith.divf %347, %348 : vector<4x128xf32>
    %350 = vector.extract_strided_slice %349 {offsets = [0, 0], sizes = [4, 32], strides = [1, 1]} : vector<4x128xf32> to vector<4x32xf32>
    %351 = vector.extract_strided_slice %349 {offsets = [0, 32], sizes = [4, 32], strides = [1, 1]} : vector<4x128xf32> to vector<4x32xf32>
    %352 = vector.extract_strided_slice %349 {offsets = [0, 96], sizes = [4, 32], strides = [1, 1]} : vector<4x128xf32> to vector<4x32xf32>
    %353 = vector.extract_strided_slice %344 {offsets = [0, 64], sizes = [4, 32], strides = [1, 1]} : vector<4x128xf32> to vector<4x32xf32>
    %354 = math.tanh %353 : vector<4x32xf32>
    %355 = arith.mulf %351, %323 : vector<4x32xf32>
    %356 = arith.mulf %350, %354 : vector<4x32xf32>
    %357 = arith.addf %355, %356 : vector<4x32xf32>
    %358 = math.tanh %357 : vector<4x32xf32>
    %359 = arith.mulf %352, %358 : vector<4x32xf32>
    %360 = vector.extract_strided_slice %359 {offsets = [0, 0], sizes = [2, 32], strides = [1, 1]} : vector<4x32xf32> to vector<2x32xf32>
    %c0_88 = arith.constant 0 : index
    %c1_89 = arith.constant 1 : index
    %c0_90 = arith.constant 0 : index
    %361 = vector.load %arg33[%c0_88, %c1_89, %c0_90] : memref<2x8x64xf32, #tpu.memory_space<vmem>>, vector<2x1x32xf32>
    %362 = vector.shape_cast %361 : vector<2x1x32xf32> to vector<2x32xf32>
    %363 = vector.shape_cast %360 : vector<2x32xf32> to vector<2x1x32xf32>
    tpu.vector_store %arg33[%c0_88, %c1_89, %c0_90], %363 {strides = array<i32>} : memref<2x8x64xf32, #tpu.memory_space<vmem>>, vector<2x1x32xf32>,
    %364 = vector.extract_strided_slice %359 {offsets = [2, 0], sizes = [2, 32], strides = [1, 1]} : vector<4x32xf32> to vector<2x32xf32>
    %c0_91 = arith.constant 0 : index
    %c6_92 = arith.constant 6 : index
    %c32_93 = arith.constant 32 : index
    %365 = vector.load %arg33[%c0_91, %c6_92, %c32_93] : memref<2x8x64xf32, #tpu.memory_space<vmem>>, vector<2x1x32xf32>
    %366 = vector.shape_cast %365 : vector<2x1x32xf32> to vector<2x32xf32>
    %367 = vector.shape_cast %364 : vector<2x32xf32> to vector<2x1x32xf32>
    tpu.vector_store %arg33[%c0_91, %c6_92, %c32_93], %367 {strides = array<i32>} : memref<2x8x64xf32, #tpu.memory_space<vmem>>, vector<2x1x32xf32>,
    %368 = arith.truncf %359 : vector<4x32xf32> to vector<4x32xbf16>
    %cst_94 = arith.constant dense<0.000000e+00> : vector<4x256xf32>
    %369 = tpu.matmul %368, %297, %cst_94 {dimension_numbers = #tpu.dot_dimension_numbers<[1], [0], [0], [1], [0, 0, 1, 1], [], []>} : vector<4x32xbf16>, vector<32x256xbf16>, vector<4x256xf32> -> vector<4x256xf32>
    %370 = vector.extract_strided_slice %296 {offsets = [0, 2, 0], sizes = [2, 1, 128], strides = [1, 1, 1]} : vector<2x8x256xf32> to vector<2x1x128xf32>
    %371 = vector.shape_cast %370 : vector<2x1x128xf32> to vector<2x128xf32>
    %372 = vector.extract_strided_slice %369 {offsets = [0, 0], sizes = [2, 128], strides = [1, 1]} : vector<4x256xf32> to vector<2x128xf32>
    %373 = arith.addf %371, %372 : vector<2x128xf32>
    %374 = vector.extract_strided_slice %296 {offsets = [0, 5, 128], sizes = [2, 1, 128], strides = [1, 1, 1]} : vector<2x8x256xf32> to vector<2x1x128xf32>
    %375 = vector.shape_cast %374 : vector<2x1x128xf32> to vector<2x128xf32>
    %376 = vector.extract_strided_slice %369 {offsets = [2, 128], sizes = [2, 128], strides = [1, 1]} : vector<4x256xf32> to vector<2x128xf32>
    %377 = arith.addf %375, %376 : vector<2x128xf32>
    %378 = tpu.concatenate %373, %377 in 0 : vector<2x128xf32>, vector<2x128xf32> -> vector<4x128xf32>
    %379 = arith.negf %378 : vector<4x128xf32>
    %380 = math.exp %379 : vector<4x128xf32>
    %cst_95 = arith.constant 1.000000e+00 : f32
    %381 = vector.broadcast %cst_95 : f32 to vector<4x128xf32>
    %382 = arith.addf %381, %380 : vector<4x128xf32>
    %383 = arith.divf %381, %382 : vector<4x128xf32>
    %384 = vector.extract_strided_slice %383 {offsets = [0, 0], sizes = [4, 32], strides = [1, 1]} : vector<4x128xf32> to vector<4x32xf32>
    %385 = vector.extract_strided_slice %383 {offsets = [0, 32], sizes = [4, 32], strides = [1, 1]} : vector<4x128xf32> to vector<4x32xf32>
    %386 = vector.extract_strided_slice %383 {offsets = [0, 96], sizes = [4, 32], strides = [1, 1]} : vector<4x128xf32> to vector<4x32xf32>
    %387 = vector.extract_strided_slice %378 {offsets = [0, 64], sizes = [4, 32], strides = [1, 1]} : vector<4x128xf32> to vector<4x32xf32>
    %388 = math.tanh %387 : vector<4x32xf32>
    %389 = arith.mulf %385, %357 : vector<4x32xf32>
    %390 = arith.mulf %384, %388 : vector<4x32xf32>
    %391 = arith.addf %389, %390 : vector<4x32xf32>
    %392 = math.tanh %391 : vector<4x32xf32>
    %393 = arith.mulf %386, %392 : vector<4x32xf32>
    %394 = vector.extract_strided_slice %393 {offsets = [0, 0], sizes = [2, 32], strides = [1, 1]} : vector<4x32xf32> to vector<2x32xf32>
    %c0_96 = arith.constant 0 : index
    %c2_97 = arith.constant 2 : index
    %c0_98 = arith.constant 0 : index
    %395 = vector.load %arg33[%c0_96, %c2_97, %c0_98] : memref<2x8x64xf32, #tpu.memory_space<vmem>>, vector<2x1x32xf32>
    %396 = vector.shape_cast %395 : vector<2x1x32xf32> to vector<2x32xf32>
    %397 = vector.shape_cast %394 : vector<2x32xf32> to vector<2x1x32xf32>
    tpu.vector_store %arg33[%c0_96, %c2_97, %c0_98], %397 {strides = array<i32>} : memref<2x8x64xf32, #tpu.memory_space<vmem>>, vector<2x1x32xf32>,
    %398 = vector.extract_strided_slice %393 {offsets = [2, 0], sizes = [2, 32], strides = [1, 1]} : vector<4x32xf32> to vector<2x32xf32>
    %c0_99 = arith.constant 0 : index
    %c5_100 = arith.constant 5 : index
    %c32_101 = arith.constant 32 : index
    %399 = vector.load %arg33[%c0_99, %c5_100, %c32_101] : memref<2x8x64xf32, #tpu.memory_space<vmem>>, vector<2x1x32xf32>
    %400 = vector.shape_cast %399 : vector<2x1x32xf32> to vector<2x32xf32>
    %401 = vector.shape_cast %398 : vector<2x32xf32> to vector<2x1x32xf32>
    tpu.vector_store %arg33[%c0_99, %c5_100, %c32_101], %401 {strides = array<i32>} : memref<2x8x64xf32, #tpu.memory_space<vmem>>, vector<2x1x32xf32>,
    %402 = arith.truncf %393 : vector<4x32xf32> to vector<4x32xbf16>
    %cst_102 = arith.constant dense<0.000000e+00> : vector<4x256xf32>
    %403 = tpu.matmul %402, %297, %cst_102 {dimension_numbers = #tpu.dot_dimension_numbers<[1], [0], [0], [1], [0, 0, 1, 1], [], []>} : vector<4x32xbf16>, vector<32x256xbf16>, vector<4x256xf32> -> vector<4x256xf32>
    %404 = vector.extract_strided_slice %296 {offsets = [0, 3, 0], sizes = [2, 1, 128], strides = [1, 1, 1]} : vector<2x8x256xf32> to vector<2x1x128xf32>
    %405 = vector.shape_cast %404 : vector<2x1x128xf32> to vector<2x128xf32>
    %406 = vector.extract_strided_slice %403 {offsets = [0, 0], sizes = [2, 128], strides = [1, 1]} : vector<4x256xf32> to vector<2x128xf32>
    %407 = arith.addf %405, %406 : vector<2x128xf32>
    %408 = vector.extract_strided_slice %296 {offsets = [0, 4, 128], sizes = [2, 1, 128], strides = [1, 1, 1]} : vector<2x8x256xf32> to vector<2x1x128xf32>
    %409 = vector.shape_cast %408 : vector<2x1x128xf32> to vector<2x128xf32>
    %410 = vector.extract_strided_slice %403 {offsets = [2, 128], sizes = [2, 128], strides = [1, 1]} : vector<4x256xf32> to vector<2x128xf32>
    %411 = arith.addf %409, %410 : vector<2x128xf32>
    %412 = tpu.concatenate %407, %411 in 0 : vector<2x128xf32>, vector<2x128xf32> -> vector<4x128xf32>
    %413 = arith.negf %412 : vector<4x128xf32>
    %414 = math.exp %413 : vector<4x128xf32>
    %cst_103 = arith.constant 1.000000e+00 : f32
    %415 = vector.broadcast %cst_103 : f32 to vector<4x128xf32>
    %416 = arith.addf %415, %414 : vector<4x128xf32>
    %417 = arith.divf %415, %416 : vector<4x128xf32>
    %418 = vector.extract_strided_slice %417 {offsets = [0, 0], sizes = [4, 32], strides = [1, 1]} : vector<4x128xf32> to vector<4x32xf32>
    %419 = vector.extract_strided_slice %417 {offsets = [0, 32], sizes = [4, 32], strides = [1, 1]} : vector<4x128xf32> to vector<4x32xf32>
    %420 = vector.extract_strided_slice %417 {offsets = [0, 96], sizes = [4, 32], strides = [1, 1]} : vector<4x128xf32> to vector<4x32xf32>
    %421 = vector.extract_strided_slice %412 {offsets = [0, 64], sizes = [4, 32], strides = [1, 1]} : vector<4x128xf32> to vector<4x32xf32>
    %422 = math.tanh %421 : vector<4x32xf32>
    %423 = arith.mulf %419, %391 : vector<4x32xf32>
    %424 = arith.mulf %418, %422 : vector<4x32xf32>
    %425 = arith.addf %423, %424 : vector<4x32xf32>
    %426 = math.tanh %425 : vector<4x32xf32>
    %427 = arith.mulf %420, %426 : vector<4x32xf32>
    %428 = vector.extract_strided_slice %427 {offsets = [0, 0], sizes = [2, 32], strides = [1, 1]} : vector<4x32xf32> to vector<2x32xf32>
    %c0_104 = arith.constant 0 : index
    %c3_105 = arith.constant 3 : index
    %c0_106 = arith.constant 0 : index
    %429 = vector.load %arg33[%c0_104, %c3_105, %c0_106] : memref<2x8x64xf32, #tpu.memory_space<vmem>>, vector<2x1x32xf32>
    %430 = vector.shape_cast %429 : vector<2x1x32xf32> to vector<2x32xf32>
    %431 = vector.shape_cast %428 : vector<2x32xf32> to vector<2x1x32xf32>
    tpu.vector_store %arg33[%c0_104, %c3_105, %c0_106], %431 {strides = array<i32>} : memref<2x8x64xf32, #tpu.memory_space<vmem>>, vector<2x1x32xf32>,
    %432 = vector.extract_strided_slice %427 {offsets = [2, 0], sizes = [2, 32], strides = [1, 1]} : vector<4x32xf32> to vector<2x32xf32>
    %c0_107 = arith.constant 0 : index
    %c4_108 = arith.constant 4 : index
    %c32_109 = arith.constant 32 : index
    %433 = vector.load %arg33[%c0_107, %c4_108, %c32_109] : memref<2x8x64xf32, #tpu.memory_space<vmem>>, vector<2x1x32xf32>
    %434 = vector.shape_cast %433 : vector<2x1x32xf32> to vector<2x32xf32>
    %435 = vector.shape_cast %432 : vector<2x32xf32> to vector<2x1x32xf32>
    tpu.vector_store %arg33[%c0_107, %c4_108, %c32_109], %435 {strides = array<i32>} : memref<2x8x64xf32, #tpu.memory_space<vmem>>, vector<2x1x32xf32>,
    %436 = arith.truncf %427 : vector<4x32xf32> to vector<4x32xbf16>
    %cst_110 = arith.constant dense<0.000000e+00> : vector<4x256xf32>
    %437 = tpu.matmul %436, %297, %cst_110 {dimension_numbers = #tpu.dot_dimension_numbers<[1], [0], [0], [1], [0, 0, 1, 1], [], []>} : vector<4x32xbf16>, vector<32x256xbf16>, vector<4x256xf32> -> vector<4x256xf32>
    %438 = vector.extract_strided_slice %296 {offsets = [0, 4, 0], sizes = [2, 1, 128], strides = [1, 1, 1]} : vector<2x8x256xf32> to vector<2x1x128xf32>
    %439 = vector.shape_cast %438 : vector<2x1x128xf32> to vector<2x128xf32>
    %440 = vector.extract_strided_slice %437 {offsets = [0, 0], sizes = [2, 128], strides = [1, 1]} : vector<4x256xf32> to vector<2x128xf32>
    %441 = arith.addf %439, %440 : vector<2x128xf32>
    %442 = vector.extract_strided_slice %296 {offsets = [0, 3, 128], sizes = [2, 1, 128], strides = [1, 1, 1]} : vector<2x8x256xf32> to vector<2x1x128xf32>
    %443 = vector.shape_cast %442 : vector<2x1x128xf32> to vector<2x128xf32>
    %444 = vector.extract_strided_slice %437 {offsets = [2, 128], sizes = [2, 128], strides = [1, 1]} : vector<4x256xf32> to vector<2x128xf32>
    %445 = arith.addf %443, %444 : vector<2x128xf32>
    %446 = tpu.concatenate %441, %445 in 0 : vector<2x128xf32>, vector<2x128xf32> -> vector<4x128xf32>
    %447 = arith.negf %446 : vector<4x128xf32>
    %448 = math.exp %447 : vector<4x128xf32>
    %cst_111 = arith.constant 1.000000e+00 : f32
    %449 = vector.broadcast %cst_111 : f32 to vector<4x128xf32>
    %450 = arith.addf %449, %448 : vector<4x128xf32>
    %451 = arith.divf %449, %450 : vector<4x128xf32>
    %452 = vector.extract_strided_slice %451 {offsets = [0, 0], sizes = [4, 32], strides = [1, 1]} : vector<4x128xf32> to vector<4x32xf32>
    %453 = vector.extract_strided_slice %451 {offsets = [0, 32], sizes = [4, 32], strides = [1, 1]} : vector<4x128xf32> to vector<4x32xf32>
    %454 = vector.extract_strided_slice %451 {offsets = [0, 96], sizes = [4, 32], strides = [1, 1]} : vector<4x128xf32> to vector<4x32xf32>
    %455 = vector.extract_strided_slice %446 {offsets = [0, 64], sizes = [4, 32], strides = [1, 1]} : vector<4x128xf32> to vector<4x32xf32>
    %456 = math.tanh %455 : vector<4x32xf32>
    %457 = arith.mulf %453, %425 : vector<4x32xf32>
    %458 = arith.mulf %452, %456 : vector<4x32xf32>
    %459 = arith.addf %457, %458 : vector<4x32xf32>
    %460 = math.tanh %459 : vector<4x32xf32>
    %461 = arith.mulf %454, %460 : vector<4x32xf32>
    %462 = vector.extract_strided_slice %461 {offsets = [0, 0], sizes = [2, 32], strides = [1, 1]} : vector<4x32xf32> to vector<2x32xf32>
    %c0_112 = arith.constant 0 : index
    %c4_113 = arith.constant 4 : index
    %c0_114 = arith.constant 0 : index
    %463 = vector.load %arg33[%c0_112, %c4_113, %c0_114] : memref<2x8x64xf32, #tpu.memory_space<vmem>>, vector<2x1x32xf32>
    %464 = vector.shape_cast %463 : vector<2x1x32xf32> to vector<2x32xf32>
    %465 = vector.shape_cast %462 : vector<2x32xf32> to vector<2x1x32xf32>
    tpu.vector_store %arg33[%c0_112, %c4_113, %c0_114], %465 {strides = array<i32>} : memref<2x8x64xf32, #tpu.memory_space<vmem>>, vector<2x1x32xf32>,
    %466 = vector.extract_strided_slice %461 {offsets = [2, 0], sizes = [2, 32], strides = [1, 1]} : vector<4x32xf32> to vector<2x32xf32>
    %c0_115 = arith.constant 0 : index
    %c3_116 = arith.constant 3 : index
    %c32_117 = arith.constant 32 : index
    %467 = vector.load %arg33[%c0_115, %c3_116, %c32_117] : memref<2x8x64xf32, #tpu.memory_space<vmem>>, vector<2x1x32xf32>
    %468 = vector.shape_cast %467 : vector<2x1x32xf32> to vector<2x32xf32>
    %469 = vector.shape_cast %466 : vector<2x32xf32> to vector<2x1x32xf32>
    tpu.vector_store %arg33[%c0_115, %c3_116, %c32_117], %469 {strides = array<i32>} : memref<2x8x64xf32, #tpu.memory_space<vmem>>, vector<2x1x32xf32>,
    %470 = arith.truncf %461 : vector<4x32xf32> to vector<4x32xbf16>
    %cst_118 = arith.constant dense<0.000000e+00> : vector<4x256xf32>
    %471 = tpu.matmul %470, %297, %cst_118 {dimension_numbers = #tpu.dot_dimension_numbers<[1], [0], [0], [1], [0, 0, 1, 1], [], []>} : vector<4x32xbf16>, vector<32x256xbf16>, vector<4x256xf32> -> vector<4x256xf32>
    %472 = vector.extract_strided_slice %296 {offsets = [0, 5, 0], sizes = [2, 1, 128], strides = [1, 1, 1]} : vector<2x8x256xf32> to vector<2x1x128xf32>
    %473 = vector.shape_cast %472 : vector<2x1x128xf32> to vector<2x128xf32>
    %474 = vector.extract_strided_slice %471 {offsets = [0, 0], sizes = [2, 128], strides = [1, 1]} : vector<4x256xf32> to vector<2x128xf32>
    %475 = arith.addf %473, %474 : vector<2x128xf32>
    %476 = vector.extract_strided_slice %296 {offsets = [0, 2, 128], sizes = [2, 1, 128], strides = [1, 1, 1]} : vector<2x8x256xf32> to vector<2x1x128xf32>
    %477 = vector.shape_cast %476 : vector<2x1x128xf32> to vector<2x128xf32>
    %478 = vector.extract_strided_slice %471 {offsets = [2, 128], sizes = [2, 128], strides = [1, 1]} : vector<4x256xf32> to vector<2x128xf32>
    %479 = arith.addf %477, %478 : vector<2x128xf32>
    %480 = tpu.concatenate %475, %479 in 0 : vector<2x128xf32>, vector<2x128xf32> -> vector<4x128xf32>
    %481 = arith.negf %480 : vector<4x128xf32>
    %482 = math.exp %481 : vector<4x128xf32>
    %cst_119 = arith.constant 1.000000e+00 : f32
    %483 = vector.broadcast %cst_119 : f32 to vector<4x128xf32>
    %484 = arith.addf %483, %482 : vector<4x128xf32>
    %485 = arith.divf %483, %484 : vector<4x128xf32>
    %486 = vector.extract_strided_slice %485 {offsets = [0, 0], sizes = [4, 32], strides = [1, 1]} : vector<4x128xf32> to vector<4x32xf32>
    %487 = vector.extract_strided_slice %485 {offsets = [0, 32], sizes = [4, 32], strides = [1, 1]} : vector<4x128xf32> to vector<4x32xf32>
    %488 = vector.extract_strided_slice %485 {offsets = [0, 96], sizes = [4, 32], strides = [1, 1]} : vector<4x128xf32> to vector<4x32xf32>
    %489 = vector.extract_strided_slice %480 {offsets = [0, 64], sizes = [4, 32], strides = [1, 1]} : vector<4x128xf32> to vector<4x32xf32>
    %490 = math.tanh %489 : vector<4x32xf32>
    %491 = arith.mulf %487, %459 : vector<4x32xf32>
    %492 = arith.mulf %486, %490 : vector<4x32xf32>
    %493 = arith.addf %491, %492 : vector<4x32xf32>
    %494 = math.tanh %493 : vector<4x32xf32>
    %495 = arith.mulf %488, %494 : vector<4x32xf32>
    %496 = vector.extract_strided_slice %495 {offsets = [0, 0], sizes = [2, 32], strides = [1, 1]} : vector<4x32xf32> to vector<2x32xf32>
    %c0_120 = arith.constant 0 : index
    %c5_121 = arith.constant 5 : index
    %c0_122 = arith.constant 0 : index
    %497 = vector.load %arg33[%c0_120, %c5_121, %c0_122] : memref<2x8x64xf32, #tpu.memory_space<vmem>>, vector<2x1x32xf32>
    %498 = vector.shape_cast %497 : vector<2x1x32xf32> to vector<2x32xf32>
    %499 = vector.shape_cast %496 : vector<2x32xf32> to vector<2x1x32xf32>
    tpu.vector_store %arg33[%c0_120, %c5_121, %c0_122], %499 {strides = array<i32>} : memref<2x8x64xf32, #tpu.memory_space<vmem>>, vector<2x1x32xf32>,
    %500 = vector.extract_strided_slice %495 {offsets = [2, 0], sizes = [2, 32], strides = [1, 1]} : vector<4x32xf32> to vector<2x32xf32>
    %c0_123 = arith.constant 0 : index
    %c2_124 = arith.constant 2 : index
    %c32_125 = arith.constant 32 : index
    %501 = vector.load %arg33[%c0_123, %c2_124, %c32_125] : memref<2x8x64xf32, #tpu.memory_space<vmem>>, vector<2x1x32xf32>
    %502 = vector.shape_cast %501 : vector<2x1x32xf32> to vector<2x32xf32>
    %503 = vector.shape_cast %500 : vector<2x32xf32> to vector<2x1x32xf32>
    tpu.vector_store %arg33[%c0_123, %c2_124, %c32_125], %503 {strides = array<i32>} : memref<2x8x64xf32, #tpu.memory_space<vmem>>, vector<2x1x32xf32>,
    %504 = arith.truncf %495 : vector<4x32xf32> to vector<4x32xbf16>
    %cst_126 = arith.constant dense<0.000000e+00> : vector<4x256xf32>
    %505 = tpu.matmul %504, %297, %cst_126 {dimension_numbers = #tpu.dot_dimension_numbers<[1], [0], [0], [1], [0, 0, 1, 1], [], []>} : vector<4x32xbf16>, vector<32x256xbf16>, vector<4x256xf32> -> vector<4x256xf32>
    %506 = vector.extract_strided_slice %296 {offsets = [0, 6, 0], sizes = [2, 1, 128], strides = [1, 1, 1]} : vector<2x8x256xf32> to vector<2x1x128xf32>
    %507 = vector.shape_cast %506 : vector<2x1x128xf32> to vector<2x128xf32>
    %508 = vector.extract_strided_slice %505 {offsets = [0, 0], sizes = [2, 128], strides = [1, 1]} : vector<4x256xf32> to vector<2x128xf32>
    %509 = arith.addf %507, %508 : vector<2x128xf32>
    %510 = vector.extract_strided_slice %296 {offsets = [0, 1, 128], sizes = [2, 1, 128], strides = [1, 1, 1]} : vector<2x8x256xf32> to vector<2x1x128xf32>
    %511 = vector.shape_cast %510 : vector<2x1x128xf32> to vector<2x128xf32>
    %512 = vector.extract_strided_slice %505 {offsets = [2, 128], sizes = [2, 128], strides = [1, 1]} : vector<4x256xf32> to vector<2x128xf32>
    %513 = arith.addf %511, %512 : vector<2x128xf32>
    %514 = tpu.concatenate %509, %513 in 0 : vector<2x128xf32>, vector<2x128xf32> -> vector<4x128xf32>
    %515 = arith.negf %514 : vector<4x128xf32>
    %516 = math.exp %515 : vector<4x128xf32>
    %cst_127 = arith.constant 1.000000e+00 : f32
    %517 = vector.broadcast %cst_127 : f32 to vector<4x128xf32>
    %518 = arith.addf %517, %516 : vector<4x128xf32>
    %519 = arith.divf %517, %518 : vector<4x128xf32>
    %520 = vector.extract_strided_slice %519 {offsets = [0, 0], sizes = [4, 32], strides = [1, 1]} : vector<4x128xf32> to vector<4x32xf32>
    %521 = vector.extract_strided_slice %519 {offsets = [0, 32], sizes = [4, 32], strides = [1, 1]} : vector<4x128xf32> to vector<4x32xf32>
    %522 = vector.extract_strided_slice %519 {offsets = [0, 96], sizes = [4, 32], strides = [1, 1]} : vector<4x128xf32> to vector<4x32xf32>
    %523 = vector.extract_strided_slice %514 {offsets = [0, 64], sizes = [4, 32], strides = [1, 1]} : vector<4x128xf32> to vector<4x32xf32>
    %524 = math.tanh %523 : vector<4x32xf32>
    %525 = arith.mulf %521, %493 : vector<4x32xf32>
    %526 = arith.mulf %520, %524 : vector<4x32xf32>
    %527 = arith.addf %525, %526 : vector<4x32xf32>
    %528 = math.tanh %527 : vector<4x32xf32>
    %529 = arith.mulf %522, %528 : vector<4x32xf32>
    %530 = vector.extract_strided_slice %529 {offsets = [0, 0], sizes = [2, 32], strides = [1, 1]} : vector<4x32xf32> to vector<2x32xf32>
    %c0_128 = arith.constant 0 : index
    %c6_129 = arith.constant 6 : index
    %c0_130 = arith.constant 0 : index
    %531 = vector.load %arg33[%c0_128, %c6_129, %c0_130] : memref<2x8x64xf32, #tpu.memory_space<vmem>>, vector<2x1x32xf32>
    %532 = vector.shape_cast %531 : vector<2x1x32xf32> to vector<2x32xf32>
    %533 = vector.shape_cast %530 : vector<2x32xf32> to vector<2x1x32xf32>
    tpu.vector_store %arg33[%c0_128, %c6_129, %c0_130], %533 {strides = array<i32>} : memref<2x8x64xf32, #tpu.memory_space<vmem>>, vector<2x1x32xf32>,
    %534 = vector.extract_strided_slice %529 {offsets = [2, 0], sizes = [2, 32], strides = [1, 1]} : vector<4x32xf32> to vector<2x32xf32>
    %c0_131 = arith.constant 0 : index
    %c1_132 = arith.constant 1 : index
    %c32_133 = arith.constant 32 : index
    %535 = vector.load %arg33[%c0_131, %c1_132, %c32_133] : memref<2x8x64xf32, #tpu.memory_space<vmem>>, vector<2x1x32xf32>
    %536 = vector.shape_cast %535 : vector<2x1x32xf32> to vector<2x32xf32>
    %537 = vector.shape_cast %534 : vector<2x32xf32> to vector<2x1x32xf32>
    tpu.vector_store %arg33[%c0_131, %c1_132, %c32_133], %537 {strides = array<i32>} : memref<2x8x64xf32, #tpu.memory_space<vmem>>, vector<2x1x32xf32>,
    %538 = arith.truncf %529 : vector<4x32xf32> to vector<4x32xbf16>
    %cst_134 = arith.constant dense<0.000000e+00> : vector<4x256xf32>
    %539 = tpu.matmul %538, %297, %cst_134 {dimension_numbers = #tpu.dot_dimension_numbers<[1], [0], [0], [1], [0, 0, 1, 1], [], []>} : vector<4x32xbf16>, vector<32x256xbf16>, vector<4x256xf32> -> vector<4x256xf32>
    %540 = vector.extract_strided_slice %296 {offsets = [0, 7, 0], sizes = [2, 1, 128], strides = [1, 1, 1]} : vector<2x8x256xf32> to vector<2x1x128xf32>
    %541 = vector.shape_cast %540 : vector<2x1x128xf32> to vector<2x128xf32>
    %542 = vector.extract_strided_slice %539 {offsets = [0, 0], sizes = [2, 128], strides = [1, 1]} : vector<4x256xf32> to vector<2x128xf32>
    %543 = arith.addf %541, %542 : vector<2x128xf32>
    %544 = vector.extract_strided_slice %296 {offsets = [0, 0, 128], sizes = [2, 1, 128], strides = [1, 1, 1]} : vector<2x8x256xf32> to vector<2x1x128xf32>
    %545 = vector.shape_cast %544 : vector<2x1x128xf32> to vector<2x128xf32>
    %546 = vector.extract_strided_slice %539 {offsets = [2, 128], sizes = [2, 128], strides = [1, 1]} : vector<4x256xf32> to vector<2x128xf32>
    %547 = arith.addf %545, %546 : vector<2x128xf32>
    %548 = tpu.concatenate %543, %547 in 0 : vector<2x128xf32>, vector<2x128xf32> -> vector<4x128xf32>
    %549 = arith.negf %548 : vector<4x128xf32>
    %550 = math.exp %549 : vector<4x128xf32>
    %cst_135 = arith.constant 1.000000e+00 : f32
    %551 = vector.broadcast %cst_135 : f32 to vector<4x128xf32>
    %552 = arith.addf %551, %550 : vector<4x128xf32>
    %553 = arith.divf %551, %552 : vector<4x128xf32>
    %554 = vector.extract_strided_slice %553 {offsets = [0, 0], sizes = [4, 32], strides = [1, 1]} : vector<4x128xf32> to vector<4x32xf32>
    %555 = vector.extract_strided_slice %553 {offsets = [0, 32], sizes = [4, 32], strides = [1, 1]} : vector<4x128xf32> to vector<4x32xf32>
    %556 = vector.extract_strided_slice %553 {offsets = [0, 96], sizes = [4, 32], strides = [1, 1]} : vector<4x128xf32> to vector<4x32xf32>
    %557 = vector.extract_strided_slice %548 {offsets = [0, 64], sizes = [4, 32], strides = [1, 1]} : vector<4x128xf32> to vector<4x32xf32>
    %558 = math.tanh %557 : vector<4x32xf32>
    %559 = arith.mulf %555, %527 : vector<4x32xf32>
    %560 = arith.mulf %554, %558 : vector<4x32xf32>
    %561 = arith.addf %559, %560 : vector<4x32xf32>
    %562 = math.tanh %561 : vector<4x32xf32>
    %563 = arith.mulf %556, %562 : vector<4x32xf32>
    %564 = vector.extract_strided_slice %563 {offsets = [0, 0], sizes = [2, 32], strides = [1, 1]} : vector<4x32xf32> to vector<2x32xf32>
    %c0_136 = arith.constant 0 : index
    %c7_137 = arith.constant 7 : index
    %c0_138 = arith.constant 0 : index
    %565 = vector.load %arg33[%c0_136, %c7_137, %c0_138] : memref<2x8x64xf32, #tpu.memory_space<vmem>>, vector<2x1x32xf32>
    %566 = vector.shape_cast %565 : vector<2x1x32xf32> to vector<2x32xf32>
    %567 = vector.shape_cast %564 : vector<2x32xf32> to vector<2x1x32xf32>
    tpu.vector_store %arg33[%c0_136, %c7_137, %c0_138], %567 {strides = array<i32>} : memref<2x8x64xf32, #tpu.memory_space<vmem>>, vector<2x1x32xf32>,
    %568 = vector.extract_strided_slice %563 {offsets = [2, 0], sizes = [2, 32], strides = [1, 1]} : vector<4x32xf32> to vector<2x32xf32>
    %c0_139 = arith.constant 0 : index
    %c0_140 = arith.constant 0 : index
    %c32_141 = arith.constant 32 : index
    %569 = vector.load %arg33[%c0_139, %c0_140, %c32_141] : memref<2x8x64xf32, #tpu.memory_space<vmem>>, vector<2x1x32xf32>
    %570 = vector.shape_cast %569 : vector<2x1x32xf32> to vector<2x32xf32>
    %571 = vector.shape_cast %568 : vector<2x32xf32> to vector<2x1x32xf32>
    tpu.vector_store %arg33[%c0_139, %c0_140, %c32_141], %571 {strides = array<i32>} : memref<2x8x64xf32, #tpu.memory_space<vmem>>, vector<2x1x32xf32>,
    %c0_142 = arith.constant 0 : index
    %c0_143 = arith.constant 0 : index
    %c0_144 = arith.constant 0 : index
    %572 = vector.load %arg33[%c0_142, %c0_143, %c0_144] : memref<2x8x64xf32, #tpu.memory_space<vmem>>, vector<2x8x64xf32>
    %573 = vector.shape_cast %572 : vector<2x8x64xf32> to vector<16x64xf32>
    %c0_145 = arith.constant 0 : index
    %c0_146 = arith.constant 0 : index
    %574 = vector.load %arg7[%c0_145, %c0_146] : memref<1x64xf32, #tpu.memory_space<vmem>>, vector<1x64xf32>
    %c0_147 = arith.constant 0 : index
    %c0_148 = arith.constant 0 : index
    %575 = vector.load %arg8[%c0_147, %c0_148] : memref<1x64xf32, #tpu.memory_space<vmem>>, vector<1x64xf32>
    %cst_149 = arith.constant dense<0.000000e+00> : vector<16xf32>
    %576 = vector.multi_reduction <add>, %573, %cst_149 [1] : vector<16x64xf32> to vector<16xf32>
    %577 = vector.shape_cast %576 : vector<16xf32> to vector<16x1xf32>
    %cst_150 = arith.constant 6.400000e+01 : f32
    %578 = vector.broadcast %cst_150 : f32 to vector<16x1xf32>
    %579 = arith.divf %577, %578 : vector<16x1xf32>
    %580 = vector.broadcast %579 : vector<16x1xf32> to vector<16x64xf32>
    %581 = arith.subf %573, %580 : vector<16x64xf32>
    %582 = arith.mulf %581, %581 : vector<16x64xf32>
    %cst_151 = arith.constant dense<0.000000e+00> : vector<16xf32>
    %583 = vector.multi_reduction <add>, %582, %cst_151 [1] : vector<16x64xf32> to vector<16xf32>
    %584 = vector.shape_cast %583 : vector<16xf32> to vector<16x1xf32>
    %cst_152 = arith.constant 6.400000e+01 : f32
    %585 = vector.broadcast %cst_152 : f32 to vector<16x1xf32>
    %586 = arith.divf %584, %585 : vector<16x1xf32>
    %cst_153 = arith.constant 9.99999974E-6 : f32
    %587 = vector.broadcast %cst_153 : f32 to vector<16x1xf32>
    %588 = arith.addf %586, %587 : vector<16x1xf32>
    %589 = math.rsqrt %588 : vector<16x1xf32>
    %590 = vector.broadcast %589 : vector<16x1xf32> to vector<16x64xf32>
    %591 = arith.mulf %581, %590 : vector<16x64xf32>
    %592 = vector.broadcast %574 : vector<1x64xf32> to vector<16x64xf32>
    %593 = arith.mulf %591, %592 : vector<16x64xf32>
    %594 = vector.broadcast %575 : vector<1x64xf32> to vector<16x64xf32>
    %595 = arith.addf %593, %594 : vector<16x64xf32>
    %c0_154 = arith.constant 0 : index
    %c0_155 = arith.constant 0 : index
    %596 = vector.load %arg9[%c0_154, %c0_155] : memref<64x192xf32, #tpu.memory_space<vmem>>, vector<64x192xf32>
    %597 = arith.truncf %595 : vector<16x64xf32> to vector<16x64xbf16>
    %598 = arith.truncf %596 : vector<64x192xf32> to vector<64x192xbf16>
    %cst_156 = arith.constant dense<0.000000e+00> : vector<16x192xf32>
    %599 = tpu.matmul %597, %598, %cst_156 {dimension_numbers = #tpu.dot_dimension_numbers<[1], [0], [0], [1], [0, 0, 1, 1], [], []>} : vector<16x64xbf16>, vector<64x192xbf16>, vector<16x192xf32> -> vector<16x192xf32>
    %c0_157 = arith.constant 0 : index
    %c0_158 = arith.constant 0 : index
    %600 = vector.load %arg10[%c0_157, %c0_158] : memref<1x192xf32, #tpu.memory_space<vmem>>, vector<1x192xf32>
    %601 = vector.broadcast %600 : vector<1x192xf32> to vector<16x192xf32>
    %602 = arith.addf %599, %601 : vector<16x192xf32>
    %603 = vector.extract_strided_slice %602 {offsets = [0, 0], sizes = [16, 64], strides = [1, 1]} : vector<16x192xf32> to vector<16x64xf32>
    %604 = vector.shape_cast %603 : vector<16x64xf32> to vector<2x8x64xf32>
    %605 = arith.truncf %604 : vector<2x8x64xf32> to vector<2x8x64xbf16>
    %606 = vector.extract_strided_slice %602 {offsets = [0, 64], sizes = [16, 64], strides = [1, 1]} : vector<16x192xf32> to vector<16x64xf32>
    %607 = vector.shape_cast %606 : vector<16x64xf32> to vector<2x8x64xf32>
    %608 = arith.truncf %607 : vector<2x8x64xf32> to vector<2x8x64xbf16>
    %609 = vector.extract_strided_slice %602 {offsets = [0, 128], sizes = [16, 64], strides = [1, 1]} : vector<16x192xf32> to vector<16x64xf32>
    %610 = vector.shape_cast %609 : vector<16x64xf32> to vector<2x8x64xf32>
    %611 = arith.truncf %610 : vector<2x8x64xf32> to vector<2x8x64xbf16>
    %612 = vector.extract_strided_slice %605 {offsets = [0, 0, 0], sizes = [2, 8, 16], strides = [1, 1, 1]} : vector<2x8x64xbf16> to vector<2x8x16xbf16>
    %613 = vector.extract_strided_slice %608 {offsets = [0, 0, 0], sizes = [2, 8, 16], strides = [1, 1, 1]} : vector<2x8x64xbf16> to vector<2x8x16xbf16>
    %614 = vector.extract_strided_slice %611 {offsets = [0, 0, 0], sizes = [2, 8, 16], strides = [1, 1, 1]} : vector<2x8x64xbf16> to vector<2x8x16xbf16>
    "tpu.trace_start"() <{level = 10 : i32, message = "bqd,bkd->bqk"}> : () -> ()
    %cst_159 = arith.constant dense<0.000000e+00> : vector<2x8x8xf32>
    %615 = tpu.matmul %612, %613, %cst_159 {dimension_numbers = #tpu.dot_dimension_numbers<[2], [2], [1], [1], [0, 0, 0, 1, 1, 1], [0], [0]>} : vector<2x8x16xbf16>, vector<2x8x16xbf16>, vector<2x8x8xf32> -> vector<2x8x8xf32>
    "tpu.trace_stop"() : () -> ()
    %cst_160 = arith.constant 2.500000e-01 : f32
    %616 = vector.broadcast %cst_160 : f32 to vector<2x8x8xf32>
    %617 = arith.mulf %615, %616 : vector<2x8x8xf32>
    %cst_161 = arith.constant dense<0xFF800000> : vector<2x8xf32>
    %618 = vector.multi_reduction <maximumf>, %617, %cst_161 [2] : vector<2x8x8xf32> to vector<2x8xf32>
    %619 = vector.shape_cast %618 : vector<2x8xf32> to vector<2x8x1xf32>
    %620 = vector.broadcast %619 : vector<2x8x1xf32> to vector<2x8x8xf32>
    %621 = arith.subf %617, %620 : vector<2x8x8xf32>
    %622 = math.exp %621 : vector<2x8x8xf32>
    %cst_162 = arith.constant dense<0.000000e+00> : vector<2x8xf32>
    %623 = vector.multi_reduction <add>, %622, %cst_162 [2] : vector<2x8x8xf32> to vector<2x8xf32>
    %624 = vector.shape_cast %623 : vector<2x8xf32> to vector<2x8x1xf32>
    %625 = tpu.reciprocal %624 {approx = true} : vector<2x8x1xf32> -> vector<2x8x1xf32>
    %626 = vector.broadcast %625 : vector<2x8x1xf32> to vector<2x8x8xf32>
    %627 = arith.mulf %622, %626 : vector<2x8x8xf32>
    %628 = arith.truncf %627 : vector<2x8x8xf32> to vector<2x8x8xbf16>
    "tpu.trace_start"() <{level = 10 : i32, message = "bqk,bkd->bqd"}> : () -> ()
    %cst_163 = arith.constant dense<0.000000e+00> : vector<2x8x16xf32>
    %629 = tpu.matmul %628, %614, %cst_163 {dimension_numbers = #tpu.dot_dimension_numbers<[2], [1], [1], [2], [0, 0, 0, 1, 1, 2], [0], [0]>} : vector<2x8x8xbf16>, vector<2x8x16xbf16>, vector<2x8x16xf32> -> vector<2x8x16xf32>
    "tpu.trace_stop"() : () -> ()
    %630 = vector.extract_strided_slice %605 {offsets = [0, 0, 16], sizes = [2, 8, 16], strides = [1, 1, 1]} : vector<2x8x64xbf16> to vector<2x8x16xbf16>
    %631 = vector.extract_strided_slice %608 {offsets = [0, 0, 16], sizes = [2, 8, 16], strides = [1, 1, 1]} : vector<2x8x64xbf16> to vector<2x8x16xbf16>
    %632 = vector.extract_strided_slice %611 {offsets = [0, 0, 16], sizes = [2, 8, 16], strides = [1, 1, 1]} : vector<2x8x64xbf16> to vector<2x8x16xbf16>
    "tpu.trace_start"() <{level = 10 : i32, message = "bqd,bkd->bqk"}> : () -> ()
    %cst_164 = arith.constant dense<0.000000e+00> : vector<2x8x8xf32>
    %633 = tpu.matmul %630, %631, %cst_164 {dimension_numbers = #tpu.dot_dimension_numbers<[2], [2], [1], [1], [0, 0, 0, 1, 1, 1], [0], [0]>} : vector<2x8x16xbf16>, vector<2x8x16xbf16>, vector<2x8x8xf32> -> vector<2x8x8xf32>
    "tpu.trace_stop"() : () -> ()
    %cst_165 = arith.constant 2.500000e-01 : f32
    %634 = vector.broadcast %cst_165 : f32 to vector<2x8x8xf32>
    %635 = arith.mulf %633, %634 : vector<2x8x8xf32>
    %cst_166 = arith.constant dense<0xFF800000> : vector<2x8xf32>
    %636 = vector.multi_reduction <maximumf>, %635, %cst_166 [2] : vector<2x8x8xf32> to vector<2x8xf32>
    %637 = vector.shape_cast %636 : vector<2x8xf32> to vector<2x8x1xf32>
    %638 = vector.broadcast %637 : vector<2x8x1xf32> to vector<2x8x8xf32>
    %639 = arith.subf %635, %638 : vector<2x8x8xf32>
    %640 = math.exp %639 : vector<2x8x8xf32>
    %cst_167 = arith.constant dense<0.000000e+00> : vector<2x8xf32>
    %641 = vector.multi_reduction <add>, %640, %cst_167 [2] : vector<2x8x8xf32> to vector<2x8xf32>
    %642 = vector.shape_cast %641 : vector<2x8xf32> to vector<2x8x1xf32>
    %643 = tpu.reciprocal %642 {approx = true} : vector<2x8x1xf32> -> vector<2x8x1xf32>
    %644 = vector.broadcast %643 : vector<2x8x1xf32> to vector<2x8x8xf32>
    %645 = arith.mulf %640, %644 : vector<2x8x8xf32>
    %646 = arith.truncf %645 : vector<2x8x8xf32> to vector<2x8x8xbf16>
    "tpu.trace_start"() <{level = 10 : i32, message = "bqk,bkd->bqd"}> : () -> ()
    %cst_168 = arith.constant dense<0.000000e+00> : vector<2x8x16xf32>
    %647 = tpu.matmul %646, %632, %cst_168 {dimension_numbers = #tpu.dot_dimension_numbers<[2], [1], [1], [2], [0, 0, 0, 1, 1, 2], [0], [0]>} : vector<2x8x8xbf16>, vector<2x8x16xbf16>, vector<2x8x16xf32> -> vector<2x8x16xf32>
    "tpu.trace_stop"() : () -> ()
    %648 = vector.extract_strided_slice %605 {offsets = [0, 0, 32], sizes = [2, 8, 16], strides = [1, 1, 1]} : vector<2x8x64xbf16> to vector<2x8x16xbf16>
    %649 = vector.extract_strided_slice %608 {offsets = [0, 0, 32], sizes = [2, 8, 16], strides = [1, 1, 1]} : vector<2x8x64xbf16> to vector<2x8x16xbf16>
    %650 = vector.extract_strided_slice %611 {offsets = [0, 0, 32], sizes = [2, 8, 16], strides = [1, 1, 1]} : vector<2x8x64xbf16> to vector<2x8x16xbf16>
    "tpu.trace_start"() <{level = 10 : i32, message = "bqd,bkd->bqk"}> : () -> ()
    %cst_169 = arith.constant dense<0.000000e+00> : vector<2x8x8xf32>
    %651 = tpu.matmul %648, %649, %cst_169 {dimension_numbers = #tpu.dot_dimension_numbers<[2], [2], [1], [1], [0, 0, 0, 1, 1, 1], [0], [0]>} : vector<2x8x16xbf16>, vector<2x8x16xbf16>, vector<2x8x8xf32> -> vector<2x8x8xf32>
    "tpu.trace_stop"() : () -> ()
    %cst_170 = arith.constant 2.500000e-01 : f32
    %652 = vector.broadcast %cst_170 : f32 to vector<2x8x8xf32>
    %653 = arith.mulf %651, %652 : vector<2x8x8xf32>
    %cst_171 = arith.constant dense<0xFF800000> : vector<2x8xf32>
    %654 = vector.multi_reduction <maximumf>, %653, %cst_171 [2] : vector<2x8x8xf32> to vector<2x8xf32>
    %655 = vector.shape_cast %654 : vector<2x8xf32> to vector<2x8x1xf32>
    %656 = vector.broadcast %655 : vector<2x8x1xf32> to vector<2x8x8xf32>
    %657 = arith.subf %653, %656 : vector<2x8x8xf32>
    %658 = math.exp %657 : vector<2x8x8xf32>
    %cst_172 = arith.constant dense<0.000000e+00> : vector<2x8xf32>
    %659 = vector.multi_reduction <add>, %658, %cst_172 [2] : vector<2x8x8xf32> to vector<2x8xf32>
    %660 = vector.shape_cast %659 : vector<2x8xf32> to vector<2x8x1xf32>
    %661 = tpu.reciprocal %660 {approx = true} : vector<2x8x1xf32> -> vector<2x8x1xf32>
    %662 = vector.broadcast %661 : vector<2x8x1xf32> to vector<2x8x8xf32>
    %663 = arith.mulf %658, %662 : vector<2x8x8xf32>
    %664 = arith.truncf %663 : vector<2x8x8xf32> to vector<2x8x8xbf16>
    "tpu.trace_start"() <{level = 10 : i32, message = "bqk,bkd->bqd"}> : () -> ()
    %cst_173 = arith.constant dense<0.000000e+00> : vector<2x8x16xf32>
    %665 = tpu.matmul %664, %650, %cst_173 {dimension_numbers = #tpu.dot_dimension_numbers<[2], [1], [1], [2], [0, 0, 0, 1, 1, 2], [0], [0]>} : vector<2x8x8xbf16>, vector<2x8x16xbf16>, vector<2x8x16xf32> -> vector<2x8x16xf32>
    "tpu.trace_stop"() : () -> ()
    %666 = vector.extract_strided_slice %605 {offsets = [0, 0, 48], sizes = [2, 8, 16], strides = [1, 1, 1]} : vector<2x8x64xbf16> to vector<2x8x16xbf16>
    %667 = vector.extract_strided_slice %608 {offsets = [0, 0, 48], sizes = [2, 8, 16], strides = [1, 1, 1]} : vector<2x8x64xbf16> to vector<2x8x16xbf16>
    %668 = vector.extract_strided_slice %611 {offsets = [0, 0, 48], sizes = [2, 8, 16], strides = [1, 1, 1]} : vector<2x8x64xbf16> to vector<2x8x16xbf16>
    "tpu.trace_start"() <{level = 10 : i32, message = "bqd,bkd->bqk"}> : () -> ()
    %cst_174 = arith.constant dense<0.000000e+00> : vector<2x8x8xf32>
    %669 = tpu.matmul %666, %667, %cst_174 {dimension_numbers = #tpu.dot_dimension_numbers<[2], [2], [1], [1], [0, 0, 0, 1, 1, 1], [0], [0]>} : vector<2x8x16xbf16>, vector<2x8x16xbf16>, vector<2x8x8xf32> -> vector<2x8x8xf32>
    "tpu.trace_stop"() : () -> ()
    %cst_175 = arith.constant 2.500000e-01 : f32
    %670 = vector.broadcast %cst_175 : f32 to vector<2x8x8xf32>
    %671 = arith.mulf %669, %670 : vector<2x8x8xf32>
    %cst_176 = arith.constant dense<0xFF800000> : vector<2x8xf32>
    %672 = vector.multi_reduction <maximumf>, %671, %cst_176 [2] : vector<2x8x8xf32> to vector<2x8xf32>
    %673 = vector.shape_cast %672 : vector<2x8xf32> to vector<2x8x1xf32>
    %674 = vector.broadcast %673 : vector<2x8x1xf32> to vector<2x8x8xf32>
    %675 = arith.subf %671, %674 : vector<2x8x8xf32>
    %676 = math.exp %675 : vector<2x8x8xf32>
    %cst_177 = arith.constant dense<0.000000e+00> : vector<2x8xf32>
    %677 = vector.multi_reduction <add>, %676, %cst_177 [2] : vector<2x8x8xf32> to vector<2x8xf32>
    %678 = vector.shape_cast %677 : vector<2x8xf32> to vector<2x8x1xf32>
    %679 = tpu.reciprocal %678 {approx = true} : vector<2x8x1xf32> -> vector<2x8x1xf32>
    %680 = vector.broadcast %679 : vector<2x8x1xf32> to vector<2x8x8xf32>
    %681 = arith.mulf %676, %680 : vector<2x8x8xf32>
    %682 = arith.truncf %681 : vector<2x8x8xf32> to vector<2x8x8xbf16>
    "tpu.trace_start"() <{level = 10 : i32, message = "bqk,bkd->bqd"}> : () -> ()
    %cst_178 = arith.constant dense<0.000000e+00> : vector<2x8x16xf32>
    %683 = tpu.matmul %682, %668, %cst_178 {dimension_numbers = #tpu.dot_dimension_numbers<[2], [1], [1], [2], [0, 0, 0, 1, 1, 2], [0], [0]>} : vector<2x8x8xbf16>, vector<2x8x16xbf16>, vector<2x8x16xf32> -> vector<2x8x16xf32>
    "tpu.trace_stop"() : () -> ()
    %684 = tpu.concatenate %629, %647, %665, %683 in 2 : vector<2x8x16xf32>, vector<2x8x16xf32>, vector<2x8x16xf32>, vector<2x8x16xf32> -> vector<2x8x64xf32>
    %685 = vector.shape_cast %684 : vector<2x8x64xf32> to vector<16x64xf32>
    %c0_179 = arith.constant 0 : index
    %c0_180 = arith.constant 0 : index
    %686 = vector.load %arg11[%c0_179, %c0_180] : memref<64x64xf32, #tpu.memory_space<vmem>>, vector<64x64xf32>
    %687 = arith.truncf %685 : vector<16x64xf32> to vector<16x64xbf16>
    %688 = arith.truncf %686 : vector<64x64xf32> to vector<64x64xbf16>
    %cst_181 = arith.constant dense<0.000000e+00> : vector<16x64xf32>
    %689 = tpu.matmul %687, %688, %cst_181 {dimension_numbers = #tpu.dot_dimension_numbers<[1], [0], [0], [1], [0, 0, 1, 1], [], []>} : vector<16x64xbf16>, vector<64x64xbf16>, vector<16x64xf32> -> vector<16x64xf32>
    %c0_182 = arith.constant 0 : index
    %c0_183 = arith.constant 0 : index
    %690 = vector.load %arg12[%c0_182, %c0_183] : memref<1x64xf32, #tpu.memory_space<vmem>>, vector<1x64xf32>
    %691 = vector.broadcast %690 : vector<1x64xf32> to vector<16x64xf32>
    %692 = arith.addf %689, %691 : vector<16x64xf32>
    %693 = arith.addf %595, %692 : vector<16x64xf32>
    %c0_184 = arith.constant 0 : index
    %c0_185 = arith.constant 0 : index
    %694 = vector.load %arg13[%c0_184, %c0_185] : memref<1x64xf32, #tpu.memory_space<vmem>>, vector<1x64xf32>
    %c0_186 = arith.constant 0 : index
    %c0_187 = arith.constant 0 : index
    %695 = vector.load %arg14[%c0_186, %c0_187] : memref<1x64xf32, #tpu.memory_space<vmem>>, vector<1x64xf32>
    %cst_188 = arith.constant dense<0.000000e+00> : vector<16xf32>
    %696 = vector.multi_reduction <add>, %693, %cst_188 [1] : vector<16x64xf32> to vector<16xf32>
    %697 = vector.shape_cast %696 : vector<16xf32> to vector<16x1xf32>
    %cst_189 = arith.constant 6.400000e+01 : f32
    %698 = vector.broadcast %cst_189 : f32 to vector<16x1xf32>
    %699 = arith.divf %697, %698 : vector<16x1xf32>
    %700 = vector.broadcast %699 : vector<16x1xf32> to vector<16x64xf32>
    %701 = arith.subf %693, %700 : vector<16x64xf32>
    %702 = arith.mulf %701, %701 : vector<16x64xf32>
    %cst_190 = arith.constant dense<0.000000e+00> : vector<16xf32>
    %703 = vector.multi_reduction <add>, %702, %cst_190 [1] : vector<16x64xf32> to vector<16xf32>
    %704 = vector.shape_cast %703 : vector<16xf32> to vector<16x1xf32>
    %cst_191 = arith.constant 6.400000e+01 : f32
    %705 = vector.broadcast %cst_191 : f32 to vector<16x1xf32>
    %706 = arith.divf %704, %705 : vector<16x1xf32>
    %cst_192 = arith.constant 9.99999974E-6 : f32
    %707 = vector.broadcast %cst_192 : f32 to vector<16x1xf32>
    %708 = arith.addf %706, %707 : vector<16x1xf32>
    %709 = math.rsqrt %708 : vector<16x1xf32>
    %710 = vector.broadcast %709 : vector<16x1xf32> to vector<16x64xf32>
    %711 = arith.mulf %701, %710 : vector<16x64xf32>
    %712 = vector.broadcast %694 : vector<1x64xf32> to vector<16x64xf32>
    %713 = arith.mulf %711, %712 : vector<16x64xf32>
    %714 = vector.broadcast %695 : vector<1x64xf32> to vector<16x64xf32>
    %715 = arith.addf %713, %714 : vector<16x64xf32>
    %c0_193 = arith.constant 0 : index
    %c0_194 = arith.constant 0 : index
    %716 = vector.load %arg15[%c0_193, %c0_194] : memref<64x128xf32, #tpu.memory_space<vmem>>, vector<64x128xf32>
    %717 = arith.truncf %715 : vector<16x64xf32> to vector<16x64xbf16>
    %718 = arith.truncf %716 : vector<64x128xf32> to vector<64x128xbf16>
    %cst_195 = arith.constant dense<0.000000e+00> : vector<16x128xf32>
    %719 = tpu.matmul %717, %718, %cst_195 {dimension_numbers = #tpu.dot_dimension_numbers<[1], [0], [0], [1], [0, 0, 1, 1], [], []>} : vector<16x64xbf16>, vector<64x128xbf16>, vector<16x128xf32> -> vector<16x128xf32>
    %c0_196 = arith.constant 0 : index
    %c0_197 = arith.constant 0 : index
    %720 = vector.load %arg16[%c0_196, %c0_197] : memref<1x128xf32, #tpu.memory_space<vmem>>, vector<1x128xf32>
    %721 = vector.broadcast %720 : vector<1x128xf32> to vector<16x128xf32>
    %722 = arith.addf %719, %721 : vector<16x128xf32>
    %723 = arith.mulf %722, %722 : vector<16x128xf32>
    %724 = arith.mulf %722, %723 : vector<16x128xf32>
    %cst_198 = arith.constant 4.471500e-02 : f32
    %725 = vector.broadcast %cst_198 : f32 to vector<16x128xf32>
    %726 = arith.mulf %725, %724 : vector<16x128xf32>
    %727 = arith.addf %722, %726 : vector<16x128xf32>
    %cst_199 = arith.constant 0.797884583 : f32
    %728 = vector.broadcast %cst_199 : f32 to vector<16x128xf32>
    %729 = arith.mulf %728, %727 : vector<16x128xf32>
    %730 = math.tanh %729 : vector<16x128xf32>
    %cst_200 = arith.constant 1.000000e+00 : f32
    %731 = vector.broadcast %cst_200 : f32 to vector<16x128xf32>
    %732 = arith.addf %731, %730 : vector<16x128xf32>
    %cst_201 = arith.constant 5.000000e-01 : f32
    %733 = vector.broadcast %cst_201 : f32 to vector<16x128xf32>
    %734 = arith.mulf %733, %732 : vector<16x128xf32>
    %735 = arith.mulf %722, %734 : vector<16x128xf32>
    %c0_202 = arith.constant 0 : index
    %c0_203 = arith.constant 0 : index
    %736 = vector.load %arg17[%c0_202, %c0_203] : memref<128x64xf32, #tpu.memory_space<vmem>>, vector<128x64xf32>
    %737 = arith.truncf %735 : vector<16x128xf32> to vector<16x128xbf16>
    %738 = arith.truncf %736 : vector<128x64xf32> to vector<128x64xbf16>
    %cst_204 = arith.constant dense<0.000000e+00> : vector<16x64xf32>
    %739 = tpu.matmul %737, %738, %cst_204 {dimension_numbers = #tpu.dot_dimension_numbers<[1], [0], [0], [1], [0, 0, 1, 1], [], []>} : vector<16x128xbf16>, vector<128x64xbf16>, vector<16x64xf32> -> vector<16x64xf32>
    %c0_205 = arith.constant 0 : index
    %c0_206 = arith.constant 0 : index
    %740 = vector.load %arg18[%c0_205, %c0_206] : memref<1x64xf32, #tpu.memory_space<vmem>>, vector<1x64xf32>
    %741 = vector.broadcast %740 : vector<1x64xf32> to vector<16x64xf32>
    %742 = arith.addf %739, %741 : vector<16x64xf32>
    %743 = arith.addf %715, %742 : vector<16x64xf32>
    %c0_207 = arith.constant 0 : index
    %c0_208 = arith.constant 0 : index
    %744 = vector.load %arg19[%c0_207, %c0_208] : memref<1x64xf32, #tpu.memory_space<vmem>>, vector<1x64xf32>
    %c0_209 = arith.constant 0 : index
    %c0_210 = arith.constant 0 : index
    %745 = vector.load %arg20[%c0_209, %c0_210] : memref<1x64xf32, #tpu.memory_space<vmem>>, vector<1x64xf32>
    %cst_211 = arith.constant dense<0.000000e+00> : vector<16xf32>
    %746 = vector.multi_reduction <add>, %743, %cst_211 [1] : vector<16x64xf32> to vector<16xf32>
    %747 = vector.shape_cast %746 : vector<16xf32> to vector<16x1xf32>
    %cst_212 = arith.constant 6.400000e+01 : f32
    %748 = vector.broadcast %cst_212 : f32 to vector<16x1xf32>
    %749 = arith.divf %747, %748 : vector<16x1xf32>
    %750 = vector.broadcast %749 : vector<16x1xf32> to vector<16x64xf32>
    %751 = arith.subf %743, %750 : vector<16x64xf32>
    %752 = arith.mulf %751, %751 : vector<16x64xf32>
    %cst_213 = arith.constant dense<0.000000e+00> : vector<16xf32>
    %753 = vector.multi_reduction <add>, %752, %cst_213 [1] : vector<16x64xf32> to vector<16xf32>
    %754 = vector.shape_cast %753 : vector<16xf32> to vector<16x1xf32>
    %cst_214 = arith.constant 6.400000e+01 : f32
    %755 = vector.broadcast %cst_214 : f32 to vector<16x1xf32>
    %756 = arith.divf %754, %755 : vector<16x1xf32>
    %cst_215 = arith.constant 9.99999974E-6 : f32
    %757 = vector.broadcast %cst_215 : f32 to vector<16x1xf32>
    %758 = arith.addf %756, %757 : vector<16x1xf32>
    %759 = math.rsqrt %758 : vector<16x1xf32>
    %760 = vector.broadcast %759 : vector<16x1xf32> to vector<16x64xf32>
    %761 = arith.mulf %751, %760 : vector<16x64xf32>
    %762 = vector.broadcast %744 : vector<1x64xf32> to vector<16x64xf32>
    %763 = arith.mulf %761, %762 : vector<16x64xf32>
    %764 = vector.broadcast %745 : vector<1x64xf32> to vector<16x64xf32>
    %765 = arith.addf %763, %764 : vector<16x64xf32>
    %766 = vector.shape_cast %765 : vector<16x64xf32> to vector<2x8x64xf32>
    %c0_216 = arith.constant 0 : index
    %c0_217 = arith.constant 0 : index
    %767 = vector.load %arg21[%c0_216, %c0_217] : memref<64x32xf32, #tpu.memory_space<vmem>>, vector<64x32xf32>
    %768 = arith.truncf %765 : vector<16x64xf32> to vector<16x64xbf16>
    %769 = arith.truncf %767 : vector<64x32xf32> to vector<64x32xbf16>
    %cst_218 = arith.constant dense<0.000000e+00> : vector<16x32xf32>
    %770 = tpu.matmul %768, %769, %cst_218 {dimension_numbers = #tpu.dot_dimension_numbers<[1], [0], [0], [1], [0, 0, 1, 1], [], []>} : vector<16x64xbf16>, vector<64x32xbf16>, vector<16x32xf32> -> vector<16x32xf32>
    %c0_219 = arith.constant 0 : index
    %c0_220 = arith.constant 0 : index
    %771 = vector.load %arg22[%c0_219, %c0_220] : memref<1x32xf32, #tpu.memory_space<vmem>>, vector<1x32xf32>
    %772 = vector.broadcast %771 : vector<1x32xf32> to vector<16x32xf32>
    %773 = arith.addf %770, %772 : vector<16x32xf32>
    %774 = math.tanh %773 : vector<16x32xf32>
    %775 = vector.shape_cast %774 : vector<16x32xf32> to vector<2x8x32xf32>
    %c0_221 = arith.constant 0 : index
    %c0_222 = arith.constant 0 : index
    %776 = vector.load %arg23[%c0_221, %c0_222] : memref<1x32xf32, #tpu.memory_space<vmem>>, vector<1x32xf32>
    %777 = vector.shape_cast %776 : vector<1x32xf32> to vector<1x1x32xf32>
    %778 = vector.broadcast %777 : vector<1x1x32xf32> to vector<2x8x32xf32>
    %779 = arith.mulf %775, %778 : vector<2x8x32xf32>
    %cst_223 = arith.constant dense<0.000000e+00> : vector<2x8xf32>
    %780 = vector.multi_reduction <add>, %779, %cst_223 [2] : vector<2x8x32xf32> to vector<2x8xf32>
    %c0_224 = arith.constant 0 : index
    %c0_225 = arith.constant 0 : index
    %781 = vector.load %arg24[%c0_224, %c0_225] : memref<1x1xf32, #tpu.memory_space<vmem>>, vector<1x1xf32>
    %782 = vector.broadcast %781 : vector<1x1xf32> to vector<2x8xf32>
    %783 = arith.addf %780, %782 : vector<2x8xf32>
    %cst_226 = arith.constant dense<0xFF800000> : vector<2xf32>
    %784 = vector.multi_reduction <maximumf>, %783, %cst_226 [1] : vector<2x8xf32> to vector<2xf32>
    %785 = vector.shape_cast %784 : vector<2xf32> to vector<2x1xf32>
    %786 = vector.broadcast %785 : vector<2x1xf32> to vector<2x8xf32>
    %787 = arith.subf %783, %786 : vector<2x8xf32>
    %788 = math.exp %787 : vector<2x8xf32>
    %cst_227 = arith.constant dense<0.000000e+00> : vector<2xf32>
    %789 = vector.multi_reduction <add>, %788, %cst_227 [1] : vector<2x8xf32> to vector<2xf32>
    %790 = vector.shape_cast %789 : vector<2xf32> to vector<2x1xf32>
    %791 = tpu.reciprocal %790 {approx = true} : vector<2x1xf32> -> vector<2x1xf32>
    %792 = vector.broadcast %791 : vector<2x1xf32> to vector<2x8xf32>
    %793 = arith.mulf %788, %792 : vector<2x8xf32>
    %c0_228 = arith.constant 0 : index
    %c0_229 = arith.constant 0 : index
    %794 = vector.load %arg32[%c0_228, %c0_229] : memref<2x8xf32, #tpu.memory_space<vmem>>, vector<2x8xf32>
    tpu.vector_store %arg32[%c0_228, %c0_229], %793 {strides = array<i32>} : memref<2x8xf32, #tpu.memory_space<vmem>>, vector<2x8xf32>,
    %795 = vector.shape_cast %793 : vector<2x8xf32> to vector<2x1x8xf32>
    "tpu.trace_start"() <{level = 10 : i32, message = "bmt,btd->bmd"}> : () -> ()
    %cst_230 = arith.constant dense<0.000000e+00> : vector<2x1x64xf32>
    %796 = tpu.matmul %795, %766, %cst_230 {dimension_numbers = #tpu.dot_dimension_numbers<[2], [1], [1], [2], [0, 0, 0, 1, 1, 2], [0], [0]>} : vector<2x1x8xf32>, vector<2x8x64xf32>, vector<2x1x64xf32> -> vector<2x1x64xf32>
    "tpu.trace_stop"() : () -> ()
    %797 = vector.shape_cast %796 : vector<2x1x64xf32> to vector<2x64xf32>
    %c0_231 = arith.constant 0 : index
    %c0_232 = arith.constant 0 : index
    %798 = vector.load %arg25[%c0_231, %c0_232] : memref<64x32xf32, #tpu.memory_space<vmem>>, vector<64x32xf32>
    %799 = arith.truncf %797 : vector<2x64xf32> to vector<2x64xbf16>
    %800 = arith.truncf %798 : vector<64x32xf32> to vector<64x32xbf16>
    %cst_233 = arith.constant dense<0.000000e+00> : vector<2x32xf32>
    %801 = tpu.matmul %799, %800, %cst_233 {dimension_numbers = #tpu.dot_dimension_numbers<[1], [0], [0], [1], [0, 0, 1, 1], [], []>} : vector<2x64xbf16>, vector<64x32xbf16>, vector<2x32xf32> -> vector<2x32xf32>
    %c0_234 = arith.constant 0 : index
    %c0_235 = arith.constant 0 : index
    %802 = vector.load %arg26[%c0_234, %c0_235] : memref<1x32xf32, #tpu.memory_space<vmem>>, vector<1x32xf32>
    %803 = vector.broadcast %802 : vector<1x32xf32> to vector<2x32xf32>
    %804 = arith.addf %801, %803 : vector<2x32xf32>
    %cst_236 = arith.constant 0.000000e+00 : f32
    %805 = vector.broadcast %cst_236 : f32 to vector<2x32xf32>
    %806 = arith.maximumf %804, %805 : vector<2x32xf32>
    %c0_237 = arith.constant 0 : index
    %c0_238 = arith.constant 0 : index
    %807 = vector.load %arg27[%c0_237, %c0_238] : memref<32x16xf32, #tpu.memory_space<vmem>>, vector<32x16xf32>
    %808 = arith.truncf %806 : vector<2x32xf32> to vector<2x32xbf16>
    %809 = arith.truncf %807 : vector<32x16xf32> to vector<32x16xbf16>
    %cst_239 = arith.constant dense<0.000000e+00> : vector<2x16xf32>
    %810 = tpu.matmul %808, %809, %cst_239 {dimension_numbers = #tpu.dot_dimension_numbers<[1], [0], [0], [1], [0, 0, 1, 1], [], []>} : vector<2x32xbf16>, vector<32x16xbf16>, vector<2x16xf32> -> vector<2x16xf32>
    %c0_240 = arith.constant 0 : index
    %c0_241 = arith.constant 0 : index
    %811 = vector.load %arg28[%c0_240, %c0_241] : memref<1x16xf32, #tpu.memory_space<vmem>>, vector<1x16xf32>
    %812 = vector.broadcast %811 : vector<1x16xf32> to vector<2x16xf32>
    %813 = arith.addf %810, %812 : vector<2x16xf32>
    %cst_242 = arith.constant 0.000000e+00 : f32
    %814 = vector.broadcast %cst_242 : f32 to vector<2x16xf32>
    %815 = arith.maximumf %813, %814 : vector<2x16xf32>
    %c0_243 = arith.constant 0 : index
    %c0_244 = arith.constant 0 : index
    %816 = vector.load %arg29[%c0_243, %c0_244] : memref<1x16xf32, #tpu.memory_space<vmem>>, vector<1x16xf32>
    %817 = vector.broadcast %816 : vector<1x16xf32> to vector<2x16xf32>
    %818 = arith.mulf %815, %817 : vector<2x16xf32>
    %cst_245 = arith.constant dense<0.000000e+00> : vector<2xf32>
    %819 = vector.multi_reduction <add>, %818, %cst_245 [1] : vector<2x16xf32> to vector<2xf32>
    %820 = vector.shape_cast %819 : vector<2xf32> to vector<2x1xf32>
    %c0_246 = arith.constant 0 : index
    %c0_247 = arith.constant 0 : index
    %821 = vector.load %arg30[%c0_246, %c0_247] : memref<1x1xf32, #tpu.memory_space<vmem>>, vector<1x1xf32>
    %822 = vector.broadcast %821 : vector<1x1xf32> to vector<2x1xf32>
    %823 = arith.addf %820, %822 : vector<2x1xf32>
    %c0_248 = arith.constant 0 : index
    %c0_249 = arith.constant 0 : index
    %824 = vector.load %arg31[%c0_248, %c0_249] : memref<2x1xf32, #tpu.memory_space<vmem>>, vector<2x1xf32>
    tpu.vector_store %arg31[%c0_248, %c0_249], %823 {strides = array<i32>} : memref<2x1xf32, #tpu.memory_space<vmem>>, vector<2x1xf32>,
    return
  }
}

</mosaic_0001>

<bundles_post_ra>
// kernel: forward.1
= control target key start
LH: loop header
LB: loop body
LE: loop exit
PB: predicated region body
PF: predicated region fallthrough
CT: control target
= control target key end

     0   :  { %s5936_s6 = smov 1   ;;  %s5937_s10 = smov 2   ;;  %s7334_s0 = inlined_call_operand.smem [shape: u32[33], index: -1, kind: input, shape index: {}] }
   0x1   :  { %s6008_s5 = sld [smem:[%s7334_s0]]   ;;  %s5938_s14 = smov 3  }
   0x2   :  { %s6013_s9 = sld [smem:[%s7334_s0 + %s5936_s6]]   ;;  %s5939_s18 = smov 4  }
   0x3   :  { %s6018_s13 = sld [smem:[%s7334_s0 + %s5937_s10]]   ;;  %s5940_s22 = smov 5  }
   0x4   :  { %s6023_s17 = sld [smem:[%s7334_s0 + %s5938_s14]]   ;;  %s5941_s26 = smov 6  }
   0x5   :  { %s6028_s21 = sld [smem:[%s7334_s0 + %s5939_s18]]   ;;  %s5942_s30 = smov 7  }
   0x6   :  { %s6033_s25 = sld [smem:[%s7334_s0 + %s5940_s22]]   ;;  %s5943_s4 = smov 8  }
   0x7   :  { %7348 = sst [smem:[#allocation46_spill]] %s6008_s5  ;;  %s5944_s10 = smov 9  }
   0x8   :  { %s6038_s29 = sld [smem:[%s7334_s0 + %s5941_s26]]   ;;  %s5945_s15 = smov 10  }
   0x9   :  { %7349 = sst [smem:[#allocation47_spill]] %s6018_s13  ;;  %s5946_s20 = smov 11  }
   0xa   :  { %7350 = sst [smem:[#allocation48_spill]] %s6023_s17  ;;  %s5947_s26 = smov 12  }
   0xb   :  { %7351 = sst [smem:[#allocation49_spill]] %s6028_s21  ;;  %s5948_s1 = smov 13  }
   0xc   :  { %7352 = sst [smem:[#allocation50_spill]] %s6033_s25  ;;  %s5949_s7 = smov 14  }
   0xd   :  { %s6043_s3 = sld [smem:[%s7334_s0 + %s5942_s30]]   ;;  %s5951_s22 = smov 16  }
   0xe   :  { %s6048_s8 = sld [smem:[%s7334_s0 + %s5943_s4]]   ;;  %s5952_s28 = smov 17  }
   0xf   :  { %s6053_s14 = sld [smem:[%s7334_s0 + %s5944_s10]]   ;;  %s5961_s10 = smov 26  }
  0x10   :  { %s6058_s19 = sld [smem:[%s7334_s0 + %s5945_s15]]   ;;  %s5950_s15 = smov 15  }
  0x11   :  { %s6063_s24 = sld [smem:[%s7334_s0 + %s5946_s20]]   ;;  %s5962_s16 = smov 27  }
  0x12   :  { %s6068_s30 = sld [smem:[%s7334_s0 + %s5947_s26]]   ;;  %s5963_s23 = smov 28  }
  0x13   :  { %s6073_s6 = sld [smem:[%s7334_s0 + %s5948_s1]]   ;;  %s5960_s1 = smov 25  }
  0x14   :  { %s6078_s12 = sld [smem:[%s7334_s0 + %s5949_s7]]   ;;  %s5953_s7 = smov 18  }
  0x15   :  { %7353 = sst [smem:[#allocation51_spill]] %s6053_s14 }
  0x16   :  { %s6083_s20 = sld [smem:[%s7334_s0 + %s5950_s15]]   ;;  %s5954_s15 = smov 19  }
  0x17   :  { %7354 = sst [smem:[#allocation52_spill]] %s6063_s24 }
  0x18   :  { %s6088_s27 = sld [smem:[%s7334_s0 + %s5951_s22]]   ;;  %s5955_s22 = smov 20  }
  0x19   :  { %s6093_s4 = sld [smem:[%s7334_s0 + %s5952_s28]]   ;;  %s5956_s28 = smov 21  }
  0x1a   :  { %s6098_s24 = sld [smem:[%s7334_s0 + %s5953_s7]]   ;;  %s5957_s7 = smov 22  }
  0x1b   :  { %s6103_s14 = sld [smem:[%s7334_s0 + %s5954_s15]]   ;;  %s5958_s15 = smov 23  }
  0x1c   :  { %s6108_s25 = sld [smem:[%s7334_s0 + %s5955_s22]]   ;;  %s5959_s22 = smov 24  }
  0x1d   :  { %s6118_s21 = sld [smem:[%s7334_s0 + %s5957_s7]]  }
  0x1e   :  { %s6123_s17 = sld [smem:[%s7334_s0 + %s5958_s15]]  }
  0x1f   :  { %7355 = sst [smem:[#allocation53_spill]] %s6093_s4 }
  0x20   :  { %7356 = sst [smem:[#allocation54_spill]] %s6098_s24 }
  0x21   :  { %s6113_s4 = sld [smem:[%s7334_s0 + %s5956_s28]]  }
  0x22   :  { %7357 = sst [smem:[#allocation55_spill]] %s6108_s25 }
  0x23   :  { %s4897_s13 = sld [smem:[%s7334_s0 + %s5959_s22]]  }
  0x24   :  { %7359 = sst [smem:[#allocation57_spill]] %s6123_s17 }
  0x25   :  { %s6136_s5 = sld [smem:[%s7334_s0 + %s5961_s10]]   ;;  %s5965_s10 = smov 31  }
  0x26   :  { %s6141_s17 = sld [smem:[%s7334_s0 + %s5962_s16]]   ;;  %s5966_s16 = smov 32  }
  0x27   :  { %7358 = sst [smem:[#allocation56_spill]] %s6113_s4 }
  0x28   :  { %s6131_s4 = sld [smem:[%s7334_s0 + %s5960_s1]]   ;;  %s5964_s1 = smov 29  }
  0x29   :  { %s6146_s25 = sld [smem:[%s7334_s0 + %s5963_s23]]   ;;  %v71_v0 = vstv %s4897_s13  ;;  %s5967_s23 = smov 30  }
  0x2a   :  { %s6156_s24 = sld [smem:[%s7334_s0 + %s5965_s10]]   ;;  %72 = vst [vmem:[#allocation3] sm:$0x1] %v71_v0 }
  0x2b   :  { %s6161_s22 = sld [smem:[%s7334_s0 + %s5966_s16]]  }
  0x2c   :  { %7361 = sst [smem:[#allocation59_spill]] %s6141_s17 }
  0x2e   :  { %7360 = sst [smem:[#allocation58_spill]] %s6131_s4 }
  0x2f   :  { %s6151_s4 = sld [smem:[%s7334_s0 + %s5964_s1]]  }
  0x30   :  { %s4903_s1 = sld [smem:[%s7334_s0 + %s5967_s23]]  }
  0x36   :  { %v73_v1 = vstv %s4903_s1 }
  0x37   :  { %74 = vst [vmem:[#allocation4] sm:$0x1] %v73_v1 }
  0x38   :  { %75 = vsyncpa [#allocation6], 0 }
  0x39   :  { %76 = vsyncpa [#allocation9], 0 }
  0x3a   :  { %77 = vsyncpa [#allocation12], 0 }
  0x3b   :  { %78 = vsyncpa [#allocation15], 0 }
  0x3c   :  { %79 = vsyncpa [#allocation18], 0 }
  0x3d   :  { %80 = vsyncpa [#allocation21], 0 }
  0x3e   :  { %81 = vsyncpa [#allocation24], 0 }
  0x3f   :  { %82 = vsyncpa [#allocation27], 0 }
  0x40   :  { %83 = vsyncpa [#allocation30], 0 }
  0x41   :  { %84 = vsyncpa [#allocation33], 0 }
  0x42   :  { %85 = vsyncpa [#allocation7], 0  ;;  %s5968_s13 = smov [#allocation8]   ;;  %s5969_s17 = smov [#allocation11]  }
  0x43   :  { %s112_s28 = sshll.u32 %s5968_s13, 4  ;;  %s132_s0 = sshll.u32 %s5969_s17, 4  ;;  %s113_s28 = int_to_ptr.vmem [resolvable:$true] %s112_s28  ;;  %s133_s0 = int_to_ptr.vmem [resolvable:$true] %s132_s0 }
  0x44   :  { %s5496_s2 = scalar_lea.hbm %s6038_s29, 32 }
  0x45   :  { %p5497_p0 = scmp.ne.s32.totalorder %s6038_s29, %s5496_s2  ;;  %p5500_p1 = scmp.lt.u32.totalorder %s5496_s2, %s6038_s29 }
  0x47   :  { %p5502_p2 = pnand %p5500_p1, %p5497_p0 }
  0x49   :  { %5505 = shalt.err (!%p5502_p2)
}
  0x4a   :  { %s5506_s10 = scalar_lea.vmem %s113_s28, 32  ;;  %p5511_p4 = scmp.lt.s32.totalorder %s113_s28, %s113_s28 }
  0x4b   :  { %p5507_p3 = scmp.ne.s32.totalorder %s113_s28, %s5506_s10  ;;  %p5512_p5 = scmp.lt.s32.totalorder %s5506_s10, %s5506_s10 }
  0x4d   :  { %p5513_p6 = por %p5512_p5, %p5511_p4 }
  0x4f   :  { %p5514_p7 = pnand %p5513_p6, %p5507_p3 }
  0x51   :  { %5517 = shalt.err (!%p5514_p7)
}
  0x52   :  { %115 = dma.hbm_to_vmem [thread:$0]  %s6038_s29, 32, %s113_s28, [#allocation9]  }
  0x53   :  { %s5518_s7 = scalar_lea.hbm %s6048_s8, 16 }
  0x54   :  { %p5519_p8 = scmp.ne.s32.totalorder %s6048_s8, %s5518_s7  ;;  %p5522_p9 = scmp.lt.u32.totalorder %s5518_s7, %s6048_s8 }
  0x56   :  { %p5524_p10 = pnand %p5522_p9, %p5519_p8 }
  0x58   :  { %5527 = shalt.err (!%p5524_p10)
}
  0x59   :  { %s5528_s11 = scalar_lea.vmem %s133_s0, 16  ;;  %s5532_s16 = scalar_lea.vmem %s133_s0, 32 }
  0x5a   :  { %p5529_p11 = scmp.ne.s32.totalorder %s133_s0, %s5528_s11  ;;  %p5533_p12 = scmp.lt.s32.totalorder %s133_s0, %s133_s0 }
  0x5b   :  { %p5534_p13 = scmp.lt.s32.totalorder %s5532_s16, %s5528_s11 }
  0x5d   :  { %p5535_p0 = por %p5534_p13, %p5533_p12 }
  0x5f   :  { %p5536_p1 = pnand %p5535_p0, %p5529_p11 }
  0x61   :  { %5539 = shalt.err (!%p5536_p1)
}
  0x62   :  { %135 = dma.hbm_to_vmem [thread:$0]  %s6048_s8, 16, %s133_s0, [#allocation12]  }
  0x63   :  { %s5970_s15 = smov [#allocation14]   ;;  %s5971_s18 = smov [#allocation17]  }
  0x64   :  { %s156_s29 = sshll.u32 %s5970_s15, 4  ;;  %s176_s23 = sshll.u32 %s5971_s18, 4  ;;  %s157_s29 = int_to_ptr.vmem [resolvable:$true] %s156_s29  ;;  %s177_s23 = int_to_ptr.vmem [resolvable:$true] %s176_s23 }
  0x65   :  { %s5540_s26 = scalar_lea.hbm %s6068_s30, 16 }
  0x66   :  { %p5541_p2 = scmp.ne.s32.totalorder %s6068_s30, %s5540_s26  ;;  %p5544_p3 = scmp.lt.u32.totalorder %s5540_s26, %s6068_s30 }
  0x68   :  { %p5546_p4 = pnand %p5544_p3, %p5541_p2 }
  0x6a   :  { %5549 = shalt.err (!%p5546_p4)
}
  0x6b   :  { %s5550_s1 = scalar_lea.vmem %s157_s29, 16  ;;  %s5554_s13 = scalar_lea.vmem %s157_s29, 32 }
  0x6c   :  { %p5551_p5 = scmp.ne.s32.totalorder %s157_s29, %s5550_s1  ;;  %p5555_p6 = scmp.lt.s32.totalorder %s157_s29, %s157_s29 }
  0x6d   :  { %p5556_p7 = scmp.lt.s32.totalorder %s5554_s13, %s5550_s1 }
  0x6f   :  { %p5557_p8 = por %p5556_p7, %p5555_p6 }
  0x71   :  { %p5558_p9 = pnand %p5557_p8, %p5551_p5 }
  0x73   :  { %5561 = shalt.err (!%p5558_p9)
}
  0x74   :  { %159 = dma.hbm_to_vmem [thread:$0]  %s6068_s30, 16, %s157_s29, [#allocation15]  }
  0x75   :  { %s5562_s8 = scalar_lea.hbm %s6078_s12, 16 }
  0x76   :  { %p5563_p10 = scmp.ne.s32.totalorder %s6078_s12, %s5562_s8  ;;  %p5566_p11 = scmp.lt.u32.totalorder %s5562_s8, %s6078_s12 }
  0x78   :  { %p5568_p12 = pnand %p5566_p11, %p5563_p10 }
  0x7a   :  { %5571 = shalt.err (!%p5568_p12)
}
  0x7b   :  { %s5572_s28 = scalar_lea.vmem %s177_s23, 16  ;;  %s5576_s17 = scalar_lea.vmem %s177_s23, 32 }
  0x7c   :  { %p5573_p13 = scmp.ne.s32.totalorder %s177_s23, %s5572_s28  ;;  %p5577_p0 = scmp.lt.s32.totalorder %s177_s23, %s177_s23 }
  0x7d   :  { %p5578_p1 = scmp.lt.s32.totalorder %s5576_s17, %s5572_s28 }
  0x7f   :  { %p5579_p2 = por %p5578_p1, %p5577_p0 }
  0x81   :  { %p5580_p3 = pnand %p5579_p2, %p5573_p13 }
  0x83   :  { %5583 = shalt.err (!%p5580_p3)
}
  0x84   :  { %179 = dma.hbm_to_vmem [thread:$0]  %s6078_s12, 16, %s177_s23, [#allocation18]  }
  0x85   :  { %s5972_s0 = smov [#allocation20]   ;;  %s5973_s2 = smov [#allocation23]  }
  0x86   :  { %s198_s30 = sshll.u32 %s5972_s0, 4  ;;  %s220_s10 = sshll.u32 %s5973_s2, 4  ;;  %s199_s30 = int_to_ptr.vmem [resolvable:$true] %s198_s30  ;;  %s221_s10 = int_to_ptr.vmem [resolvable:$true] %s220_s10 }
  0x87   :  { %s5584_s7 = scalar_lea.hbm %s6088_s27, 16 }
  0x88   :  { %p5585_p4 = scmp.ne.s32.totalorder %s6088_s27, %s5584_s7  ;;  %p5588_p5 = scmp.lt.u32.totalorder %s5584_s7, %s6088_s27 }
  0x8a   :  { %p5590_p6 = pnand %p5588_p5, %p5585_p4 }
  0x8c   :  { %5593 = shalt.err (!%p5590_p6)
}
  0x8d   :  { %s5594_s11 = scalar_lea.vmem %s199_s30, 16  ;;  %s5598_s16 = scalar_lea.vmem %s199_s30, 32 }
  0x8e   :  { %p5595_p7 = scmp.ne.s32.totalorder %s199_s30, %s5594_s11  ;;  %p5599_p8 = scmp.lt.s32.totalorder %s199_s30, %s199_s30 }
  0x8f   :  { %p5600_p9 = scmp.lt.s32.totalorder %s5598_s16, %s5594_s11 }
  0x91   :  { %p5601_p10 = por %p5600_p9, %p5599_p8 }
  0x93   :  { %p5602_p11 = pnand %p5601_p10, %p5595_p7 }
  0x95   :  { %5605 = shalt.err (!%p5602_p11)
}
  0x96   :  { %201 = dma.hbm_to_vmem [thread:$0]  %s6088_s27, 16, %s199_s30, [#allocation21]  }
  0x97   :  { %s5606_s12 = scalar_lea.hbm %s6103_s14, 16 }
  0x98   :  { %p5607_p12 = scmp.ne.s32.totalorder %s6103_s14, %s5606_s12  ;;  %p5610_p13 = scmp.lt.u32.totalorder %s5606_s12, %s6103_s14 }
  0x9a   :  { %p5612_p0 = pnand %p5610_p13, %p5607_p12 }
  0x9c   :  { %5615 = shalt.err (!%p5612_p0)
}
  0x9d   :  { %s5616_s15 = scalar_lea.vmem %s221_s10, 16  ;;  %s5620_s29 = scalar_lea.vmem %s221_s10, 32 }
  0x9e   :  { %p5617_p1 = scmp.ne.s32.totalorder %s221_s10, %s5616_s15  ;;  %p5621_p2 = scmp.lt.s32.totalorder %s221_s10, %s221_s10 }
  0x9f   :  { %p5622_p3 = scmp.lt.s32.totalorder %s5620_s29, %s5616_s15 }
  0xa1   :  { %p5623_p4 = por %p5622_p3, %p5621_p2 }
  0xa3   :  { %p5624_p5 = pnand %p5623_p4, %p5617_p1 }
  0xa5   :  { %5627 = shalt.err (!%p5624_p5)
}
  0xa6   :  { %223 = dma.hbm_to_vmem [thread:$0]  %s6103_s14, 16, %s221_s10, [#allocation24]  }
  0xa7   :  { %s5974_s18 = smov [#allocation26]   ;;  %s5975_s23 = smov [#allocation29]  }
  0xa8   :  { %s242_s27 = sshll.u32 %s5974_s18, 4  ;;  %s266_s26 = sshll.u32 %s5975_s23, 4  ;;  %s243_s27 = int_to_ptr.vmem [resolvable:$true] %s242_s27  ;;  %s267_s26 = int_to_ptr.vmem [resolvable:$true] %s266_s26 }
  0xa9   :  { %s5628_s1 = scalar_lea.hbm %s6118_s21, 16 }
  0xaa   :  { %p5629_p6 = scmp.ne.s32.totalorder %s6118_s21, %s5628_s1  ;;  %p5632_p7 = scmp.lt.u32.totalorder %s5628_s1, %s6118_s21 }
  0xac   :  { %p5634_p8 = pnand %p5632_p7, %p5629_p6 }
  0xae   :  { %5637 = shalt.err (!%p5634_p8)
}
  0xaf   :  { %s5638_s13 = scalar_lea.vmem %s243_s27, 16  ;;  %s5642_s8 = scalar_lea.vmem %s243_s27, 32 }
  0xb0   :  { %p5639_p9 = scmp.ne.s32.totalorder %s243_s27, %s5638_s13  ;;  %p5643_p10 = scmp.lt.s32.totalorder %s243_s27, %s243_s27 }
  0xb1   :  { %p5644_p11 = scmp.lt.s32.totalorder %s5642_s8, %s5638_s13 }
  0xb3   :  { %p5645_p12 = por %p5644_p11, %p5643_p10 }
  0xb5   :  { %p5646_p13 = pnand %p5645_p12, %p5639_p9 }
  0xb7   :  { %5649 = shalt.err (!%p5646_p13)
}
  0xb8   :  { %245 = dma.hbm_to_vmem [thread:$0]  %s6118_s21, 16, %s243_s27, [#allocation27]  }
  0xb9   :  { %s5650_s14 = scalar_lea.hbm %s6136_s5, 16 }
  0xba   :  { %p5651_p0 = scmp.ne.s32.totalorder %s6136_s5, %s5650_s14  ;;  %p5654_p1 = scmp.lt.u32.totalorder %s5650_s14, %s6136_s5 }
  0xbc   :  { %p5656_p2 = pnand %p5654_p1, %p5651_p0 }
  0xbe   :  { %5659 = shalt.err (!%p5656_p2)
}
  0xbf   :  { %s5660_s28 = scalar_lea.vmem %s267_s26, 16  ;;  %s5664_s17 = scalar_lea.vmem %s267_s26, 32 }
  0xc0   :  { %p5661_p3 = scmp.ne.s32.totalorder %s267_s26, %s5660_s28  ;;  %p5665_p4 = scmp.lt.s32.totalorder %s267_s26, %s267_s26 }
  0xc1   :  { %p5666_p5 = scmp.lt.s32.totalorder %s5664_s17, %s5660_s28 }
  0xc3   :  { %p5667_p6 = por %p5666_p5, %p5665_p4 }
  0xc5   :  { %p5668_p7 = pnand %p5667_p6, %p5661_p3 }
  0xc7   :  { %5671 = shalt.err (!%p5668_p7)
}
  0xc8   :  { %269 = dma.hbm_to_vmem [thread:$0]  %s6136_s5, 16, %s267_s26, [#allocation30]  }
  0xc9   :  { %s5976_s0 = smov [#allocation5]   ;;  %s5977_s30 = smov [#allocation10]  }
  0xca   :  { %s94_s21 = sshll.u32 %s5976_s0, 4  ;;  %s122_s2 = sshll.u32 %s5977_s30, 4  ;;  %s95_s21 = int_to_ptr.vmem [resolvable:$true] %s94_s21  ;;  %s123_s2 = int_to_ptr.vmem [resolvable:$true] %s122_s2 }
  0xcb   :  { %s5672_s10 = scalar_lea.hbm %s6013_s9, 256 }
  0xcc   :  { %p5673_p8 = scmp.ne.s32.totalorder %s6013_s9, %s5672_s10  ;;  %p5676_p9 = scmp.lt.u32.totalorder %s5672_s10, %s6013_s9 }
  0xce   :  { %p5678_p10 = pnand %p5676_p9, %p5673_p8 }
  0xd0   :  { %5681 = shalt.err (!%p5678_p10)
}
  0xd1   :  { %s5682_s7 = scalar_lea.vmem %s95_s21, 256  ;;  %p5687_p12 = scmp.lt.s32.totalorder %s95_s21, %s95_s21 }
  0xd2   :  { %p5683_p11 = scmp.ne.s32.totalorder %s95_s21, %s5682_s7  ;;  %p5688_p13 = scmp.lt.s32.totalorder %s5682_s7, %s5682_s7 }
  0xd4   :  { %p5689_p0 = por %p5688_p13, %p5687_p12 }
  0xd6   :  { %p5690_p1 = pnand %p5689_p0, %p5683_p11 }
  0xd8   :  { %5693 = shalt.err (!%p5690_p1)
}
  0xd9   :  { %97 = dma.hbm_to_vmem [thread:$0]  %s6013_s9, 256, %s95_s21, [#allocation6]  }
  0xda   :  { %s5694_s5 = scalar_lea.hbm %s6043_s3, 16 }
  0xdb   :  { %p5695_p2 = scmp.ne.s32.totalorder %s6043_s3, %s5694_s5  ;;  %p5698_p3 = scmp.lt.u32.totalorder %s5694_s5, %s6043_s3 }
  0xdd   :  { %p5700_p4 = pnand %p5698_p3, %p5695_p2 }
  0xdf   :  { %5703 = shalt.err (!%p5700_p4)
}
  0xe0   :  { %s5704_s11 = scalar_lea.vmem %s123_s2, 16  ;;  %s5708_s16 = scalar_lea.vmem %s123_s2, 32 }
  0xe1   :  { %p5705_p5 = scmp.ne.s32.totalorder %s123_s2, %s5704_s11  ;;  %p5709_p6 = scmp.lt.s32.totalorder %s123_s2, %s123_s2 }
  0xe2   :  { %p5710_p7 = scmp.lt.s32.totalorder %s5708_s16, %s5704_s11 }
  0xe4   :  { %p5711_p8 = por %p5710_p7, %p5709_p6 }
  0xe6   :  { %p5712_p9 = pnand %p5711_p8, %p5705_p5 }
  0xe8   :  { %5715 = shalt.err (!%p5712_p9)
}
  0xe9   :  { %125 = dma.hbm_to_vmem [thread:$0]  %s6043_s3, 16, %s123_s2, [#allocation9]  }
  0xea   :  { %s5978_s12 = smov [#allocation13]   ;;  %s5979_s15 = smov [#allocation16]  }
  0xeb   :  { %s144_s9 = sshll.u32 %s5978_s12, 4  ;;  %s166_s29 = sshll.u32 %s5979_s15, 4  ;;  %s145_s9 = int_to_ptr.vmem [resolvable:$true] %s144_s9  ;;  %s167_s29 = int_to_ptr.vmem [resolvable:$true] %s166_s29 }
  0xec   :  { %s5716_s18 = scalar_lea.hbm %s6058_s19, 32 }
  0xed   :  { %p5717_p10 = scmp.ne.s32.totalorder %s6058_s19, %s5716_s18  ;;  %p5720_p11 = scmp.lt.u32.totalorder %s5716_s18, %s6058_s19 }
  0xef   :  { %p5722_p12 = pnand %p5720_p11, %p5717_p10 }
  0xf1   :  { %5725 = shalt.err (!%p5722_p12)
}
  0xf2   :  { %s5726_s27 = scalar_lea.vmem %s145_s9, 32  ;;  %p5731_p0 = scmp.lt.s32.totalorder %s145_s9, %s145_s9 }
  0xf3   :  { %p5727_p13 = scmp.ne.s32.totalorder %s145_s9, %s5726_s27  ;;  %p5732_p1 = scmp.lt.s32.totalorder %s5726_s27, %s5726_s27 }
  0xf5   :  { %p5733_p2 = por %p5732_p1, %p5731_p0 }
  0xf7   :  { %p5734_p3 = pnand %p5733_p2, %p5727_p13 }
  0xf9   :  { %5737 = shalt.err (!%p5734_p3)
}
  0xfa   :  { %147 = dma.hbm_to_vmem [thread:$0]  %s6058_s19, 32, %s145_s9, [#allocation12]  }
  0xfb   :  { %s5738_s3 = scalar_lea.hbm %s6073_s6, 16 }
  0xfc   :  { %p5739_p4 = scmp.ne.s32.totalorder %s6073_s6, %s5738_s3  ;;  %p5742_p5 = scmp.lt.u32.totalorder %s5738_s3, %s6073_s6 }
  0xfe   :  { %p5744_p6 = pnand %p5742_p5, %p5739_p4 }
 0x100   :  { %5747 = shalt.err (!%p5744_p6)
}
 0x101   :  { %s5748_s23 = scalar_lea.vmem %s167_s29, 16  ;;  %s5752_s26 = scalar_lea.vmem %s167_s29, 32 }
 0x102   :  { %p5749_p7 = scmp.ne.s32.totalorder %s167_s29, %s5748_s23  ;;  %p5753_p8 = scmp.lt.s32.totalorder %s167_s29, %s167_s29 }
 0x103   :  { %p5754_p9 = scmp.lt.s32.totalorder %s5752_s26, %s5748_s23 }
 0x105   :  { %p5755_p10 = por %p5754_p9, %p5753_p8 }
 0x107   :  { %p5756_p11 = pnand %p5755_p10, %p5749_p7 }
 0x109   :  { %5759 = shalt.err (!%p5756_p11)
}
 0x10a   :  { %169 = dma.hbm_to_vmem [thread:$0]  %s6073_s6, 16, %s167_s29, [#allocation15]  }
 0x10b   :  { %s5980_s1 = smov [#allocation19]   ;;  %s5760_s13 = scalar_lea.hbm %s6083_s20, 1024 }
 0x10c   :  { %s185_s19 = sshll.u32 %s5980_s1, 4  ;;  %p5761_p12 = scmp.ne.s32.totalorder %s6083_s20, %s5760_s13  ;;  %s186_s19 = int_to_ptr.vmem [resolvable:$true] %s185_s19 }
 0x10d   :  { %p5764_p13 = scmp.lt.u32.totalorder %s5760_s13, %s6083_s20 }
 0x10f   :  { %p5766_p0 = pnand %p5764_p13, %p5761_p12 }
 0x111   :  { %5769 = shalt.err (!%p5766_p0)
}
 0x112   :  { %s5770_s8 = scalar_lea.vmem %s186_s19, 1024  ;;  %p5775_p2 = scmp.lt.s32.totalorder %s186_s19, %s186_s19 }
 0x113   :  { %p5771_p1 = scmp.ne.s32.totalorder %s186_s19, %s5770_s8  ;;  %p5776_p3 = scmp.lt.s32.totalorder %s5770_s8, %s5770_s8 }
 0x115   :  { %p5777_p4 = por %p5776_p3, %p5775_p2 }
 0x117   :  { %p5778_p5 = pnand %p5777_p4, %p5771_p1 }
 0x119   :  { %5781 = shalt.err (!%p5778_p5)
}
 0x11a   :  { %s5981_s14 = smov 128   ;;  %s7362_s28 = sld [smem:[#allocation54_spill]] }
 0x11b   :  { %s5982_s6 = smov 8   ;;  %s5983_s17 = smov [#allocation22]  }
 0x11c   :  { %191 = dma.hbm_to_vmem [thread:$0]  %s6083_s20, 1024, %s186_s19, [#allocation18], %s5981_s14, %s5981_s14, %s5982_s6  }
 0x11d   :  { %s210_s0 = sshll.u32 %s5983_s17, 4  ;;  %s5984_s21 = smov [#allocation25]   ;;  %s211_s0 = int_to_ptr.vmem [resolvable:$true] %s210_s0 }
 0x11e   :  { %s230_s30 = sshll.u32 %s5984_s21, 4  ;;  %s231_s30 = int_to_ptr.vmem [resolvable:$true] %s230_s30 }
 0x120   :  { %s5782_s2 = scalar_lea.hbm %s7362_s28, 16 }
 0x121   :  { %p5783_p6 = scmp.ne.s32.totalorder %s7362_s28, %s5782_s2  ;;  %p5786_p7 = scmp.lt.u32.totalorder %s5782_s2, %s7362_s28 }
 0x123   :  { %p5788_p8 = pnand %p5786_p7, %p5783_p6 }
 0x125   :  { %5791 = shalt.err (!%p5788_p8)
}
 0x126   :  { %s5792_s10 = scalar_lea.vmem %s211_s0, 16  ;;  %s5796_s7 = scalar_lea.vmem %s211_s0, 32 }
 0x127   :  { %p5793_p9 = scmp.ne.s32.totalorder %s211_s0, %s5792_s10  ;;  %p5797_p10 = scmp.lt.s32.totalorder %s211_s0, %s211_s0 }
 0x128   :  { %p5798_p11 = scmp.lt.s32.totalorder %s5796_s7, %s5792_s10 }
 0x12a   :  { %p5799_p12 = por %p5798_p11, %p5797_p10 }
 0x12c   :  { %p5800_p13 = pnand %p5799_p12, %p5793_p9 }
 0x12e   :  { %5803 = shalt.err (!%p5800_p13)
}
 0x12f   :  { %s7363_s20 = sld [smem:[#allocation55_spill]] }
 0x130   :  { %213 = dma.hbm_to_vmem [thread:$0]  %s7362_s28, 16, %s211_s0, [#allocation21]  }
 0x135   :  { %s5804_s5 = scalar_lea.hbm %s7363_s20, 16 }
 0x136   :  { %p5805_p0 = scmp.ne.s32.totalorder %s7363_s20, %s5804_s5  ;;  %p5808_p1 = scmp.lt.u32.totalorder %s5804_s5, %s7363_s20 }
 0x138   :  { %p5810_p2 = pnand %p5808_p1, %p5805_p0 }
 0x13a   :  { %5813 = shalt.err (!%p5810_p2)
}
 0x13b   :  { %s5814_s11 = scalar_lea.vmem %s231_s30, 16  ;;  %s5818_s16 = scalar_lea.vmem %s231_s30, 32 }
 0x13c   :  { %p5815_p3 = scmp.ne.s32.totalorder %s231_s30, %s5814_s11  ;;  %p5819_p4 = scmp.lt.s32.totalorder %s231_s30, %s231_s30 }
 0x13d   :  { %p5820_p5 = scmp.lt.s32.totalorder %s5818_s16, %s5814_s11 }
 0x13f   :  { %p5821_p6 = por %p5820_p5, %p5819_p4 }
 0x141   :  { %p5822_p7 = pnand %p5821_p6, %p5815_p3 }
 0x143   :  { %5825 = shalt.err (!%p5822_p7)
}
 0x144   :  { %s7364_s12 = sld [smem:[#allocation57_spill]]  ;;  %s5985_s9 = smov [#allocation28]  }
 0x145   :  { %233 = dma.hbm_to_vmem [thread:$0]  %s7363_s20, 16, %s231_s30, [#allocation24]  }
 0x146   :  { %s252_s15 = sshll.u32 %s5985_s9, 4  ;;  %s5986_s29 = smov [#allocation31]   ;;  %s253_s15 = int_to_ptr.vmem [resolvable:$true] %s252_s15 }
 0x147   :  { %s278_s18 = sshll.u32 %s5986_s29, 4  ;;  %s279_s18 = int_to_ptr.vmem [resolvable:$true] %s278_s18 }
 0x14a   :  { %s5826_s27 = scalar_lea.hbm %s7364_s12, 16 }
 0x14b   :  { %p5827_p8 = scmp.ne.s32.totalorder %s7364_s12, %s5826_s27  ;;  %p5830_p9 = scmp.lt.u32.totalorder %s5826_s27, %s7364_s12 }
 0x14d   :  { %p5832_p10 = pnand %p5830_p9, %p5827_p8 }
 0x14f   :  { %5835 = shalt.err (!%p5832_p10)
}
 0x150   :  { %s5836_s3 = scalar_lea.vmem %s253_s15, 16  ;;  %s5840_s23 = scalar_lea.vmem %s253_s15, 32 }
 0x151   :  { %p5837_p11 = scmp.ne.s32.totalorder %s253_s15, %s5836_s3  ;;  %p5841_p12 = scmp.lt.s32.totalorder %s253_s15, %s253_s15 }
 0x152   :  { %p5842_p13 = scmp.lt.s32.totalorder %s5840_s23, %s5836_s3 }
 0x154   :  { %p5843_p0 = por %p5842_p13, %p5841_p12 }
 0x156   :  { %p5844_p1 = pnand %p5843_p0, %p5837_p11 }
 0x158   :  { %5847 = shalt.err (!%p5844_p1)
}
 0x159   :  { %255 = dma.hbm_to_vmem [thread:$0]  %s7364_s12, 16, %s253_s15, [#allocation27]  }
 0x15a   :  { %s5848_s26 = scalar_lea.hbm %s6146_s25, 16 }
 0x15b   :  { %p5849_p2 = scmp.ne.s32.totalorder %s6146_s25, %s5848_s26  ;;  %p5852_p3 = scmp.lt.u32.totalorder %s5848_s26, %s6146_s25 }
 0x15d   :  { %p5854_p4 = pnand %p5852_p3, %p5849_p2 }
 0x15f   :  { %5857 = shalt.err (!%p5854_p4)
}
 0x160   :  { %s5858_s1 = scalar_lea.vmem %s279_s18, 16  ;;  %s5862_s19 = scalar_lea.vmem %s279_s18, 32 }
 0x161   :  { %p5859_p5 = scmp.ne.s32.totalorder %s279_s18, %s5858_s1  ;;  %p5863_p6 = scmp.lt.s32.totalorder %s279_s18, %s279_s18 }
 0x162   :  { %p5864_p7 = scmp.lt.s32.totalorder %s5862_s19, %s5858_s1 }
 0x164   :  { %p5865_p8 = por %p5864_p7, %p5863_p6 }
 0x166   :  { %p5866_p9 = pnand %p5865_p8, %p5859_p5 }
 0x168   :  { %5869 = shalt.err (!%p5866_p9)
}
 0x169   :  { %281 = dma.hbm_to_vmem [thread:$0]  %s6146_s25, 16, %s279_s18, [#allocation30]  }
 0x16a   :  { %s5987_s13 = smov [#allocation32]   ;;  %s5870_s14 = scalar_lea.hbm %s6151_s4, 16 }
 0x16b   :  { %s288_s8 = sshll.u32 %s5987_s13, 4  ;;  %p5871_p10 = scmp.ne.s32.totalorder %s6151_s4, %s5870_s14  ;;  %s289_s8 = int_to_ptr.vmem [resolvable:$true] %s288_s8 }
 0x16c   :  { %p5874_p11 = scmp.lt.u32.totalorder %s5870_s14, %s6151_s4 }
 0x16e   :  { %p5876_p12 = pnand %p5874_p11, %p5871_p10 }
 0x170   :  { %5879 = shalt.err (!%p5876_p12)
}
 0x171   :  { %s5880_s28 = scalar_lea.vmem %s289_s8, 16  ;;  %s5884_s6 = scalar_lea.vmem %s289_s8, 32 }
 0x172   :  { %p5881_p13 = scmp.ne.s32.totalorder %s289_s8, %s5880_s28  ;;  %p5885_p0 = scmp.lt.s32.totalorder %s289_s8, %s289_s8 }
 0x173   :  { %p5886_p1 = scmp.lt.s32.totalorder %s5884_s6, %s5880_s28 }
 0x175   :  { %p5887_p2 = por %p5886_p1, %p5885_p0 }
 0x177   :  { %p5888_p3 = pnand %p5887_p2, %p5881_p13 }
 0x179   :  { %5891 = shalt.err (!%p5888_p3)
}
 0x17a   :  { %291 = dma.hbm_to_vmem [thread:$0]  %s6151_s4, 16, %s289_s8, [#allocation33]  }
 0x17b   :  { %5914 = dma.done.wait [#allocation6], 256  }
 0x17c   :  { %5915 = vsyncadd [#allocation6], 4294967040 }
 0x17d   :  { %5916 = dma.done.wait [#allocation9], 48  }
 0x17e   :  { %5917 = vsyncadd [#allocation9], 4294967248 }
 0x17f   :  { %5918 = dma.done.wait [#allocation12], 48  }
 0x180   :  { %5919 = vsyncadd [#allocation12], 4294967248 }
 0x181   :  { %5920 = dma.done.wait [#allocation15], 32  }
 0x182   :  { %5921 = vsyncadd [#allocation15], 4294967264 }
 0x183   :  { %5922 = dma.done.wait [#allocation18], 1040  }
 0x184   :  { %5923 = vsyncadd [#allocation18], 4294966256 }
 0x185   :  { %5924 = dma.done.wait [#allocation21], 32  }
 0x186   :  { %5925 = vsyncadd [#allocation21], 4294967264 }
 0x187   :  { %5926 = dma.done.wait [#allocation24], 32  }
 0x188   :  { %5927 = vsyncadd [#allocation24], 4294967264 }
 0x189   :  { %5928 = dma.done.wait [#allocation27], 32  }
 0x18a   :  { %5929 = vsyncadd [#allocation27], 4294967264 }
 0x18b   :  { %5930 = dma.done.wait [#allocation30], 32  }
 0x18c   :  { %5931 = vsyncadd [#allocation30], 4294967264 }
 0x18d   :  { %5932 = dma.done.wait [#allocation33], 16  }
 0x18e   :  { %5933 = vsyncadd [#allocation33], 4294967280  ;;  %s7365_s25 = sld [smem:[#allocation46_spill]]  ;;  %s7366_s4 = sld [smem:[#allocation47_spill]]  ;;  %v5988_v2 = vmov 0   ;;  %v352_v3 = vld [vmem:[#allocation5 + $0x8] sm:$0xff]  ;;  %v366_v23 = vlaneseq }
 0x18f   :  { %419 = vmatprep.mubr.bf16.mxu1 %v5988_v2  ;;  %629 = vmatprep.mubr.bf16.mxu0 %v5988_v2  ;;  %vm380_vm0 = vcmask 1043456   ;;  %v351_v4 = vld [vmem:[#allocation5] sm:$0xff]  ;;  %v364_v6 = vpack.c.bf16 %v352_v3, %v352_v3  ;;  %vm376_vm1 = vcmask 64512   ;;  %s7367_s17 = sld [smem:[#allocation48_spill]]  ;;  %vm495_vm2 = vcmask 1041409   ;;  %s5989_s0 = smov 64  }
 0x190   :  { %5308 = vset.pattern.permute.xlu0 %v5988_v2  ;;  %5309 = vset.pattern.permute.xlu1 %v5988_v2  ;;  %v363_v7 = vpack.c.bf16 %v351_v4, %v351_v4  ;;  %v6281_v24 = vshrl.u32 %v366_v23, 7  ;;  %vm502_vm3 = vcmask 1043459   ;;  %vm505_vm4 = vcmask 1041408   ;;  %s5990_s21 = smov 32   ;;  %s7368_s30 = sld [smem:[#allocation49_spill]] }
 0x191   :  { %4906 = vmatprep.subr.msk.bf16.mxu1 %vm380_vm0, %v364_v6  ;;  %vm434_vm5 = vcmask 261120   ;;  %vm568_vm6 = vcmask 253952   ;;  %vm587_vm7 = vcmask 516352   ;;  %s7369_s2 = sld [smem:[#allocation50_spill]]  ;;  %vm1723_vm8 = vcmask 523264   ;;  %s7370_s10 = sld [smem:[#allocation51_spill]] }
 0x192   :  { %v382_v15 = vsel %vm380_vm0, %v363_v7, 0  ;;  %v6284_v27 = vsub.s32 1, %v6281_v24  ;;  %v6288_v30 = vsub.s32 0, %v6281_v24  ;;  %vm5993_vm9 = vmmov 0   ;;  %s5994_s7 = smov 48   ;;  %s5995_s20 = smov 112  }
 0x193   :  { %388 = vmatpush1.bf16.msra.mxu1 %v382_v15  ;;  %vm3144_vm10 = vcmask 130048   ;;  %s5996_s5 = smov 96   ;;  %s5997_s11 = smov 16   ;;  %vm4054_vm11 = vcmask 392192   ;;  %vm4475_vm12 = vcmask 58368   ;;  %vm4832_vm13 = vcmask 123904  }
 0x194   :  { %v349_v5 = vld [vmem:[%s7365_s25] sm:$0xff]  ;;  %v350_v8 = vld [vmem:[%s7365_s25 + $0x8] sm:$0xff]  ;;  %v356_v10 = vld [vmem:[%s7366_s4 + $0x18] sm:$0xff]  ;;  %s5998_s16 = smov 80   ;;  %s7371_s12 = sld [smem:[#allocation52_spill]] }
 0x195   :  { %v354_v9 = vld [vmem:[%s7366_s4 + $0x8] sm:$0xff]  ;;  %v353_v12 = vld [vmem:[%s7366_s4] sm:$0xff]  ;;  %v355_v13 = vld [vmem:[%s7366_s4 + $0x10] sm:$0xff]  ;;  %v362_v16 = vpack.c.bf16 %v350_v8, %v349_v5  ;;  %s7372_s9 = sld [smem:[#allocation53_spill]]  ;;  %s7373_s15 = sld [smem:[#allocation56_spill]] }
 0x196   :  { %v6246_v11 = vpack.c.bf16 %v356_v10, %v354_v9  ;;  %v358_v14 = vld [vmem:[%s7366_s4 + $0x28] sm:$0xff]  ;;  %v6253_v17 = vpack.c.bf16 %v355_v13, %v353_v12  ;;  %v360_v18 = vld [vmem:[%s7366_s4 + $0x38] sm:$0xff]  ;;  %v357_v20 = vld [vmem:[%s7366_s4 + $0x20] sm:$0xff]  ;;  %s7374_s29 = sld [smem:[#allocation58_spill]]  ;;  %s7375_s18 = sld [smem:[#allocation59_spill]] }
 0x197   :  { %v6256_v19 = vpack.c.bf16 %v360_v18, %v358_v14  ;;  %v359_v21 = vld [vmem:[%s7366_s4 + $0x30] sm:$0xff]  ;;  %4907 = vmatmul.mubr.msk.bf16.vlgmr.msra.gmra.mrb[0].mxu1 %vm376_vm1, %v362_v16  ;;  %v361_v29 = vld [vmem:[%s7367_s17] sm:$0x3]  ;;  %s5999_s27 = smov [#allocation34]  }
 0x198   :  { %597 = vmatprep.subr.bf16.mxu0 %v6246_v11  ;;  %438 = vmatprep.subr.bf16.mxu1 %v6246_v11  ;;  %v6265_v22 = vpack.c.bf16 %v359_v21, %v357_v20  ;;  %v373_v32 = vrot.slane %v361_v29, %v6284_v27  ;;  %v369_v33 = vrot.slane %v361_v29, %v6288_v30  ;;  %s4854_s3 = sshll.u32 %s5999_s27, 4  ;;  %s4855_s3 = int_to_ptr.vmem [resolvable:$true] %s4854_s3 }
 0x199   :  { %598 = vmatpush1.bf16.msra.mxu0 %v6253_v17  ;;  %439 = vmatpush1.bf16.msra.mxu1 %v6253_v17  ;;  %s5892_s23 = scalar_lea.vmem %s4855_s3, 32  ;;  %p5897_p5 = scmp.lt.s32.totalorder %s4855_s3, %s4855_s3 }
 0x19a   :  { %599 = vmatprep.subr.bf16.mxu0 %v6256_v19  ;;  %470 = vmatprep.mubr.bf16.mxu1 %v5988_v2  ;;  %p5893_p4 = scmp.ne.s32.totalorder %s4855_s3, %s5892_s23  ;;  %p5898_p6 = scmp.lt.s32.totalorder %s5892_s23, %s5892_s23 }
 0x19b   :  { %440 = vmatprep.subr.bf16.mxu1 %v6256_v19 }
 0x19c   :  { %p5899_p7 = por %p5898_p6, %p5897_p5 }
 0x19d   :  { %600 = vmatpush1.bf16.msra.mxu0 %v6265_v22  ;;  %441 = vmatpush1.bf16.msra.mxu1 %v6265_v22 }
 0x19e   :  { %907 = vmatprep.subr.bf16.mxu0 %v6246_v11  ;;  %751 = vmatprep.subr.bf16.mxu1 %v6246_v11  ;;  %p5900_p8 = pnand %p5899_p7, %p5893_p4 }
 0x1a0   :  { %471 = vmatmul.mubr.bf16.vlgmr.msra.gmra.mrb[4].mxu1 %v5988_v2 }
 0x1a1   :  { %752 = vmatpush1.bf16.msra.mxu1 %v6253_v17  ;;  %783 = vmatprep.mubr.bf16.mxu1 %v5988_v2 }
 0x1a2   :  { %753 = vmatprep.subr.bf16.mxu1 %v6256_v19 }
 0x1a5   :  { %754 = vmatpush1.bf16.msra.mxu1 %v6265_v22 }
 0x1a6   :  { %1063 = vmatprep.subr.bf16.mxu1 %v6246_v11 }
 0x26a   :  { %v421_v25 = vpop.f32.mrb[0].mxu1 }
 0x26b   :  { %v423_v26 = vpop.f32.mrb[1].mxu1  ;;  %v6298_v43 = vadd.f32 %v421_v25, %v369_v33 }
 0x26c   :  { %v425_v28 = vpop.f32.mrb[2].mxu1  ;;  %v6294_v38 = vadd.f32 %v423_v26, %v373_v32 }
 0x26d   :  { %v427_v31 = vpop.f32.mrb[3].mxu1  ;;  %v6292_v35 = vadd.f32 %v425_v28, %v369_v33 }
 0x26e   :  { %v6296_v39 = vadd.f32 %v427_v31, %v373_v32 }
 0x273   :  { %v472_v34 = vpop.f32.mrb[4].mxu1 }
 0x274   :  { %v480_v36 = vrot.slane %v472_v34, 1  ;;  %v474_v37 = vpop.f32.mrb[5].mxu1  ;;  %v483_v48 = vadd.f32 %v472_v34, %v6298_v43 }
 0x275   :  { %v486_v40 = vrot.slane %v474_v37, 3  ;;  %v487_v41 = vrot.slane %v474_v37, 4  ;;  %v476_v42 = vpop.f32.mrb[6].mxu1 }
 0x276   :  { %v484_v44 = vadd.f32 %v480_v36, %v6292_v35  ;;  %v477_v45 = vpop.f32.mrb[7].mxu1 }
 0x277   :  { %v490_v46 = vadd.f32 %v486_v40, %v6294_v38  ;;  %v491_v47 = vadd.f32 %v487_v41, %v6296_v39 }
 0x278   :  { %v494_v49 = vrot.slane %v484_v44, 7 }
 0x279   :  { %v500_v50 = vrot.slane %v490_v46, 5  ;;  %v501_v51 = vrot.slane %v491_v47, 4 }
 0x27a   :  { %v496_v52 = vsel %vm495_vm2, %v494_v49, %v483_v48 }
 0x27b   :  { %v503_v53 = vsel %vm502_vm3, %v501_v51, %v500_v50 }
 0x27c   :  { %v506_v54 = vsel %vm505_vm4, %v496_v52, %v503_v53 }
 0x27d   :  { %5310 = vtanh.f32 %v506_v54  ;;  %v4908_v56 = vmul.f32 -1.442695, %v506_v54 }
 0x27f   :  { %5312 = vpow2.f32 %v4908_v56 }
 0x287   :  { %v5311_v55 = vpop.eup %5310 }
 0x288   :  { %516 = vrot.lane.b32.xlu0 %v5311_v55, %s5989_s0 }
 0x289   :  { %v5313_v57 = vpop.eup %5312 }
 0x28a   :  { %v510_v58 = vadd.f32 1.0, %v5313_v57 }
 0x28c   :  { %5314 = vrcp.f32 %v510_v58 }
 0x296   :  { %v5315_v59 = vpop.eup %5314 }
 0x297   :  { %v514_v62 = vmul.f32 0.0, %v5315_v59 }
 0x2fa   :  { %v517_v60 = vpop.permute.xlu0 %516 }
 0x2fb   :  { %v519_v61 = vmul.f32 %v5315_v59, %v517_v60 }
 0x2fd   :  { %521 = vrot.lane.b32.xlu0 %v519_v61, %s5990_s21 }
 0x36f   :  { %v522_v63 = vpop.permute.xlu0 %521 }
 0x370   :  { %v524_v0 = vadd.f32 %v522_v63, %v514_v62 }
 0x372   :  { %5316 = vtanh.f32 %v524_v0 }
 0x37c   :  { %v5317_v1 = vpop.eup %5316 }
 0x37d   :  { %527 = vrot.lane.b32.xlu1 %v5317_v1, %s5989_s0 }
 0x3ef   :  { %v528_v3 = vpop.permute.xlu1 %527 }
 0x3f0   :  { %v6310_v4 = vmul.f32 %v5315_v59, %v528_v3 }
 0x3f2   :  { %v590_v5 = vpack.c.bf16 %v6310_v4, %v6310_v4 }
 0x3f4   :  { %592 = vrot.lane.b32.xlu1 %v590_v5, %s5990_s21 }
 0x466   :  { %v593_v6 = vpop.permute.xlu1 %592 }
 0x467   :  { %4909 = vmatmul.mubr.msk.bf16.vlgmr.msra.gmra.mrb[0].mxu0 %vm434_vm5, %v593_v6 }
 0x468   :  { %908 = vmatpush1.bf16.msra.mxu0 %v6253_v17  ;;  %939 = vmatprep.mubr.bf16.mxu0 %v5988_v2 }
 0x469   :  { %909 = vmatprep.subr.bf16.mxu0 %v6256_v19 }
 0x46c   :  { %910 = vmatpush1.bf16.msra.mxu0 %v6265_v22 }
 0x46d   :  { %1217 = vmatprep.subr.bf16.mxu0 %v6246_v11 }
 0x53a   :  { %v631_v7 = vpop.f32.mrb[0].mxu0 }
 0x53b   :  { %v639_v8 = vrot.slane %v631_v7, 7  ;;  %v633_v9 = vpop.f32.mrb[1].mxu0  ;;  %v643_v20 = vadd.f32 %v631_v7, %v6292_v35 }
 0x53c   :  { %v645_v10 = vrot.slane %v633_v9, 4  ;;  %v646_v12 = vrot.slane %v633_v9, 5  ;;  %v635_v13 = vpop.f32.mrb[2].mxu0 }
 0x53d   :  { %v642_v14 = vadd.f32 %v639_v8, %v6298_v43  ;;  %v636_v15 = vpop.f32.mrb[3].mxu0 }
 0x53e   :  { %v649_v16 = vadd.f32 %v645_v10, %v6294_v38  ;;  %v650_v18 = vadd.f32 %v646_v12, %v6296_v39 }
 0x53f   :  { %v653_v21 = vrot.slane %v642_v14, 1 }
 0x540   :  { %v658_v25 = vrot.slane %v649_v16, 4  ;;  %v659_v26 = vrot.slane %v650_v18, 3 }
 0x541   :  { %v654_v28 = vsel %vm495_vm2, %v643_v20, %v653_v21 }
 0x542   :  { %v660_v29 = vsel %vm502_vm3, %v659_v26, %v658_v25 }
 0x543   :  { %v662_v31 = vsel %vm505_vm4, %v654_v28, %v660_v29 }
 0x544   :  { %5318 = vtanh.f32 %v662_v31  ;;  %v4910_v33 = vmul.f32 -1.442695, %v662_v31 }
 0x546   :  { %5320 = vpow2.f32 %v4910_v33 }
 0x54e   :  { %v5319_v32 = vpop.eup %5318 }
 0x54f   :  { %672 = vrot.lane.b32.xlu0 %v5319_v32, %s5989_s0 }
 0x550   :  { %v5321_v34 = vpop.eup %5320 }
 0x551   :  { %v666_v36 = vadd.f32 1.0, %v5321_v34 }
 0x553   :  { %5322 = vrcp.f32 %v666_v36 }
 0x55d   :  { %v5323_v37 = vpop.eup %5322 }
 0x55e   :  { %v670_v42 = vmul.f32 %v5323_v37, %v524_v0 }
 0x5c1   :  { %v673_v40 = vpop.permute.xlu0 %672 }
 0x5c2   :  { %v675_v41 = vmul.f32 %v5323_v37, %v673_v40 }
 0x5c4   :  { %677 = vrot.lane.b32.xlu1 %v675_v41, %s5990_s21 }
 0x636   :  { %v678_v44 = vpop.permute.xlu1 %677 }
 0x637   :  { %v680_v45 = vadd.f32 %v678_v44, %v670_v42 }
 0x639   :  { %5324 = vtanh.f32 %v680_v45 }
 0x643   :  { %v5325_v46 = vpop.eup %5324 }
 0x644   :  { %683 = vrot.lane.b32.xlu0 %v5325_v46, %s5989_s0 }
 0x6b6   :  { %v684_v47 = vpop.permute.xlu0 %683 }
 0x6b7   :  { %v6331_v48 = vmul.f32 %v5323_v37, %v684_v47 }
 0x6b9   :  { %v744_v49 = vpack.c.bf16 %v6331_v48, %v6331_v48 }
 0x6bb   :  { %746 = vrot.lane.b32.xlu1 %v744_v49, %s5990_s21 }
 0x72d   :  { %v747_v50 = vpop.permute.xlu1 %746 }
 0x72e   :  { %4911 = vmatmul.mubr.msk.bf16.vlgmr.msra.gmra.mrb[8].mxu1 %vm434_vm5, %v747_v50 }
 0x72f   :  { %1064 = vmatpush1.bf16.msra.mxu1 %v6253_v17  ;;  %1095 = vmatprep.mubr.bf16.mxu1 %v5988_v2 }
 0x730   :  { %1065 = vmatprep.subr.bf16.mxu1 %v6256_v19 }
 0x733   :  { %1066 = vmatpush1.bf16.msra.mxu1 %v6265_v22 }
 0x734   :  { %1371 = vmatprep.subr.bf16.mxu1 %v6246_v11 }
 0x801   :  { %v785_v51 = vpop.f32.mrb[8].mxu1 }
 0x802   :  { %v793_v52 = vrot.slane %v785_v51, 6  ;;  %v794_v53 = vrot.slane %v785_v51, 7  ;;  %v787_v54 = vpop.f32.mrb[9].mxu1 }
 0x803   :  { %v800_v55 = vrot.slane %v787_v54, 5  ;;  %v801_v56 = vrot.slane %v787_v54, 6  ;;  %v789_v57 = vpop.f32.mrb[10].mxu1 }
 0x804   :  { %v797_v58 = vadd.f32 %v793_v52, %v6298_v43  ;;  %v798_v59 = vadd.f32 %v794_v53, %v6292_v35  ;;  %v790_v60 = vpop.f32.mrb[11].mxu1 }
 0x805   :  { %v804_v61 = vadd.f32 %v800_v55, %v6294_v38  ;;  %v805_v62 = vadd.f32 %v801_v56, %v6296_v39 }
 0x806   :  { %v808_v63 = vrot.slane %v797_v58, 2  ;;  %v809_v0 = vrot.slane %v798_v59, 1 }
 0x807   :  { %v814_v1 = vrot.slane %v804_v61, 3  ;;  %v815_v3 = vrot.slane %v805_v62, 2 }
 0x808   :  { %v810_v5 = vsel %vm495_vm2, %v809_v0, %v808_v63 }
 0x809   :  { %v816_v6 = vsel %vm502_vm3, %v815_v3, %v814_v1 }
 0x80a   :  { %v818_v7 = vsel %vm505_vm4, %v810_v5, %v816_v6 }
 0x80b   :  { %5326 = vtanh.f32 %v818_v7  ;;  %v4912_v9 = vmul.f32 -1.442695, %v818_v7 }
 0x80d   :  { %5328 = vpow2.f32 %v4912_v9 }
 0x815   :  { %v5327_v8 = vpop.eup %5326 }
 0x816   :  { %828 = vrot.lane.b32.xlu0 %v5327_v8, %s5989_s0 }
 0x817   :  { %v5329_v10 = vpop.eup %5328 }
 0x818   :  { %v822_v12 = vadd.f32 1.0, %v5329_v10 }
 0x81a   :  { %5330 = vrcp.f32 %v822_v12 }
 0x824   :  { %v5331_v13 = vpop.eup %5330 }
 0x825   :  { %v826_v16 = vmul.f32 %v5331_v13, %v680_v45 }
 0x888   :  { %v829_v14 = vpop.permute.xlu0 %828 }
 0x889   :  { %v831_v15 = vmul.f32 %v5331_v13, %v829_v14 }
 0x88b   :  { %833 = vrot.lane.b32.xlu1 %v831_v15, %s5990_s21 }
 0x8fd   :  { %v834_v18 = vpop.permute.xlu1 %833 }
 0x8fe   :  { %v836_v20 = vadd.f32 %v834_v18, %v826_v16 }
 0x900   :  { %5332 = vtanh.f32 %v836_v20 }
 0x90a   :  { %v5333_v21 = vpop.eup %5332 }
 0x90b   :  { %839 = vrot.lane.b32.xlu0 %v5333_v21, %s5989_s0 }
 0x97d   :  { %v840_v25 = vpop.permute.xlu0 %839 }
 0x97e   :  { %v6352_v26 = vmul.f32 %v5331_v13, %v840_v25 }
 0x980   :  { %v900_v28 = vpack.c.bf16 %v6352_v26, %v6352_v26 }
 0x982   :  { %902 = vrot.lane.b32.xlu1 %v900_v28, %s5990_s21 }
 0x9f4   :  { %v903_v29 = vpop.permute.xlu1 %902 }
 0x9f5   :  { %4913 = vmatmul.mubr.msk.bf16.vlgmr.msra.gmra.mrb[4].mxu0 %vm434_vm5, %v903_v29 }
 0x9f6   :  { %1218 = vmatpush1.bf16.msra.mxu0 %v6253_v17  ;;  %1249 = vmatprep.mubr.bf16.mxu0 %v5988_v2 }
 0x9f7   :  { %1219 = vmatprep.subr.bf16.mxu0 %v6256_v19 }
 0x9fa   :  { %1220 = vmatpush1.bf16.msra.mxu0 %v6265_v22 }
 0x9fb   :  { %1527 = vmatprep.subr.bf16.mxu0 %v6246_v11 }
 0xac8   :  { %v941_v31 = vpop.f32.mrb[4].mxu0 }
 0xac9   :  { %v949_v32 = vrot.slane %v941_v31, 5  ;;  %v950_v33 = vrot.slane %v941_v31, 6  ;;  %v943_v34 = vpop.f32.mrb[5].mxu0 }
 0xaca   :  { %v956_v36 = vrot.slane %v943_v34, 6  ;;  %v957_v37 = vrot.slane %v943_v34, 7  ;;  %v945_v40 = vpop.f32.mrb[6].mxu0 }
 0xacb   :  { %v953_v41 = vadd.f32 %v949_v32, %v6298_v43  ;;  %v954_v42 = vadd.f32 %v950_v33, %v6292_v35  ;;  %v946_v44 = vpop.f32.mrb[7].mxu0 }
 0xacc   :  { %v960_v45 = vadd.f32 %v956_v36, %v6294_v38  ;;  %v961_v46 = vadd.f32 %v957_v37, %v6296_v39 }
 0xacd   :  { %v964_v47 = vrot.slane %v953_v41, 3  ;;  %v965_v49 = vrot.slane %v954_v42, 2 }
 0xace   :  { %v970_v50 = vrot.slane %v960_v45, 2  ;;  %v971_v11 = vrot.slane %v961_v46, 1 }
 0xacf   :  { %v966_v51 = vsel %vm495_vm2, %v965_v49, %v964_v47 }
 0xad0   :  { %v972_v52 = vsel %vm502_vm3, %v971_v11, %v970_v50 }
 0xad1   :  { %v974_v53 = vsel %vm505_vm4, %v966_v51, %v972_v52 }
 0xad2   :  { %5334 = vtanh.f32 %v974_v53  ;;  %v4914_v55 = vmul.f32 -1.442695, %v974_v53 }
 0xad4   :  { %5336 = vpow2.f32 %v4914_v55 }
 0xadc   :  { %v5335_v54 = vpop.eup %5334 }
 0xadd   :  { %984 = vrot.lane.b32.xlu0 %v5335_v54, %s5989_s0 }
 0xade   :  { %v5337_v56 = vpop.eup %5336 }
 0xadf   :  { %v978_v57 = vadd.f32 1.0, %v5337_v56 }
 0xae1   :  { %5338 = vrcp.f32 %v978_v57 }
 0xaeb   :  { %v5339_v58 = vpop.eup %5338 }
 0xaec   :  { %v982_v61 = vmul.f32 %v5339_v58, %v836_v20 }
 0xb4f   :  { %v985_v59 = vpop.permute.xlu0 %984 }
 0xb50   :  { %v987_v60 = vmul.f32 %v5339_v58, %v985_v59 }
 0xb52   :  { %989 = vrot.lane.b32.xlu1 %v987_v60, %s5990_s21 }
 0xbc4   :  { %v990_v62 = vpop.permute.xlu1 %989 }
 0xbc5   :  { %v992_v63 = vadd.f32 %v990_v62, %v982_v61 }
 0xbc7   :  { %5340 = vtanh.f32 %v992_v63 }
 0xbd1   :  { %v5341_v0 = vpop.eup %5340 }
 0xbd2   :  { %995 = vrot.lane.b32.xlu0 %v5341_v0, %s5989_s0 }
 0xc44   :  { %v996_v1 = vpop.permute.xlu0 %995 }
 0xc45   :  { %v6373_v3 = vmul.f32 %v5339_v58, %v996_v1 }
 0xc47   :  { %v1056_v5 = vpack.c.bf16 %v6373_v3, %v6373_v3 }
 0xc49   :  { %1058 = vrot.lane.b32.xlu1 %v1056_v5, %s5990_s21 }
 0xcbb   :  { %v1059_v6 = vpop.permute.xlu1 %1058 }
 0xcbc   :  { %4915 = vmatmul.mubr.msk.bf16.vlgmr.msra.gmra.mrb[12].mxu1 %vm434_vm5, %v1059_v6 }
 0xcbd   :  { %1372 = vmatpush1.bf16.msra.mxu1 %v6253_v17  ;;  %1403 = vmatprep.mubr.bf16.mxu1 %v5988_v2 }
 0xcbe   :  { %1373 = vmatprep.subr.bf16.mxu1 %v6256_v19 }
 0xcc1   :  { %1374 = vmatpush1.bf16.msra.mxu1 %v6265_v22 }
 0xd8f   :  { %v1097_v7 = vpop.f32.mrb[12].mxu1 }
 0xd90   :  { %v1105_v8 = vrot.slane %v1097_v7, 4  ;;  %v1106_v9 = vrot.slane %v1097_v7, 5  ;;  %v1099_v10 = vpop.f32.mrb[13].mxu1 }
 0xd91   :  { %v1112_v12 = vrot.slane %v1099_v10, 7  ;;  %v1101_v13 = vpop.f32.mrb[14].mxu1  ;;  %v1116_v25 = vadd.f32 %v1099_v10, %v6296_v39 }
 0xd92   :  { %v1109_v14 = vadd.f32 %v1105_v8, %v6298_v43  ;;  %v1110_v15 = vadd.f32 %v1106_v9, %v6292_v35  ;;  %v1102_v16 = vpop.f32.mrb[15].mxu1 }
 0xd93   :  { %v1115_v18 = vadd.f32 %v1112_v12, %v6294_v38 }
 0xd94   :  { %v1119_v20 = vrot.slane %v1109_v14, 4  ;;  %v1120_v21 = vrot.slane %v1110_v15, 3 }
 0xd95   :  { %v1125_v28 = vrot.slane %v1115_v18, 1 }
 0xd96   :  { %v1121_v29 = vsel %vm495_vm2, %v1120_v21, %v1119_v20 }
 0xd97   :  { %v1126_v31 = vsel %vm502_vm3, %v1116_v25, %v1125_v28 }
 0xd98   :  { %v1128_v32 = vsel %vm505_vm4, %v1121_v29, %v1126_v31 }
 0xd99   :  { %5342 = vtanh.f32 %v1128_v32  ;;  %v4916_v34 = vmul.f32 -1.442695, %v1128_v32 }
 0xd9b   :  { %5344 = vpow2.f32 %v4916_v34 }
 0xda3   :  { %v5343_v33 = vpop.eup %5342 }
 0xda4   :  { %1138 = vrot.lane.b32.xlu0 %v5343_v33, %s5989_s0 }
 0xda5   :  { %v5345_v36 = vpop.eup %5344 }
 0xda6   :  { %v1132_v37 = vadd.f32 1.0, %v5345_v36 }
 0xda8   :  { %5346 = vrcp.f32 %v1132_v37 }
 0xdb2   :  { %v5347_v40 = vpop.eup %5346 }
 0xdb3   :  { %v1136_v44 = vmul.f32 %v5347_v40, %v992_v63 }
 0xe16   :  { %v1139_v41 = vpop.permute.xlu0 %1138 }
 0xe17   :  { %v1141_v42 = vmul.f32 %v5347_v40, %v1139_v41 }
 0xe19   :  { %1143 = vrot.lane.b32.xlu1 %v1141_v42, %s5990_s21 }
 0xe8b   :  { %v1144_v45 = vpop.permute.xlu1 %1143 }
 0xe8c   :  { %v1146_v46 = vadd.f32 %v1144_v45, %v1136_v44 }
 0xe8e   :  { %5348 = vtanh.f32 %v1146_v46 }
 0xe98   :  { %v5349_v47 = vpop.eup %5348 }
 0xe99   :  { %1149 = vrot.lane.b32.xlu0 %v5349_v47, %s5989_s0 }
 0xf0b   :  { %v1150_v49 = vpop.permute.xlu0 %1149 }
 0xf0c   :  { %v6393_v50 = vmul.f32 %v5347_v40, %v1150_v49 }
 0xf0e   :  { %v1210_v11 = vpack.c.bf16 %v6393_v50, %v6393_v50 }
 0xf10   :  { %1212 = vrot.lane.b32.xlu1 %v1210_v11, %s5990_s21 }
 0xf82   :  { %v1213_v51 = vpop.permute.xlu1 %1212 }
 0xf83   :  { %4917 = vmatmul.mubr.msk.bf16.vlgmr.msra.gmra.mrb[8].mxu0 %vm434_vm5, %v1213_v51 }
 0xf84   :  { %1528 = vmatpush1.bf16.msra.mxu0 %v6253_v17  ;;  %1559 = vmatprep.mubr.bf16.mxu0 %v5988_v2 }
 0xf85   :  { %1529 = vmatprep.subr.bf16.mxu0 %v6256_v19 }
 0xf88   :  { %1530 = vmatpush1.bf16.msra.mxu0 %v6265_v22 }
0x1056   :  { %v1251_v52 = vpop.f32.mrb[8].mxu0 }
0x1057   :  { %v1259_v53 = vrot.slane %v1251_v52, 3  ;;  %v1260_v54 = vrot.slane %v1251_v52, 4  ;;  %v1253_v55 = vpop.f32.mrb[9].mxu0 }
0x1058   :  { %v1266_v56 = vrot.slane %v1253_v55, 1  ;;  %v1255_v57 = vpop.f32.mrb[10].mxu0  ;;  %v1269_v63 = vadd.f32 %v1253_v55, %v6294_v38 }
0x1059   :  { %v1263_v58 = vadd.f32 %v1259_v53, %v6298_v43  ;;  %v1264_v59 = vadd.f32 %v1260_v54, %v6292_v35  ;;  %v1256_v60 = vpop.f32.mrb[11].mxu0 }
0x105a   :  { %v1270_v61 = vadd.f32 %v1266_v56, %v6296_v39 }
0x105b   :  { %v1273_v17 = vrot.slane %v1263_v58, 5  ;;  %v1274_v62 = vrot.slane %v1264_v59, 4 }
0x105c   :  { %v1279_v19 = vrot.slane %v1270_v61, 7 }
0x105d   :  { %v1275_v22 = vsel %vm495_vm2, %v1274_v62, %v1273_v17 }
0x105e   :  { %v1280_v0 = vsel %vm502_vm3, %v1279_v19, %v1269_v63 }
0x105f   :  { %v1282_v1 = vsel %vm505_vm4, %v1275_v22, %v1280_v0 }
0x1060   :  { %5350 = vtanh.f32 %v1282_v1  ;;  %v4918_v6 = vmul.f32 -1.442695, %v1282_v1 }
0x1062   :  { %5352 = vpow2.f32 %v4918_v6 }
0x106a   :  { %v5351_v5 = vpop.eup %5350 }
0x106b   :  { %1292 = vrot.lane.b32.xlu0 %v5351_v5, %s5989_s0 }
0x106c   :  { %v5353_v7 = vpop.eup %5352 }
0x106d   :  { %v1286_v8 = vadd.f32 1.0, %v5353_v7 }
0x106f   :  { %5354 = vrcp.f32 %v1286_v8 }
0x1079   :  { %v5355_v9 = vpop.eup %5354 }
0x107a   :  { %v1290_v13 = vmul.f32 %v5355_v9, %v1146_v46 }
0x10dd   :  { %v1293_v10 = vpop.permute.xlu0 %1292 }
0x10de   :  { %v1295_v12 = vmul.f32 %v5355_v9, %v1293_v10 }
0x10e0   :  { %1297 = vrot.lane.b32.xlu1 %v1295_v12, %s5990_s21 }
0x1152   :  { %v1298_v14 = vpop.permute.xlu1 %1297 }
0x1153   :  { %v1300_v15 = vadd.f32 %v1298_v14, %v1290_v13 }
0x1155   :  { %5356 = vtanh.f32 %v1300_v15 }
0x115f   :  { %v5357_v16 = vpop.eup %5356 }
0x1160   :  { %1303 = vrot.lane.b32.xlu0 %v5357_v16, %s5989_s0 }
0x11d2   :  { %v1304_v18 = vpop.permute.xlu0 %1303 }
0x11d3   :  { %v6413_v20 = vmul.f32 %v5355_v9, %v1304_v18 }
0x11d5   :  { %v1364_v21 = vpack.c.bf16 %v6413_v20, %v6413_v20 }
0x11d7   :  { %1366 = vrot.lane.b32.xlu1 %v1364_v21, %s5990_s21 }
0x1249   :  { %v1367_v25 = vpop.permute.xlu1 %1366 }
0x124a   :  { %4919 = vmatmul.mubr.msk.bf16.vlgmr.msra.gmra.mrb[16].mxu1 %vm434_vm5, %v1367_v25 }
0x124b   :  { %1759 = vmatprep.mubr.bf16.mxu1 %v5988_v2 }
0x131d   :  { %v1405_v28 = vpop.f32.mrb[16].mxu1 }
0x131e   :  { %v1413_v29 = vrot.slane %v1405_v28, 2  ;;  %v1414_v31 = vrot.slane %v1405_v28, 3  ;;  %v1407_v32 = vpop.f32.mrb[17].mxu1 }
0x131f   :  { %v1420_v33 = vrot.slane %v1407_v32, 1  ;;  %v1421_v34 = vrot.slane %v1407_v32, 2  ;;  %v1409_v36 = vpop.f32.mrb[18].mxu1 }
0x1320   :  { %v1417_v37 = vadd.f32 %v1413_v29, %v6298_v43  ;;  %v1418_v40 = vadd.f32 %v1414_v31, %v6292_v35  ;;  %v1410_v41 = vpop.f32.mrb[19].mxu1 }
0x1321   :  { %v1424_v42 = vadd.f32 %v1420_v33, %v6294_v38  ;;  %v1425_v44 = vadd.f32 %v1421_v34, %v6296_v39 }
0x1322   :  { %v1428_v45 = vrot.slane %v1417_v37, 6  ;;  %v1429_v46 = vrot.slane %v1418_v40, 5 }
0x1323   :  { %v1434_v47 = vrot.slane %v1424_v42, 7  ;;  %v1435_v49 = vrot.slane %v1425_v44, 6 }
0x1324   :  { %v1430_v11 = vsel %vm495_vm2, %v1429_v46, %v1428_v45 }
0x1325   :  { %v1436_v51 = vsel %vm502_vm3, %v1435_v49, %v1434_v47 }
0x1326   :  { %v1438_v52 = vsel %vm505_vm4, %v1430_v11, %v1436_v51 }
0x1327   :  { %5358 = vtanh.f32 %v1438_v52  ;;  %v4920_v54 = vmul.f32 -1.442695, %v1438_v52 }
0x1329   :  { %5360 = vpow2.f32 %v4920_v54 }
0x1331   :  { %v5359_v53 = vpop.eup %5358 }
0x1332   :  { %1448 = vrot.lane.b32.xlu0 %v5359_v53, %s5989_s0 }
0x1333   :  { %v5361_v55 = vpop.eup %5360 }
0x1334   :  { %v1442_v56 = vadd.f32 1.0, %v5361_v55 }
0x1336   :  { %5362 = vrcp.f32 %v1442_v56 }
0x1340   :  { %v5363_v57 = vpop.eup %5362 }
0x1341   :  { %v1446_v60 = vmul.f32 %v5363_v57, %v1300_v15 }
0x13a4   :  { %v1449_v58 = vpop.permute.xlu0 %1448 }
0x13a5   :  { %v1451_v59 = vmul.f32 %v5363_v57, %v1449_v58 }
0x13a7   :  { %1453 = vrot.lane.b32.xlu1 %v1451_v59, %s5990_s21 }
0x1419   :  { %v1454_v61 = vpop.permute.xlu1 %1453 }
0x141a   :  { %v6429_v17 = vadd.f32 %v1454_v61, %v1446_v60 }
0x141c   :  { %5364 = vtanh.f32 %v6429_v17 }
0x1426   :  { %v5365_v62 = vpop.eup %5364 }
0x1427   :  { %1459 = vrot.lane.b32.xlu0 %v5365_v62, %s5989_s0 }
0x1499   :  { %v1460_v63 = vpop.permute.xlu0 %1459 }
0x149a   :  { %v6433_v19 = vmul.f32 %v5363_v57, %v1460_v63 }
0x149c   :  { %v1520_v22 = vpack.c.bf16 %v6433_v19, %v6433_v19 }
0x149e   :  { %1522 = vrot.lane.b32.xlu1 %v1520_v22, %s5990_s21 }
0x1510   :  { %v1523_v0 = vpop.permute.xlu1 %1522 }
0x1511   :  { %4921 = vmatmul.mubr.msk.bf16.vlgmr.msra.gmra.mrb[12].mxu0 %vm434_vm5, %v1523_v0 }
0x1512   :  { %1806 = vmatprep.mubr.bf16.mxu0 %v5988_v2 }
0x15e4   :  { %v1561_v1 = vpop.f32.mrb[12].mxu0 }
0x15e5   :  { %v1569_v5 = vrot.slane %v1561_v1, 1  ;;  %v1570_v6 = vrot.slane %v1561_v1, 2  ;;  %v1563_v7 = vpop.f32.mrb[13].mxu0 }
0x15e6   :  { %v1576_v8 = vrot.slane %v1563_v7, 2  ;;  %v1577_v9 = vrot.slane %v1563_v7, 3  ;;  %v1565_v10 = vpop.f32.mrb[14].mxu0 }
0x15e7   :  { %v1573_v12 = vadd.f32 %v1569_v5, %v6298_v43  ;;  %v1574_v13 = vadd.f32 %v1570_v6, %v6292_v35  ;;  %v1566_v14 = vpop.f32.mrb[15].mxu0 }
0x15e8   :  { %v1580_v15 = vadd.f32 %v1576_v8, %v6294_v38  ;;  %v1581_v16 = vadd.f32 %v1577_v9, %v6296_v39  ;;  %v5991_v38 = vmov 1966171168  }
0x15e9   :  { %v1584_v18 = vrot.slane %v1573_v12, 7  ;;  %v1585_v21 = vrot.slane %v1574_v13, 6  ;;  %v533_v34 = vunpack.c.l.s4 %v5991_v38 }
0x15ea   :  { %v1590_v25 = vrot.slane %v1580_v15, 6  ;;  %v1591_v28 = vrot.slane %v1581_v16, 5 }
0x15eb   :  { %v1586_v29 = vsel %vm495_vm2, %v1585_v21, %v1584_v18  ;;  %v534_v36 = vunpack.c.0.s8 %v533_v34 }
0x15ec   :  { %v1592_v31 = vsel %vm502_vm3, %v1591_v28, %v1590_v25 }
0x15ed   :  { %v1594_v32 = vsel %vm505_vm4, %v1586_v29, %v1592_v31  ;;  %v6449_v37 = vsub.s32 %v534_v36, %v6281_v24 }
0x15ee   :  { %5366 = vtanh.f32 %v1594_v32  ;;  %v4922_v35 = vmul.f32 -1.442695, %v1594_v32 }
0x15ef   :  { %v6453_v40 = vrot.slane %v6310_v4, %v6449_v37  ;;  %v6463_v46 = vrot.slane %v6331_v48, %v6449_v37  ;;  %v6473_v51 = vrot.slane %v6352_v26, %v6449_v37  ;;  %v6483_v55 = vrot.slane %v6373_v3, %v6449_v37 }
0x15f0   :  { %5368 = vpow2.f32 %v4922_v35  ;;  %v6493_v59 = vrot.slane %v6393_v50, %v6449_v37  ;;  %v6503_v63 = vrot.slane %v6413_v20, %v6449_v37  ;;  %v6513_v5 = vrot.slane %v6433_v19, %v6449_v37 }
0x15f1   :  { %v546_v44 = vrot.slane %v6453_v40, %v6449_v37  ;;  %v702_v4 = vrot.slane %v6463_v46, %v6449_v37  ;;  %v858_v53 = vrot.slane %v6473_v51, %v6449_v37  ;;  %v1014_v57 = vrot.slane %v6483_v55, %v6449_v37 }
0x15f2   :  { %v1168_v61 = vrot.slane %v6493_v59, %v6449_v37  ;;  %v1322_v0 = vrot.slane %v6503_v63, %v6449_v37  ;;  %v1478_v7 = vrot.slane %v6513_v5, %v6449_v37  ;;  %v539_v16 = vcombine.high %v6453_v40, %v6453_v40 }
0x15f3   :  { %v557_v47 = vrot.slane %v546_v44, %v6288_v30  ;;  %v571_v49 = vcombine.high %v546_v44, %v546_v44  ;;  %v713_v52 = vrot.slane %v702_v4, %v6288_v30  ;;  %v726_v48 = vcombine.high %v702_v4, %v702_v4 }
0x15f4   :  { %v869_v56 = vrot.slane %v858_v53, %v6288_v30  ;;  %v882_v26 = vcombine.high %v858_v53, %v858_v53  ;;  %v1025_v60 = vrot.slane %v1014_v57, %v6288_v30  ;;  %v1038_v3 = vcombine.high %v1014_v57, %v1014_v57 }
0x15f5   :  { %v576_v11 = vrot.slane %v571_v49, %v6288_v30  ;;  %v731_v54 = vrot.slane %v726_v48, %v6288_v30  ;;  %v1179_v22 = vrot.slane %v1168_v61, %v6288_v30  ;;  %v1192_v50 = vcombine.high %v1168_v61, %v1168_v61 }
0x15f6   :  { %v887_v58 = vrot.slane %v882_v26, %v6288_v30  ;;  %v1043_v62 = vrot.slane %v1038_v3, %v6288_v30  ;;  %v1333_v6 = vrot.slane %v1322_v0, %v6288_v30  ;;  %v1346_v20 = vcombine.high %v1322_v0, %v1322_v0 }
0x15f7   :  { %v1197_v1 = vrot.slane %v1192_v50, %v6288_v30  ;;  %v1489_v9 = vrot.slane %v1478_v7, %v6288_v30  ;;  %v1502_v10 = vcombine.high %v1478_v7, %v1478_v7  ;;  %v553_v25 = vrot.slane %v539_v16, %v6449_v37 }
0x15f8   :  { %v5367_v33 = vpop.eup %5366  ;;  %v1351_v8 = vrot.slane %v1346_v20, %v6288_v30  ;;  %v851_v38 = vcombine.high %v6473_v51, %v6473_v51  ;;  %v1315_v57 = vcombine.high %v6503_v63, %v6503_v63  ;;  %v1471_v63 = vcombine.high %v6513_v5, %v6513_v5 }
0x15f9   :  { %1604 = vrot.lane.b32.xlu0 %v5367_v33, %s5989_s0  ;;  %v1507_v19 = vrot.slane %v1502_v10, %v6288_v30  ;;  %v561_v31 = vrot.slane %v553_v25, %v6288_v30  ;;  %v572_v32 = vcombine.high %v553_v25, %v553_v25 }
0x15fa   :  { %v5369_v43 = vpop.eup %5368  ;;  %v865_v44 = vrot.slane %v851_v38, %v6449_v37 }
0x15fb   :  { %v1598_v39 = vadd.f32 1.0, %v5369_v43  ;;  %v580_v35 = vrot.slane %v572_v32, %v6288_v30 }
0x15fc   :  { %v883_v49 = vcombine.high %v865_v44, %v865_v44 }
0x15fd   :  { %5370 = vrcp.f32 %v1598_v39 }
0x1607   :  { %v6455_v41 = vpop.eup %5370 }
0x1608   :  { %v1602_v12 = vmul.f32 %v6455_v41, %v6429_v17  ;;  %v695_v17 = vcombine.high %v6463_v46, %v6463_v46 }
0x160a   :  { %v709_v43 = vrot.slane %v695_v17, %v6449_v37  ;;  %v1695_v17 = vld [vmem:[%s7369_s2 + $0x8] sm:$0xff] }
0x160c   :  { %v717_v39 = vrot.slane %v709_v43, %v6288_v30  ;;  %v727_v36 = vcombine.high %v709_v43, %v709_v43  ;;  %v1694_v43 = vld [vmem:[%s7369_s2] sm:$0xff] }
0x166b   :  { %v1605_v42 = vpop.permute.xlu0 %1604 }
0x166c   :  { %v1607_v45 = vmul.f32 %v6455_v41, %v1605_v42  ;;  %v735_v42 = vrot.slane %v727_v36, %v6288_v30  ;;  %v1688_v36 = vld [vmem:[%s7368_s30 + $0x50] sm:$0xff] }
0x166e   :  { %1609 = vrot.lane.b32.xlu1 %v1607_v45, %s5990_s21  ;;  %v1007_v45 = vcombine.high %v6483_v55, %v6483_v55 }
0x1670   :  { %v1021_v51 = vrot.slane %v1007_v45, %v6449_v37  ;;  %v1699_v45 = vld [vmem:[%s7369_s2 + $0x28] sm:$0xff] }
0x1672   :  { %562 = vrot.lane.b32.xlu1 %v557_v47, %s5990_s21  ;;  %v873_v47 = vrot.slane %v865_v44, %v6288_v30  ;;  %v1029_v53 = vrot.slane %v1021_v51, %v6288_v30 }
0x1676   :  { %581 = vrot.lane.b32.xlu1 %v576_v11, %s5989_s0  ;;  %v891_v11 = vrot.slane %v883_v49, %v6288_v30 }
0x167a   :  { %718 = vrot.lane.b32.xlu1 %v713_v52, %s5990_s21  ;;  %v1161_v52 = vcombine.high %v6493_v59, %v6493_v59 }
0x167c   :  { %v1175_v26 = vrot.slane %v1161_v52, %v6449_v37  ;;  %v1698_v52 = vld [vmem:[%s7369_s2 + $0x20] sm:$0xff] }
0x167e   :  { %736 = vrot.lane.b32.xlu1 %v731_v54, %s5989_s0  ;;  %v1039_v54 = vcombine.high %v1021_v51, %v1021_v51  ;;  %v1183_v59 = vrot.slane %v1175_v26, %v6288_v30  ;;  %v1693_v51 = vld [vmem:[%s7368_s30 + $0x78] sm:$0xff] }
0x1682   :  { %874 = vrot.lane.b32.xlu1 %v869_v56, %s5990_s21  ;;  %v1047_v56 = vrot.slane %v1039_v54, %v6288_v30  ;;  %v1690_v54 = vld [vmem:[%s7368_s30 + $0x60] sm:$0xff] }
0x1686   :  { %892 = vrot.lane.b32.xlu1 %v887_v58, %s5989_s0 }
0x168a   :  { %1030 = vrot.lane.b32.xlu1 %v1025_v60, %s5990_s21  ;;  %v1193_v60 = vcombine.high %v1175_v26, %v1175_v26 }
0x168c   :  { %v1201_v61 = vrot.slane %v1193_v60, %v6288_v30 }
0x168e   :  { %1048 = vrot.lane.b32.xlu1 %v1043_v62, %s5989_s0  ;;  %v1329_v62 = vrot.slane %v1315_v57, %v6449_v37 }
0x1690   :  { %v1337_v50 = vrot.slane %v1329_v62, %v6288_v30  ;;  %v1347_v0 = vcombine.high %v1329_v62, %v1329_v62 }
0x1692   :  { %1184 = vrot.lane.b32.xlu1 %v1179_v22, %s5990_s21 }
0x1696   :  { %1202 = vrot.lane.b32.xlu1 %v1197_v1, %s5989_s0  ;;  %v1355_v1 = vrot.slane %v1347_v0, %v6288_v30 }
0x169a   :  { %1338 = vrot.lane.b32.xlu1 %v1333_v6, %s5990_s21  ;;  %v1485_v6 = vrot.slane %v1471_v63, %v6449_v37 }
0x169c   :  { %v1493_v5 = vrot.slane %v1485_v6, %v6288_v30  ;;  %v1503_v20 = vcombine.high %v1485_v6, %v1485_v6 }
0x169e   :  { %1356 = vrot.lane.b32.xlu1 %v1351_v8, %s5989_s0  ;;  %v1511_v7 = vrot.slane %v1503_v20, %v6288_v30  ;;  %v1679_v8 = vld [vmem:[%s7368_s30 + $0x8] sm:$0xff] }
0x16a2   :  { %1494 = vrot.lane.b32.xlu1 %v1489_v9, %s5990_s21  ;;  %v1681_v9 = vld [vmem:[%s7368_s30 + $0x18] sm:$0xff] }
0x16a3   :  { %v1705_v10 = vpack.c.bf16 %v1681_v9, %v1679_v8 }
0x16a5   :  { %1727 = vmatprep.subr.bf16.mxu1 %v1705_v10 }
0x16a6   :  { %1512 = vrot.lane.b32.xlu1 %v1507_v19, %s5989_s0  ;;  %v1678_v19 = vld [vmem:[%s7368_s30] sm:$0xff] }
0x16e0   :  { %v1610_v13 = vpop.permute.xlu1 %1609 }
0x16e1   :  { %v1612_v14 = vadd.f32 %v1610_v13, %v1602_v12  ;;  %v1680_v12 = vld [vmem:[%s7368_s30 + $0x10] sm:$0xff] }
0x16e2   :  { %v1704_v13 = vpack.c.bf16 %v1680_v12, %v1678_v19 }
0x16e3   :  { %5372 = vtanh.f32 %v1612_v14  ;;  %v1683_v14 = vld [vmem:[%s7368_s30 + $0x28] sm:$0xff] }
0x16e4   :  { %v563_v15 = vpop.permute.xlu1 %562  ;;  %1728 = vmatpush1.bf16.msra.mxu1 %v1704_v13 }
0x16e5   :  { %569 = vst.msk [vmem:[#allocation2] sm:$0x1] %vm568_vm6, %v563_v15  ;;  %v1685_v15 = vld [vmem:[%s7368_s30 + $0x38] sm:$0xff] }
0x16e6   :  { %v1707_v16 = vpack.c.bf16 %v1685_v15, %v1683_v14 }
0x16e8   :  { %v582_v18 = vpop.permute.xlu1 %581  ;;  %1729 = vmatprep.subr.bf16.mxu1 %v1707_v16 }
0x16e9   :  { %588 = vst.msk [vmem:[#allocation2 + $0x7] sm:$0x1] %vm587_vm7, %v582_v18  ;;  %v1682_v18 = vld [vmem:[%s7368_s30 + $0x20] sm:$0xff] }
0x16ec   :  { %v719_v21 = vpop.permute.xlu1 %718 }
0x16ed   :  { %v5373_v28 = vpop.eup %5372  ;;  %724 = vst.msk [vmem:[#allocation2 + $0x1] sm:$0x1] %vm568_vm6, %v719_v21  ;;  %v1684_v21 = vld [vmem:[%s7368_s30 + $0x30] sm:$0xff] }
0x16ee   :  { %1615 = vrot.lane.b32.xlu0 %v5373_v28, %s5989_s0  ;;  %v1706_v25 = vpack.c.bf16 %v1684_v21, %v1682_v18 }
0x16f0   :  { %v737_v29 = vpop.permute.xlu1 %736  ;;  %1730 = vmatpush1.bf16.msra.mxu1 %v1706_v25 }
0x16f1   :  { %742 = vst.msk [vmem:[#allocation2 + $0x6] sm:$0x1] %vm587_vm7, %v737_v29  ;;  %v1697_v29 = vld [vmem:[%s7369_s2 + $0x18] sm:$0xff] }
0x16f2   :  { %564 = vrot.lane.b32.xlu0 %v561_v31, %s5990_s21  ;;  %v6602_v32 = vpack.c.bf16 %v1697_v29, %v1695_v17 }
0x16f4   :  { %v875_v33 = vpop.permute.xlu1 %874  ;;  %1774 = vmatprep.subr.bf16.mxu0 %v6602_v32 }
0x16f5   :  { %880 = vst.msk [vmem:[#allocation2 + $0x2] sm:$0x1] %vm568_vm6, %v875_v33  ;;  %v1687_v33 = vld [vmem:[%s7368_s30 + $0x48] sm:$0xff] }
0x16f6   :  { %583 = vrot.lane.b32.xlu0 %v580_v35, %s5989_s0  ;;  %v1689_v35 = vld [vmem:[%s7368_s30 + $0x58] sm:$0xff] }
0x16f7   :  { %v1709_v38 = vpack.c.bf16 %v1689_v35, %v1687_v33 }
0x16f8   :  { %v893_v34 = vpop.permute.xlu1 %892 }
0x16f9   :  { %898 = vst.msk [vmem:[#allocation2 + $0x5] sm:$0x1] %vm587_vm7, %v893_v34  ;;  %v1696_v34 = vld [vmem:[%s7369_s2 + $0x10] sm:$0xff]  ;;  %1731 = vmatprep.subr.bf16.mxu1 %v1709_v38 }
0x16fa   :  { %720 = vrot.lane.b32.xlu0 %v717_v39, %s5990_s21  ;;  %v1686_v39 = vld [vmem:[%s7368_s30 + $0x40] sm:$0xff] }
0x16fc   :  { %v1031_v40 = vpop.permute.xlu1 %1030 }
0x16fd   :  { %1036 = vst.msk [vmem:[#allocation2 + $0x3] sm:$0x1] %vm568_vm6, %v1031_v40 }
0x16fe   :  { %738 = vrot.lane.b32.xlu0 %v735_v42, %s5989_s0  ;;  %v1708_v42 = vpack.c.bf16 %v1688_v36, %v1686_v39 }
0x1700   :  { %v1049_v46 = vpop.permute.xlu1 %1048  ;;  %1732 = vmatpush1.bf16.msra.mxu1 %v1708_v42 }
0x1701   :  { %1054 = vst.msk [vmem:[#allocation2 + $0x4] sm:$0x1] %vm587_vm7, %v1049_v46  ;;  %v1701_v46 = vld [vmem:[%s7369_s2 + $0x38] sm:$0xff] }
0x1702   :  { %876 = vrot.lane.b32.xlu0 %v873_v47, %s5990_s21 }
0x1704   :  { %v1185_v4 = vpop.permute.xlu1 %1184 }
0x1705   :  { %1190 = vst.msk [vmem:[#allocation2 + $0x4] sm:$0x1] %vm568_vm6, %v1185_v4  ;;  %v6619_v4 = vpack.c.bf16 %v1701_v46, %v1699_v45 }
0x1706   :  { %894 = vrot.lane.b32.xlu0 %v891_v11, %s5989_s0  ;;  %v1691_v11 = vld [vmem:[%s7368_s30 + $0x68] sm:$0xff] }
0x1708   :  { %v1203_v48 = vpop.permute.xlu1 %1202 }
0x1709   :  { %1208 = vst.msk [vmem:[#allocation2 + $0x3] sm:$0x1] %vm587_vm7, %v1203_v48  ;;  %v1711_v48 = vpack.c.bf16 %v1693_v51, %v1691_v11 }
0x170a   :  { %1032 = vrot.lane.b32.xlu0 %v1029_v53, %s5990_s21  ;;  %v1700_v53 = vld [vmem:[%s7369_s2 + $0x30] sm:$0xff] }
0x170b   :  { %1733 = vmatprep.subr.bf16.mxu1 %v1711_v48 }
0x170c   :  { %v1339_v55 = vpop.permute.xlu1 %1338 }
0x170d   :  { %1344 = vst.msk [vmem:[#allocation2 + $0x5] sm:$0x1] %vm568_vm6, %v1339_v55  ;;  %v1692_v55 = vld [vmem:[%s7368_s30 + $0x70] sm:$0xff] }
0x170e   :  { %1050 = vrot.lane.b32.xlu0 %v1047_v56, %s5989_s0  ;;  %v1710_v60 = vpack.c.bf16 %v1692_v55, %v1690_v54 }
0x1710   :  { %v1357_v58 = vpop.permute.xlu1 %1356  ;;  %1734 = vmatpush1.bf16.msra.mxu1 %v1710_v60 }
0x1711   :  { %1362 = vst.msk [vmem:[#allocation2 + $0x2] sm:$0x1] %vm587_vm7, %v1357_v58  ;;  %v6630_v58 = vpack.c.bf16 %v1700_v53, %v1698_v52  ;;  %2082 = vmatprep.subr.bf16.mxu1 %v6602_v32 }
0x1712   :  { %1186 = vrot.lane.b32.xlu0 %v1183_v59, %s5990_s21 }
0x1714   :  { %v1495_v3 = vpop.permute.xlu1 %1494 }
0x1715   :  { %1500 = vst.msk [vmem:[#allocation2 + $0x6] sm:$0x1] %vm568_vm6, %v1495_v3 }
0x1716   :  { %1204 = vrot.lane.b32.xlu0 %v1201_v61, %s5989_s0 }
0x1718   :  { %v1513_v22 = vpop.permute.xlu1 %1512 }
0x1719   :  { %1518 = vst.msk [vmem:[#allocation2 + $0x1] sm:$0x1] %vm587_vm7, %v1513_v22 }
0x171a   :  { %1340 = vrot.lane.b32.xlu0 %v1337_v50, %s5990_s21 }
0x171e   :  { %1358 = vrot.lane.b32.xlu0 %v1355_v1, %s5989_s0 }
0x1722   :  { %1496 = vrot.lane.b32.xlu0 %v1493_v5, %s5990_s21 }
0x1726   :  { %1514 = vrot.lane.b32.xlu0 %v1511_v7, %s5989_s0 }
0x1760   :  { %v1616_v28 = vpop.permute.xlu0 %1615 }
0x1761   :  { %v1618_v31 = vmul.f32 %v6455_v41, %v1616_v28  ;;  %v6612_v41 = vpack.c.bf16 %v1696_v34, %v1694_v43 }
0x1763   :  { %v1626_v40 = vrot.slane %v1618_v31, %v6449_v37  ;;  %1775 = vmatpush1.bf16.msra.mxu0 %v6612_v41  ;;  %v1702_v31 = vld [vmem:[#allocation8] sm:$0x3] }
0x1764   :  { %v565_v44 = vpop.permute.xlu0 %564  ;;  %1776 = vmatprep.subr.bf16.mxu0 %v6619_v4  ;;  %v1720_v33 = vrot.slane %v1702_v31, %v6284_v27  ;;  %v1716_v35 = vrot.slane %v1702_v31, %v6288_v30 }
0x1765   :  { %v1627_v47 = vcombine.high %v1626_v40, %v1626_v40  ;;  %v1634_v49 = vrot.slane %v1626_v40, %v6449_v37  ;;  %570 = vst.msk [vmem:[#allocation2 + $0x8] sm:$0x1] %vm568_vm6, %v565_v44 }
0x1767   :  { %v1645_v56 = vrot.slane %v1634_v49, %v6288_v30  ;;  %v1641_v26 = vrot.slane %v1627_v47, %v6449_v37  ;;  %v1658_v57 = vcombine.high %v1634_v49, %v1634_v49  ;;  %1777 = vmatpush1.bf16.msra.mxu0 %v6630_v58 }
0x1768   :  { %v584_v59 = vpop.permute.xlu0 %583  ;;  %1928 = vmatprep.subr.bf16.mxu0 %v6602_v32 }
0x1769   :  { %589 = vst.msk [vmem:[#allocation2 + $0xf] sm:$0x1] %vm587_vm7, %v584_v59  ;;  %1650 = vrot.lane.b32.xlu1 %v1645_v56, %s5990_s21  ;;  %v1649_v3 = vrot.slane %v1641_v26, %v6288_v30  ;;  %v1659_v61 = vcombine.high %v1641_v26, %v1641_v26  ;;  %v1663_v62 = vrot.slane %v1658_v57, %v6288_v30 }
0x176a   :  { %1807 = vmatmul.mubr.bf16.vlgmr.msra.gmra.mrb[16].mxu0 %v5988_v2 }
0x176b   :  { %1652 = vrot.lane.b32.xlu0 %v1649_v3, %s5990_s21  ;;  %v1667_v22 = vrot.slane %v1659_v61, %v6288_v30  ;;  %1929 = vmatpush1.bf16.msra.mxu0 %v6612_v41 }
0x176c   :  { %v721_v63 = vpop.permute.xlu0 %720  ;;  %1930 = vmatprep.subr.bf16.mxu0 %v6619_v4  ;;  %1960 = vmatprep.mubr.bf16.mxu0 %v5988_v2 }
0x176d   :  { %725 = vst.msk [vmem:[#allocation2 + $0x9] sm:$0x1] %vm568_vm6, %v721_v63  ;;  %1668 = vrot.lane.b32.xlu1 %v1663_v62, %s5989_s0 }
0x176f   :  { %1670 = vrot.lane.b32.xlu0 %v1667_v22, %s5989_s0  ;;  %1931 = vmatpush1.bf16.msra.mxu0 %v6630_v58 }
0x1770   :  { %v739_v50 = vpop.permute.xlu0 %738  ;;  %2238 = vmatprep.subr.bf16.mxu0 %v6602_v32 }
0x1771   :  { %743 = vst.msk [vmem:[#allocation2 + $0xe] sm:$0x1] %vm587_vm7, %v739_v50 }
0x1774   :  { %v877_v0 = vpop.permute.xlu0 %876 }
0x1775   :  { %881 = vst.msk [vmem:[#allocation2 + $0xa] sm:$0x1] %vm568_vm6, %v877_v0 }
0x1778   :  { %v895_v1 = vpop.permute.xlu0 %894 }
0x1779   :  { %899 = vst.msk [vmem:[#allocation2 + $0xd] sm:$0x1] %vm587_vm7, %v895_v1 }
0x177c   :  { %v1033_v6 = vpop.permute.xlu0 %1032 }
0x177d   :  { %1037 = vst.msk [vmem:[#allocation2 + $0xb] sm:$0x1] %vm568_vm6, %v1033_v6 }
0x1780   :  { %v1051_v5 = vpop.permute.xlu0 %1050 }
0x1781   :  { %1055 = vst.msk [vmem:[#allocation2 + $0xc] sm:$0x1] %vm587_vm7, %v1051_v5 }
0x1784   :  { %v1187_v20 = vpop.permute.xlu0 %1186 }
0x1785   :  { %1191 = vst.msk [vmem:[#allocation2 + $0xc] sm:$0x1] %vm568_vm6, %v1187_v20 }
0x1788   :  { %v1205_v7 = vpop.permute.xlu0 %1204 }
0x1789   :  { %1209 = vst.msk [vmem:[#allocation2 + $0xb] sm:$0x1] %vm587_vm7, %v1205_v7 }
0x178c   :  { %v1341_v8 = vpop.permute.xlu0 %1340 }
0x178d   :  { %1345 = vst.msk [vmem:[#allocation2 + $0xd] sm:$0x1] %vm568_vm6, %v1341_v8 }
0x1790   :  { %v1359_v9 = vpop.permute.xlu0 %1358 }
0x1791   :  { %1363 = vst.msk [vmem:[#allocation2 + $0xa] sm:$0x1] %vm587_vm7, %v1359_v9 }
0x1794   :  { %v1497_v10 = vpop.permute.xlu0 %1496 }
0x1795   :  { %1501 = vst.msk [vmem:[#allocation2 + $0xe] sm:$0x1] %vm568_vm6, %v1497_v10 }
0x1798   :  { %v1515_v19 = vpop.permute.xlu0 %1514 }
0x1799   :  { %1519 = vst.msk [vmem:[#allocation2 + $0x9] sm:$0x1] %vm587_vm7, %v1515_v19 }
0x17db   :  { %v1651_v12 = vpop.permute.xlu1 %1650 }
0x17dc   :  { %1656 = vst.msk [vmem:[#allocation2 + $0x7] sm:$0x1] %vm568_vm6, %v1651_v12 }
0x17dd   :  { %v1653_v13 = vpop.permute.xlu0 %1652 }
0x17de   :  { %1657 = vst.msk [vmem:[#allocation2 + $0xf] sm:$0x1] %vm568_vm6, %v1653_v13 }
0x17df   :  { %v1669_v14 = vpop.permute.xlu1 %1668 }
0x17e0   :  { %1674 = vst.msk [vmem:[#allocation2] sm:$0x1] %vm587_vm7, %v1669_v14 }
0x17e1   :  { %v1671_v15 = vpop.permute.xlu0 %1670 }
0x17e2   :  { %1675 = vst.msk [vmem:[#allocation2 + $0x8] sm:$0x1] %vm587_vm7, %v1671_v15 }
0x17e7   :  { %v1676_v16 = vld [vmem:[#allocation2] sm:$0xff] }
0x17e9   :  { %v1677_v18 = vld [vmem:[#allocation2 + $0x8] sm:$0xff] }
0x17ea   :  { %v1703_v21 = vpack.c.bf16 %v1677_v18, %v1676_v16 }
0x17ec   :  { %4923 = vmatmul.mubr.msk.bf16.vlgmr.msra.gmra.mrb[20].mxu1 %vm1723_vm8, %v1703_v21 }
0x17ed   :  { %2083 = vmatpush1.bf16.msra.mxu1 %v6612_v41  ;;  %2114 = vmatprep.mubr.bf16.mxu1 %v5988_v2 }
0x17ee   :  { %2084 = vmatprep.subr.bf16.mxu1 %v6619_v4 }
0x17f1   :  { %2085 = vmatpush1.bf16.msra.mxu1 %v6630_v58 }
0x17f2   :  { %2394 = vmatprep.subr.bf16.mxu1 %v6602_v32 }
0x183d   :  { %v1808_v25 = vpop.f32.mrb[16].mxu0 }
0x183e   :  { %v1810_v28 = vpop.f32.mrb[17].mxu0  ;;  %v1816_v34 = vrot.slane %v1808_v25, 1 }
0x183f   :  { %v1812_v17 = vpop.f32.mrb[18].mxu0  ;;  %v1822_v38 = vrot.slane %v1810_v28, 3  ;;  %v1823_v36 = vrot.slane %v1810_v28, 4 }
0x1840   :  { %v1813_v29 = vpop.f32.mrb[19].mxu0 }
0x18bf   :  { %v1761_v43 = vpop.f32.mrb[20].mxu1 }
0x18c0   :  { %v1763_v39 = vpop.f32.mrb[21].mxu1  ;;  %v6675_v44 = vadd.f32 %v1761_v43, %v1716_v35 }
0x18c1   :  { %v6673_v40 = vadd.f32 %v1763_v39, %v1720_v33  ;;  %v1765_v42 = vpop.f32.mrb[22].mxu1 }
0x18c2   :  { %v6677_v45 = vadd.f32 %v1765_v42, %v1716_v35  ;;  %v1767_v46 = vpop.f32.mrb[23].mxu1  ;;  %v1819_v52 = vadd.f32 %v1808_v25, %v6675_v44 }
0x18c3   :  { %v6679_v47 = vadd.f32 %v1767_v46, %v1720_v33  ;;  %v1826_v49 = vadd.f32 %v1822_v38, %v6673_v40 }
0x18c4   :  { %v1820_v11 = vadd.f32 %v1816_v34, %v6677_v45 }
0x18c5   :  { %v1827_v51 = vadd.f32 %v1823_v36, %v6679_v47  ;;  %v1835_v53 = vrot.slane %v1826_v49, 5 }
0x18c6   :  { %v1830_v48 = vrot.slane %v1820_v11, 7 }
0x18c7   :  { %v1836_v54 = vrot.slane %v1827_v51, 4 }
0x18c8   :  { %v1831_v55 = vsel %vm495_vm2, %v1830_v48, %v1819_v52 }
0x18c9   :  { %v1837_v56 = vsel %vm502_vm3, %v1836_v54, %v1835_v53 }
0x18ca   :  { %v1839_v26 = vsel %vm505_vm4, %v1831_v55, %v1837_v56 }
0x18cb   :  { %5374 = vtanh.f32 %v1839_v26  ;;  %v4924_v59 = vmul.f32 -1.442695, %v1839_v26 }
0x18cd   :  { %5376 = vpow2.f32 %v4924_v59 }
0x18d5   :  { %v5375_v57 = vpop.eup %5374 }
0x18d6   :  { %1849 = vrot.lane.b32.xlu1 %v5375_v57, %s5989_s0 }
0x18d7   :  { %v5377_v60 = vpop.eup %5376 }
0x18d8   :  { %v1843_v3 = vadd.f32 1.0, %v5377_v60 }
0x18da   :  { %5378 = vrcp.f32 %v1843_v3 }
0x18e4   :  { %v5379_v61 = vpop.eup %5378 }
0x18e5   :  { %v1847_v22 = vmul.f32 0.0, %v5379_v61 }
0x1948   :  { %v1850_v62 = vpop.permute.xlu1 %1849 }
0x1949   :  { %v1852_v63 = vmul.f32 %v5379_v61, %v1850_v62 }
0x194b   :  { %1854 = vrot.lane.b32.xlu0 %v1852_v63, %s5990_s21 }
0x19bd   :  { %v1855_v50 = vpop.permute.xlu0 %1854 }
0x19be   :  { %v1857_v0 = vadd.f32 %v1855_v50, %v1847_v22 }
0x19c0   :  { %5380 = vtanh.f32 %v1857_v0 }
0x19ca   :  { %v5381_v1 = vpop.eup %5380 }
0x19cb   :  { %1860 = vrot.lane.b32.xlu1 %v5381_v1, %s5989_s0 }
0x1a3d   :  { %v1861_v6 = vpop.permute.xlu1 %1860 }
0x1a3e   :  { %v6691_v5 = vmul.f32 %v5379_v61, %v1861_v6 }
0x1a40   :  { %v1921_v20 = vpack.c.bf16 %v6691_v5, %v6691_v5 }
0x1a42   :  { %1923 = vrot.lane.b32.xlu0 %v1921_v20, %s5990_s21 }
0x1ab4   :  { %v1924_v7 = vpop.permute.xlu0 %1923 }
0x1ab5   :  { %4925 = vmatmul.mubr.msk.bf16.vlgmr.msra.gmra.mrb[20].mxu0 %vm434_vm5, %v1924_v7 }
0x1ab6   :  { %2239 = vmatpush1.bf16.msra.mxu0 %v6612_v41  ;;  %2270 = vmatprep.mubr.bf16.mxu0 %v5988_v2 }
0x1ab7   :  { %2240 = vmatprep.subr.bf16.mxu0 %v6619_v4 }
0x1aba   :  { %2241 = vmatpush1.bf16.msra.mxu0 %v6630_v58 }
0x1abb   :  { %2548 = vmatprep.subr.bf16.mxu0 %v6602_v32 }
0x1b88   :  { %v1962_v8 = vpop.f32.mrb[20].mxu0 }
0x1b89   :  { %v1970_v9 = vrot.slane %v1962_v8, 7  ;;  %v1964_v10 = vpop.f32.mrb[21].mxu0  ;;  %v1974_v21 = vadd.f32 %v1962_v8, %v6677_v45 }
0x1b8a   :  { %v1976_v19 = vrot.slane %v1964_v10, 4  ;;  %v1977_v12 = vrot.slane %v1964_v10, 5  ;;  %v1966_v13 = vpop.f32.mrb[22].mxu0 }
0x1b8b   :  { %v1973_v14 = vadd.f32 %v1970_v9, %v6675_v44  ;;  %v1967_v15 = vpop.f32.mrb[23].mxu0 }
0x1b8c   :  { %v1980_v16 = vadd.f32 %v1976_v19, %v6673_v40  ;;  %v1981_v18 = vadd.f32 %v1977_v12, %v6679_v47 }
0x1b8d   :  { %v1984_v25 = vrot.slane %v1973_v14, 1 }
0x1b8e   :  { %v1989_v28 = vrot.slane %v1980_v16, 4  ;;  %v1990_v17 = vrot.slane %v1981_v18, 3 }
0x1b8f   :  { %v1985_v29 = vsel %vm495_vm2, %v1974_v21, %v1984_v25 }
0x1b90   :  { %v1991_v31 = vsel %vm502_vm3, %v1990_v17, %v1989_v28 }
0x1b91   :  { %v1993_v33 = vsel %vm505_vm4, %v1985_v29, %v1991_v31 }
0x1b92   :  { %5382 = vtanh.f32 %v1993_v33  ;;  %v4926_v43 = vmul.f32 -1.442695, %v1993_v33 }
0x1b94   :  { %5384 = vpow2.f32 %v4926_v43 }
0x1b9c   :  { %v5383_v35 = vpop.eup %5382 }
0x1b9d   :  { %2003 = vrot.lane.b32.xlu1 %v5383_v35, %s5989_s0 }
0x1b9e   :  { %v5385_v38 = vpop.eup %5384 }
0x1b9f   :  { %v1997_v34 = vadd.f32 1.0, %v5385_v38 }
0x1ba1   :  { %5386 = vrcp.f32 %v1997_v34 }
0x1bab   :  { %v5387_v39 = vpop.eup %5386 }
0x1bac   :  { %v2001_v46 = vmul.f32 %v5387_v39, %v1857_v0 }
0x1c0f   :  { %v2004_v36 = vpop.permute.xlu1 %2003 }
0x1c10   :  { %v2006_v42 = vmul.f32 %v5387_v39, %v2004_v36 }
0x1c12   :  { %2008 = vrot.lane.b32.xlu0 %v2006_v42, %s5990_s21 }
0x1c84   :  { %v2009_v49 = vpop.permute.xlu0 %2008 }
0x1c85   :  { %v2011_v11 = vadd.f32 %v2009_v49, %v2001_v46 }
0x1c87   :  { %5388 = vtanh.f32 %v2011_v11 }
0x1c91   :  { %v5389_v51 = vpop.eup %5388 }
0x1c92   :  { %2014 = vrot.lane.b32.xlu1 %v5389_v51, %s5989_s0 }
0x1d04   :  { %v2015_v52 = vpop.permute.xlu1 %2014 }
0x1d05   :  { %v6712_v48 = vmul.f32 %v5387_v39, %v2015_v52 }
0x1d07   :  { %v2075_v53 = vpack.c.bf16 %v6712_v48, %v6712_v48 }
0x1d09   :  { %2077 = vrot.lane.b32.xlu0 %v2075_v53, %s5990_s21 }
0x1d7b   :  { %v2078_v54 = vpop.permute.xlu0 %2077 }
0x1d7c   :  { %4927 = vmatmul.mubr.msk.bf16.vlgmr.msra.gmra.mrb[24].mxu1 %vm434_vm5, %v2078_v54 }
0x1d7d   :  { %2395 = vmatpush1.bf16.msra.mxu1 %v6612_v41  ;;  %2426 = vmatprep.mubr.bf16.mxu1 %v5988_v2 }
0x1d7e   :  { %2396 = vmatprep.subr.bf16.mxu1 %v6619_v4 }
0x1d81   :  { %2397 = vmatpush1.bf16.msra.mxu1 %v6630_v58 }
0x1d82   :  { %2702 = vmatprep.subr.bf16.mxu1 %v6602_v32 }
0x1e4f   :  { %v2116_v55 = vpop.f32.mrb[24].mxu1 }
0x1e50   :  { %v2124_v56 = vrot.slane %v2116_v55, 6  ;;  %v2125_v26 = vrot.slane %v2116_v55, 7  ;;  %v2118_v57 = vpop.f32.mrb[25].mxu1 }
0x1e51   :  { %v2131_v59 = vrot.slane %v2118_v57, 5  ;;  %v2132_v60 = vrot.slane %v2118_v57, 6  ;;  %v2120_v3 = vpop.f32.mrb[26].mxu1 }
0x1e52   :  { %v2128_v61 = vadd.f32 %v2124_v56, %v6675_v44  ;;  %v2129_v62 = vadd.f32 %v2125_v26, %v6677_v45  ;;  %v2121_v63 = vpop.f32.mrb[27].mxu1 }
0x1e53   :  { %v2135_v22 = vadd.f32 %v2131_v59, %v6673_v40  ;;  %v2136_v50 = vadd.f32 %v2132_v60, %v6679_v47 }
0x1e54   :  { %v2139_v0 = vrot.slane %v2128_v61, 2  ;;  %v2140_v1 = vrot.slane %v2129_v62, 1 }
0x1e55   :  { %v2145_v6 = vrot.slane %v2135_v22, 3  ;;  %v2146_v20 = vrot.slane %v2136_v50, 2 }
0x1e56   :  { %v2141_v7 = vsel %vm495_vm2, %v2140_v1, %v2139_v0 }
0x1e57   :  { %v2147_v8 = vsel %vm502_vm3, %v2146_v20, %v2145_v6 }
0x1e58   :  { %v2149_v9 = vsel %vm505_vm4, %v2141_v7, %v2147_v8 }
0x1e59   :  { %5390 = vtanh.f32 %v2149_v9  ;;  %v4928_v19 = vmul.f32 -1.442695, %v2149_v9 }
0x1e5b   :  { %5392 = vpow2.f32 %v4928_v19 }
0x1e63   :  { %v5391_v10 = vpop.eup %5390 }
0x1e64   :  { %2159 = vrot.lane.b32.xlu1 %v5391_v10, %s5989_s0 }
0x1e65   :  { %v5393_v12 = vpop.eup %5392 }
0x1e66   :  { %v2153_v13 = vadd.f32 1.0, %v5393_v12 }
0x1e68   :  { %5394 = vrcp.f32 %v2153_v13 }
0x1e72   :  { %v5395_v14 = vpop.eup %5394 }
0x1e73   :  { %v2157_v18 = vmul.f32 %v5395_v14, %v2011_v11 }
0x1ed6   :  { %v2160_v15 = vpop.permute.xlu1 %2159 }
0x1ed7   :  { %v2162_v16 = vmul.f32 %v5395_v14, %v2160_v15 }
0x1ed9   :  { %2164 = vrot.lane.b32.xlu0 %v2162_v16, %s5990_s21 }
0x1f4b   :  { %v2165_v21 = vpop.permute.xlu0 %2164 }
0x1f4c   :  { %v2167_v25 = vadd.f32 %v2165_v21, %v2157_v18 }
0x1f4e   :  { %5396 = vtanh.f32 %v2167_v25 }
0x1f58   :  { %v5397_v28 = vpop.eup %5396 }
0x1f59   :  { %2170 = vrot.lane.b32.xlu1 %v5397_v28, %s5989_s0 }
0x1fcb   :  { %v2171_v17 = vpop.permute.xlu1 %2170 }
0x1fcc   :  { %v6733_v29 = vmul.f32 %v5395_v14, %v2171_v17 }
0x1fce   :  { %v2231_v31 = vpack.c.bf16 %v6733_v29, %v6733_v29 }
0x1fd0   :  { %2233 = vrot.lane.b32.xlu0 %v2231_v31, %s5990_s21 }
0x2042   :  { %v2234_v33 = vpop.permute.xlu0 %2233 }
0x2043   :  { %4929 = vmatmul.mubr.msk.bf16.vlgmr.msra.gmra.mrb[24].mxu0 %vm434_vm5, %v2234_v33 }
0x2044   :  { %2549 = vmatpush1.bf16.msra.mxu0 %v6612_v41  ;;  %2580 = vmatprep.mubr.bf16.mxu0 %v5988_v2 }
0x2045   :  { %2550 = vmatprep.subr.bf16.mxu0 %v6619_v4 }
0x2048   :  { %2551 = vmatpush1.bf16.msra.mxu0 %v6630_v58 }
0x2049   :  { %2858 = vmatprep.subr.bf16.mxu0 %v6602_v32 }
0x2116   :  { %v2272_v35 = vpop.f32.mrb[24].mxu0 }
0x2117   :  { %v2280_v43 = vrot.slane %v2272_v35, 5  ;;  %v2281_v38 = vrot.slane %v2272_v35, 6  ;;  %v2274_v34 = vpop.f32.mrb[25].mxu0 }
0x2118   :  { %v2287_v39 = vrot.slane %v2274_v34, 6  ;;  %v2288_v36 = vrot.slane %v2274_v34, 7  ;;  %v2276_v42 = vpop.f32.mrb[26].mxu0 }
0x2119   :  { %v2284_v46 = vadd.f32 %v2280_v43, %v6675_v44  ;;  %v2285_v49 = vadd.f32 %v2281_v38, %v6677_v45  ;;  %v2277_v11 = vpop.f32.mrb[27].mxu0 }
0x211a   :  { %v2291_v51 = vadd.f32 %v2287_v39, %v6673_v40  ;;  %v2292_v52 = vadd.f32 %v2288_v36, %v6679_v47 }
0x211b   :  { %v2295_v53 = vrot.slane %v2284_v46, 3  ;;  %v2296_v54 = vrot.slane %v2285_v49, 2 }
0x211c   :  { %v2301_v55 = vrot.slane %v2291_v51, 2  ;;  %v2302_v32 = vrot.slane %v2292_v52, 1 }
0x211d   :  { %v2297_v56 = vsel %vm495_vm2, %v2296_v54, %v2295_v53 }
0x211e   :  { %v2303_v26 = vsel %vm502_vm3, %v2302_v32, %v2301_v55 }
0x211f   :  { %v2305_v57 = vsel %vm505_vm4, %v2297_v56, %v2303_v26 }
0x2120   :  { %5398 = vtanh.f32 %v2305_v57  ;;  %v4930_v60 = vmul.f32 -1.442695, %v2305_v57 }
0x2122   :  { %5400 = vpow2.f32 %v4930_v60 }
0x212a   :  { %v5399_v59 = vpop.eup %5398 }
0x212b   :  { %2315 = vrot.lane.b32.xlu1 %v5399_v59, %s5989_s0 }
0x212c   :  { %v5401_v3 = vpop.eup %5400 }
0x212d   :  { %v2309_v61 = vadd.f32 1.0, %v5401_v3 }
0x212f   :  { %5402 = vrcp.f32 %v2309_v61 }
0x2139   :  { %v5403_v62 = vpop.eup %5402 }
0x213a   :  { %v2313_v50 = vmul.f32 %v5403_v62, %v2167_v25 }
0x219d   :  { %v2316_v63 = vpop.permute.xlu1 %2315 }
0x219e   :  { %v2318_v22 = vmul.f32 %v5403_v62, %v2316_v63 }
0x21a0   :  { %2320 = vrot.lane.b32.xlu0 %v2318_v22, %s5990_s21 }
0x2212   :  { %v2321_v0 = vpop.permute.xlu0 %2320 }
0x2213   :  { %v2323_v1 = vadd.f32 %v2321_v0, %v2313_v50 }
0x2215   :  { %5404 = vtanh.f32 %v2323_v1 }
0x221f   :  { %v5405_v6 = vpop.eup %5404 }
0x2220   :  { %2326 = vrot.lane.b32.xlu1 %v5405_v6, %s5989_s0 }
0x2292   :  { %v2327_v20 = vpop.permute.xlu1 %2326 }
0x2293   :  { %v6754_v7 = vmul.f32 %v5403_v62, %v2327_v20 }
0x2295   :  { %v2387_v8 = vpack.c.bf16 %v6754_v7, %v6754_v7 }
0x2297   :  { %2389 = vrot.lane.b32.xlu0 %v2387_v8, %s5990_s21 }
0x2309   :  { %v2390_v9 = vpop.permute.xlu0 %2389 }
0x230a   :  { %4931 = vmatmul.mubr.msk.bf16.vlgmr.msra.gmra.mrb[28].mxu1 %vm434_vm5, %v2390_v9 }
0x230b   :  { %2703 = vmatpush1.bf16.msra.mxu1 %v6612_v41  ;;  %2734 = vmatprep.mubr.bf16.mxu1 %v5988_v2 }
0x230c   :  { %2704 = vmatprep.subr.bf16.mxu1 %v6619_v4 }
0x230f   :  { %2705 = vmatpush1.bf16.msra.mxu1 %v6630_v58 }
0x23dd   :  { %v2428_v10 = vpop.f32.mrb[28].mxu1 }
0x23de   :  { %v2436_v19 = vrot.slane %v2428_v10, 4  ;;  %v2437_v12 = vrot.slane %v2428_v10, 5  ;;  %v2430_v13 = vpop.f32.mrb[29].mxu1 }
0x23df   :  { %v2443_v14 = vrot.slane %v2430_v13, 7  ;;  %v2432_v15 = vpop.f32.mrb[30].mxu1  ;;  %v2447_v31 = vadd.f32 %v2430_v13, %v6679_v47 }
0x23e0   :  { %v2440_v16 = vadd.f32 %v2436_v19, %v6675_v44  ;;  %v2441_v18 = vadd.f32 %v2437_v12, %v6677_v45  ;;  %v2433_v21 = vpop.f32.mrb[31].mxu1 }
0x23e1   :  { %v2446_v25 = vadd.f32 %v2443_v14, %v6673_v40 }
0x23e2   :  { %v2450_v28 = vrot.slane %v2440_v16, 4  ;;  %v2451_v17 = vrot.slane %v2441_v18, 3 }
0x23e3   :  { %v2456_v33 = vrot.slane %v2446_v25, 1 }
0x23e4   :  { %v2452_v35 = vsel %vm495_vm2, %v2451_v17, %v2450_v28 }
0x23e5   :  { %v2457_v43 = vsel %vm502_vm3, %v2447_v31, %v2456_v33 }
0x23e6   :  { %v2459_v38 = vsel %vm505_vm4, %v2452_v35, %v2457_v43 }
0x23e7   :  { %5406 = vtanh.f32 %v2459_v38  ;;  %v4932_v39 = vmul.f32 -1.442695, %v2459_v38 }
0x23e9   :  { %5408 = vpow2.f32 %v4932_v39 }
0x23f1   :  { %v5407_v34 = vpop.eup %5406 }
0x23f2   :  { %2469 = vrot.lane.b32.xlu1 %v5407_v34, %s5989_s0 }
0x23f3   :  { %v5409_v36 = vpop.eup %5408 }
0x23f4   :  { %v2463_v42 = vadd.f32 1.0, %v5409_v36 }
0x23f6   :  { %5410 = vrcp.f32 %v2463_v42 }
0x2400   :  { %v5411_v46 = vpop.eup %5410 }
0x2401   :  { %v2467_v51 = vmul.f32 %v5411_v46, %v2323_v1 }
0x2464   :  { %v2470_v49 = vpop.permute.xlu1 %2469 }
0x2465   :  { %v2472_v11 = vmul.f32 %v5411_v46, %v2470_v49 }
0x2467   :  { %2474 = vrot.lane.b32.xlu0 %v2472_v11, %s5990_s21 }
0x24d9   :  { %v2475_v52 = vpop.permute.xlu0 %2474 }
0x24da   :  { %v2477_v53 = vadd.f32 %v2475_v52, %v2467_v51 }
0x24dc   :  { %5412 = vtanh.f32 %v2477_v53 }
0x24e6   :  { %v5413_v54 = vpop.eup %5412 }
0x24e7   :  { %2480 = vrot.lane.b32.xlu1 %v5413_v54, %s5989_s0 }
0x2559   :  { %v2481_v55 = vpop.permute.xlu1 %2480 }
0x255a   :  { %v6774_v32 = vmul.f32 %v5411_v46, %v2481_v55 }
0x255c   :  { %v2541_v56 = vpack.c.bf16 %v6774_v32, %v6774_v32 }
0x255e   :  { %2543 = vrot.lane.b32.xlu0 %v2541_v56, %s5990_s21 }
0x25d0   :  { %v2544_v26 = vpop.permute.xlu0 %2543 }
0x25d1   :  { %4933 = vmatmul.mubr.msk.bf16.vlgmr.msra.gmra.mrb[28].mxu0 %vm434_vm5, %v2544_v26 }
0x25d2   :  { %2859 = vmatpush1.bf16.msra.mxu0 %v6612_v41  ;;  %2890 = vmatprep.mubr.bf16.mxu0 %v5988_v2 }
0x25d3   :  { %2860 = vmatprep.subr.bf16.mxu0 %v6619_v4 }
0x25d6   :  { %2861 = vmatpush1.bf16.msra.mxu0 %v6630_v58 }
0x26a4   :  { %v2582_v57 = vpop.f32.mrb[28].mxu0 }
0x26a5   :  { %v2590_v59 = vrot.slane %v2582_v57, 3  ;;  %v2591_v60 = vrot.slane %v2582_v57, 4  ;;  %v2584_v3 = vpop.f32.mrb[29].mxu0 }
0x26a6   :  { %v2597_v61 = vrot.slane %v2584_v3, 1  ;;  %v2586_v62 = vpop.f32.mrb[30].mxu0  ;;  %v2600_v6 = vadd.f32 %v2584_v3, %v6673_v40 }
0x26a7   :  { %v2594_v63 = vadd.f32 %v2590_v59, %v6675_v44  ;;  %v2595_v22 = vadd.f32 %v2591_v60, %v6677_v45  ;;  %v2587_v50 = vpop.f32.mrb[31].mxu0 }
0x26a8   :  { %v2601_v0 = vadd.f32 %v2597_v61, %v6679_v47 }
0x26a9   :  { %v2604_v41 = vrot.slane %v2594_v63, 5  ;;  %v2605_v1 = vrot.slane %v2595_v22, 4 }
0x26aa   :  { %v2610_v4 = vrot.slane %v2601_v0, 7 }
0x26ab   :  { %v2606_v58 = vsel %vm495_vm2, %v2605_v1, %v2604_v41 }
0x26ac   :  { %v2611_v20 = vsel %vm502_vm3, %v2610_v4, %v2600_v6 }
0x26ad   :  { %v2613_v8 = vsel %vm505_vm4, %v2606_v58, %v2611_v20 }
0x26ae   :  { %5414 = vtanh.f32 %v2613_v8  ;;  %v4934_v10 = vmul.f32 -1.442695, %v2613_v8 }
0x26b0   :  { %5416 = vpow2.f32 %v4934_v10 }
0x26b8   :  { %v5415_v9 = vpop.eup %5414 }
0x26b9   :  { %2623 = vrot.lane.b32.xlu1 %v5415_v9, %s5989_s0 }
0x26ba   :  { %v5417_v19 = vpop.eup %5416 }
0x26bb   :  { %v2617_v12 = vadd.f32 1.0, %v5417_v19 }
0x26bd   :  { %5418 = vrcp.f32 %v2617_v12 }
0x26c7   :  { %v5419_v13 = vpop.eup %5418 }
0x26c8   :  { %v2621_v16 = vmul.f32 %v5419_v13, %v2477_v53 }
0x272b   :  { %v2624_v14 = vpop.permute.xlu1 %2623 }
0x272c   :  { %v2626_v15 = vmul.f32 %v5419_v13, %v2624_v14 }
0x272e   :  { %2628 = vrot.lane.b32.xlu0 %v2626_v15, %s5990_s21 }
0x27a0   :  { %v2629_v18 = vpop.permute.xlu0 %2628 }
0x27a1   :  { %v2631_v21 = vadd.f32 %v2629_v18, %v2621_v16 }
0x27a3   :  { %5420 = vtanh.f32 %v2631_v21 }
0x27ad   :  { %v5421_v25 = vpop.eup %5420 }
0x27ae   :  { %2634 = vrot.lane.b32.xlu1 %v5421_v25, %s5989_s0 }
0x2820   :  { %v2635_v28 = vpop.permute.xlu1 %2634 }
0x2821   :  { %v6794_v17 = vmul.f32 %v5419_v13, %v2635_v28 }
0x2823   :  { %v2695_v31 = vpack.c.bf16 %v6794_v17, %v6794_v17 }
0x2825   :  { %2697 = vrot.lane.b32.xlu0 %v2695_v31, %s5990_s21 }
0x2897   :  { %v2698_v33 = vpop.permute.xlu0 %2697 }
0x2898   :  { %4935 = vmatmul.mubr.msk.bf16.vlgmr.msra.gmra.mrb[32].mxu1 %vm434_vm5, %v2698_v33 }
0x2899   :  { %3126 = vmatprep.mubr.bf16.mxu1 %v5988_v2 }
0x296b   :  { %v2736_v35 = vpop.f32.mrb[32].mxu1 }
0x296c   :  { %v2744_v43 = vrot.slane %v2736_v35, 2  ;;  %v2745_v38 = vrot.slane %v2736_v35, 3  ;;  %v2738_v34 = vpop.f32.mrb[33].mxu1 }
0x296d   :  { %v2751_v39 = vrot.slane %v2738_v34, 1  ;;  %v2752_v36 = vrot.slane %v2738_v34, 2  ;;  %v2740_v42 = vpop.f32.mrb[34].mxu1 }
0x296e   :  { %v2748_v46 = vadd.f32 %v2744_v43, %v6675_v44  ;;  %v2749_v49 = vadd.f32 %v2745_v38, %v6677_v45  ;;  %v2741_v11 = vpop.f32.mrb[35].mxu1 }
0x296f   :  { %v2755_v51 = vadd.f32 %v2751_v39, %v6673_v40  ;;  %v2756_v52 = vadd.f32 %v2752_v36, %v6679_v47  ;;  %v6840_v11 = vrot.slane %v6712_v48, %v6449_v37 }
0x2970   :  { %v2759_v53 = vrot.slane %v2748_v46, 6  ;;  %v2760_v54 = vrot.slane %v2749_v49, 5 }
0x2971   :  { %v2765_v55 = vrot.slane %v2755_v51, 7  ;;  %v2766_v2 = vrot.slane %v2756_v52, 6 }
0x2972   :  { %v2761_v56 = vsel %vm495_vm2, %v2760_v54, %v2759_v53 }
0x2973   :  { %v2767_v26 = vsel %vm502_vm3, %v2766_v2, %v2765_v55  ;;  %v6850_v55 = vrot.slane %v6733_v29, %v6449_v37 }
0x2974   :  { %v2769_v57 = vsel %vm505_vm4, %v2761_v56, %v2767_v26 }
0x2975   :  { %5422 = vtanh.f32 %v2769_v57  ;;  %v4936_v60 = vmul.f32 -1.442695, %v2769_v57  ;;  %v2189_v2 = vrot.slane %v6850_v55, %v6449_v37  ;;  %v6860_v57 = vrot.slane %v6754_v7, %v6449_v37 }
0x2977   :  { %5424 = vpow2.f32 %v4936_v60  ;;  %v2213_v26 = vcombine.high %v2189_v2, %v2189_v2  ;;  %v2345_v29 = vrot.slane %v6860_v57, %v6449_v37 }
0x2979   :  { %v2218_v60 = vrot.slane %v2213_v26, %v6288_v30 }
0x297f   :  { %v5423_v59 = vpop.eup %5422 }
0x2980   :  { %2779 = vrot.lane.b32.xlu1 %v5423_v59, %s5989_s0  ;;  %v2200_v59 = vrot.slane %v2189_v2, %v6288_v30 }
0x2981   :  { %v5425_v3 = vpop.eup %5424 }
0x2982   :  { %v2773_v61 = vadd.f32 1.0, %v5425_v3  ;;  %v2369_v3 = vcombine.high %v2345_v29, %v2345_v29 }
0x2984   :  { %5426 = vrcp.f32 %v2773_v61  ;;  %v6870_v61 = vrot.slane %v6774_v32, %v6449_v37 }
0x2986   :  { %v2499_v7 = vrot.slane %v6870_v61, %v6449_v37 }
0x298e   :  { %v5427_v62 = vpop.eup %5426 }
0x298f   :  { %v2777_v50 = vmul.f32 %v5427_v62, %v2631_v21 }
0x29f2   :  { %v2780_v63 = vpop.permute.xlu1 %2779 }
0x29f3   :  { %v2782_v22 = vmul.f32 %v5427_v62, %v2780_v63  ;;  %v2374_v63 = vrot.slane %v2369_v3, %v6288_v30 }
0x29f5   :  { %2784 = vrot.lane.b32.xlu0 %v2782_v22, %s5990_s21  ;;  %v2523_v22 = vcombine.high %v2499_v7, %v2499_v7 }
0x2a67   :  { %v2785_v0 = vpop.permute.xlu0 %2784 }
0x2a68   :  { %v6810_v41 = vadd.f32 %v2785_v0, %v2777_v50  ;;  %v6880_v50 = vrot.slane %v6794_v17, %v6449_v37  ;;  %v2510_v0 = vrot.slane %v2499_v7, %v6288_v30 }
0x2a6a   :  { %5428 = vtanh.f32 %v6810_v41  ;;  %v2653_v32 = vrot.slane %v6880_v50, %v6449_v37 }
0x2a74   :  { %v5429_v1 = vpop.eup %5428 }
0x2a75   :  { %2790 = vrot.lane.b32.xlu1 %v5429_v1, %s5989_s0  ;;  %v2528_v1 = vrot.slane %v2523_v22, %v6288_v30 }
0x2ae7   :  { %v2791_v6 = vpop.permute.xlu1 %2790 }
0x2ae8   :  { %v6814_v4 = vmul.f32 %v5427_v62, %v2791_v6  ;;  %v2356_v62 = vrot.slane %v2345_v29, %v6288_v30  ;;  %v2677_v6 = vcombine.high %v2653_v32, %v2653_v32 }
0x2aea   :  { %v2851_v58 = vpack.c.bf16 %v6814_v4, %v6814_v4 }
0x2aec   :  { %2853 = vrot.lane.b32.xlu0 %v2851_v58, %s5990_s21  ;;  %v6890_v58 = vrot.slane %v6814_v4, %v6449_v37 }
0x2aee   :  { %v2809_v17 = vrot.slane %v6890_v58, %v6449_v37 }
0x2b5e   :  { %v2854_v20 = vpop.permute.xlu0 %2853 }
0x2b5f   :  { %4937 = vmatmul.mubr.msk.bf16.vlgmr.msra.gmra.mrb[32].mxu0 %vm434_vm5, %v2854_v20  ;;  %v2664_v20 = vrot.slane %v2653_v32, %v6288_v30 }
0x2c32   :  { %v2892_v8 = vpop.f32.mrb[32].mxu0 }
0x2c33   :  { %v2900_v9 = vrot.slane %v2892_v8, 1  ;;  %v2901_v10 = vrot.slane %v2892_v8, 2  ;;  %v2894_v19 = vpop.f32.mrb[33].mxu0  ;;  %v2682_v8 = vrot.slane %v2677_v6, %v6288_v30 }
0x2c34   :  { %v2907_v12 = vrot.slane %v2894_v19, 2  ;;  %v2908_v13 = vrot.slane %v2894_v19, 3  ;;  %v2896_v14 = vpop.f32.mrb[34].mxu0 }
0x2c35   :  { %v2904_v15 = vadd.f32 %v2900_v9, %v6675_v44  ;;  %v2905_v16 = vadd.f32 %v2901_v10, %v6677_v45  ;;  %v2897_v18 = vpop.f32.mrb[35].mxu0  ;;  %v2820_v9 = vrot.slane %v2809_v17, %v6288_v30  ;;  %v2833_v10 = vcombine.high %v2809_v17, %v2809_v17 }
0x2c36   :  { %v2911_v21 = vadd.f32 %v2907_v12, %v6673_v40  ;;  %v2912_v25 = vadd.f32 %v2908_v13, %v6679_v47  ;;  %v6830_v47 = vrot.slane %v6691_v5, %v6449_v37  ;;  %v2033_v5 = vrot.slane %v6840_v11, %v6449_v37 }
0x2c37   :  { %v2915_v28 = vrot.slane %v2904_v15, 7  ;;  %v2916_v31 = vrot.slane %v2905_v16, 6  ;;  %v2838_v19 = vrot.slane %v2833_v10, %v6288_v30 }
0x2c38   :  { %v2921_v33 = vrot.slane %v2911_v21, 6  ;;  %v2922_v35 = vrot.slane %v2912_v25, 5  ;;  %v1879_v46 = vrot.slane %v6830_v47, %v6449_v37  ;;  %v2057_v54 = vcombine.high %v2033_v5, %v2033_v5 }
0x2c39   :  { %v2917_v43 = vsel %vm495_vm2, %v2916_v31, %v2915_v28  ;;  %v2044_v48 = vrot.slane %v2033_v5, %v6288_v30  ;;  %v1872_v15 = vcombine.high %v6830_v47, %v6830_v47 }
0x2c3a   :  { %v2923_v38 = vsel %vm502_vm3, %v2922_v35, %v2921_v33  ;;  %v1890_v51 = vrot.slane %v1879_v46, %v6288_v30  ;;  %v1903_v52 = vcombine.high %v1879_v46, %v1879_v46  ;;  %v2062_v56 = vrot.slane %v2057_v54, %v6288_v30 }
0x2c3b   :  { %v2925_v34 = vsel %vm505_vm4, %v2917_v43, %v2923_v38  ;;  %v1886_v21 = vrot.slane %v1872_v15, %v6449_v37  ;;  %v2338_v46 = vcombine.high %v6860_v57, %v6860_v57  ;;  %v2492_v54 = vcombine.high %v6870_v61, %v6870_v61 }
0x2c3c   :  { %5430 = vtanh.f32 %v2925_v34  ;;  %v4938_v44 = vmul.f32 -1.442695, %v2925_v34  ;;  %v1908_v53 = vrot.slane %v1903_v52, %v6288_v30  ;;  %v2182_v34 = vcombine.high %v6850_v55, %v6850_v55 }
0x2c3d   :  { %v1894_v31 = vrot.slane %v1886_v21, %v6288_v30  ;;  %v1904_v33 = vcombine.high %v1886_v21, %v1886_v21  ;;  %v2352_v52 = vrot.slane %v2338_v46, %v6449_v37 }
0x2c3e   :  { %5432 = vpow2.f32 %v4938_v44 }
0x2c3f   :  { %v1912_v38 = vrot.slane %v1904_v33, %v6288_v30  ;;  %v2370_v2 = vcombine.high %v2352_v52, %v2352_v52 }
0x2c41   :  { %v2378_v57 = vrot.slane %v2370_v2, %v6288_v30 }
0x2c46   :  { %v5431_v39 = vpop.eup %5430 }
0x2c47   :  { %2935 = vrot.lane.b32.xlu1 %v5431_v39, %s5989_s0 }
0x2c48   :  { %v5433_v45 = vpop.eup %5432 }
0x2c49   :  { %v2929_v40 = vadd.f32 1.0, %v5433_v45 }
0x2c4b   :  { %5434 = vrcp.f32 %v2929_v40  ;;  %v2196_v40 = vrot.slane %v2182_v34, %v6449_v37 }
0x2c55   :  { %v6832_v36 = vpop.eup %5434 }
0x2c56   :  { %v2933_v4 = vmul.f32 %v6832_v36, %v6810_v41  ;;  %v2026_v41 = vcombine.high %v6840_v11, %v6840_v11  ;;  %v2204_v11 = vrot.slane %v2196_v40, %v6288_v30 }
0x2c58   :  { %v2040_v35 = vrot.slane %v2026_v41, %v6449_v37 }
0x2c5a   :  { %v2048_v44 = vrot.slane %v2040_v35, %v6288_v30  ;;  %v2058_v45 = vcombine.high %v2040_v35, %v2040_v35 }
0x2cb9   :  { %v2936_v42 = vpop.permute.xlu1 %2935 }
0x2cba   :  { %v2938_v49 = vmul.f32 %v6832_v36, %v2936_v42  ;;  %v2066_v42 = vrot.slane %v2058_v45, %v6288_v30 }
0x2cbc   :  { %2940 = vrot.lane.b32.xlu0 %v2938_v49, %s5990_s21 }
0x2cc0   :  { %1895 = vrot.lane.b32.xlu0 %v1890_v51, %s5990_s21  ;;  %v2214_v51 = vcombine.high %v2196_v40, %v2196_v40 }
0x2cc4   :  { %1913 = vrot.lane.b32.xlu0 %v1908_v53, %s5989_s0  ;;  %v2222_v53 = vrot.slane %v2214_v51, %v6288_v30 }
0x2cc8   :  { %2049 = vrot.lane.b32.xlu0 %v2044_v48, %s5990_s21  ;;  %v2360_v48 = vrot.slane %v2352_v52, %v6288_v30 }
0x2ccc   :  { %2067 = vrot.lane.b32.xlu0 %v2062_v56, %s5989_s0  ;;  %v2506_v56 = vrot.slane %v2492_v54, %v6449_v37 }
0x2cce   :  { %v2524_v3 = vcombine.high %v2506_v56, %v2506_v56 }
0x2cd0   :  { %2205 = vrot.lane.b32.xlu0 %v2200_v59, %s5990_s21  ;;  %v2646_v59 = vcombine.high %v6880_v50, %v6880_v50  ;;  %v2532_v7 = vrot.slane %v2524_v3, %v6288_v30  ;;  %v3054_v3 = vld [vmem:[%s7370_s10] sm:$0xff] }
0x2cd2   :  { %v2660_v61 = vrot.slane %v2646_v59, %v6449_v37  ;;  %v3055_v59 = vld [vmem:[%s7370_s10 + $0x8] sm:$0xff] }
0x2cd4   :  { %2223 = vrot.lane.b32.xlu0 %v2218_v60, %s5989_s0  ;;  %v2514_v60 = vrot.slane %v2506_v56, %v6288_v30  ;;  %v2668_v50 = vrot.slane %v2660_v61, %v6288_v30 }
0x2cd8   :  { %2361 = vrot.lane.b32.xlu0 %v2356_v62, %s5990_s21 }
0x2cdc   :  { %2379 = vrot.lane.b32.xlu0 %v2374_v63, %s5989_s0  ;;  %v2802_v63 = vcombine.high %v6890_v58, %v6890_v58 }
0x2cde   :  { %v2816_v32 = vrot.slane %v2802_v63, %v6449_v37  ;;  %v3061_v63 = vld [vmem:[%s7370_s10 + $0x38] sm:$0xff] }
0x2ce0   :  { %2515 = vrot.lane.b32.xlu0 %v2510_v0, %s5990_s21  ;;  %v2678_v0 = vcombine.high %v2660_v61, %v2660_v61  ;;  %v2834_v6 = vcombine.high %v2816_v32, %v2816_v32  ;;  %v3056_v61 = vld [vmem:[%s7370_s10 + $0x10] sm:$0xff] }
0x2ce2   :  { %v2842_v58 = vrot.slane %v2834_v6, %v6288_v30  ;;  %v3065_v6 = vld [vmem:[%s7370_s10 + $0x58] sm:$0xff] }
0x2ce4   :  { %2533 = vrot.lane.b32.xlu0 %v2528_v1, %s5989_s0  ;;  %v2686_v1 = vrot.slane %v2678_v0, %v6288_v30  ;;  %v3060_v0 = vld [vmem:[%s7370_s10 + $0x30] sm:$0xff] }
0x2ce8   :  { %2669 = vrot.lane.b32.xlu0 %v2664_v20, %s5990_s21  ;;  %v2824_v20 = vrot.slane %v2816_v32, %v6288_v30 }
0x2cec   :  { %2687 = vrot.lane.b32.xlu0 %v2682_v8, %s5989_s0 }
0x2cf0   :  { %2825 = vrot.lane.b32.xlu0 %v2820_v9, %s5990_s21 }
0x2cf4   :  { %2843 = vrot.lane.b32.xlu0 %v2838_v19, %s5989_s0 }
0x2d2e   :  { %v2941_v12 = vpop.permute.xlu0 %2940 }
0x2d2f   :  { %v2943_v13 = vadd.f32 %v2941_v12, %v2933_v4 }
0x2d31   :  { %5436 = vtanh.f32 %v2943_v13 }
0x2d32   :  { %v1896_v14 = vpop.permute.xlu0 %1895 }
0x2d33   :  { %1901 = vst.msk [vmem:[#allocation2] sm:$0x1] %vm568_vm6, %v1896_v14 }
0x2d36   :  { %v1914_v16 = vpop.permute.xlu0 %1913 }
0x2d37   :  { %1919 = vst.msk [vmem:[#allocation2 + $0x7] sm:$0x1] %vm587_vm7, %v1914_v16 }
0x2d3a   :  { %v2050_v18 = vpop.permute.xlu0 %2049 }
0x2d3b   :  { %v5437_v25 = vpop.eup %5436  ;;  %2055 = vst.msk [vmem:[#allocation2 + $0x1] sm:$0x1] %vm568_vm6, %v2050_v18 }
0x2d3c   :  { %2946 = vrot.lane.b32.xlu1 %v5437_v25, %s5989_s0 }
0x2d3e   :  { %v2068_v28 = vpop.permute.xlu0 %2067 }
0x2d3f   :  { %2073 = vst.msk [vmem:[#allocation2 + $0x6] sm:$0x1] %vm587_vm7, %v2068_v28 }
0x2d40   :  { %1897 = vrot.lane.b32.xlu1 %v1894_v31, %s5990_s21 }
0x2d42   :  { %v2206_v43 = vpop.permute.xlu0 %2205 }
0x2d43   :  { %2211 = vst.msk [vmem:[#allocation2 + $0x2] sm:$0x1] %vm568_vm6, %v2206_v43 }
0x2d44   :  { %1915 = vrot.lane.b32.xlu1 %v1912_v38, %s5989_s0 }
0x2d46   :  { %v2224_v39 = vpop.permute.xlu0 %2223 }
0x2d47   :  { %2229 = vst.msk [vmem:[#allocation2 + $0x5] sm:$0x1] %vm587_vm7, %v2224_v39 }
0x2d48   :  { %2051 = vrot.lane.b32.xlu1 %v2048_v44, %s5990_s21 }
0x2d4a   :  { %v2362_v47 = vpop.permute.xlu0 %2361 }
0x2d4b   :  { %2367 = vst.msk [vmem:[#allocation2 + $0x3] sm:$0x1] %vm568_vm6, %v2362_v47 }
0x2d4c   :  { %2069 = vrot.lane.b32.xlu1 %v2066_v42, %s5989_s0 }
0x2d4e   :  { %v2380_v49 = vpop.permute.xlu0 %2379 }
0x2d4f   :  { %2385 = vst.msk [vmem:[#allocation2 + $0x4] sm:$0x1] %vm587_vm7, %v2380_v49 }
0x2d50   :  { %2207 = vrot.lane.b32.xlu1 %v2204_v11, %s5990_s21 }
0x2d52   :  { %v2516_v5 = vpop.permute.xlu0 %2515 }
0x2d53   :  { %2521 = vst.msk [vmem:[#allocation2 + $0x4] sm:$0x1] %vm568_vm6, %v2516_v5 }
0x2d54   :  { %2225 = vrot.lane.b32.xlu1 %v2222_v53, %s5989_s0 }
0x2d56   :  { %v2534_v55 = vpop.permute.xlu0 %2533 }
0x2d57   :  { %2539 = vst.msk [vmem:[#allocation2 + $0x3] sm:$0x1] %vm587_vm7, %v2534_v55 }
0x2d58   :  { %2363 = vrot.lane.b32.xlu1 %v2360_v48, %s5990_s21 }
0x2d5a   :  { %v2670_v26 = vpop.permute.xlu0 %2669 }
0x2d5b   :  { %2675 = vst.msk [vmem:[#allocation2 + $0x5] sm:$0x1] %vm568_vm6, %v2670_v26 }
0x2d5c   :  { %2381 = vrot.lane.b32.xlu1 %v2378_v57, %s5989_s0 }
0x2d5e   :  { %v2688_v29 = vpop.permute.xlu0 %2687 }
0x2d5f   :  { %2693 = vst.msk [vmem:[#allocation2 + $0x2] sm:$0x1] %vm587_vm7, %v2688_v29  ;;  %v3057_v29 = vld [vmem:[%s7370_s10 + $0x18] sm:$0xff] }
0x2d60   :  { %2517 = vrot.lane.b32.xlu1 %v2514_v60, %s5990_s21  ;;  %v3072_v60 = vpack.c.bf16 %v3057_v29, %v3055_v59 }
0x2d62   :  { %v2826_v62 = vpop.permute.xlu0 %2825  ;;  %3094 = vmatprep.subr.bf16.mxu1 %v3072_v60 }
0x2d63   :  { %2831 = vst.msk [vmem:[#allocation2 + $0x6] sm:$0x1] %vm568_vm6, %v2826_v62  ;;  %v3071_v62 = vpack.c.bf16 %v3056_v61, %v3054_v3 }
0x2d64   :  { %2535 = vrot.lane.b32.xlu1 %v2532_v7, %s5989_s0  ;;  %v3059_v7 = vld [vmem:[%s7370_s10 + $0x28] sm:$0xff] }
0x2d65   :  { %3095 = vmatpush1.bf16.msra.mxu1 %v3071_v62 }
0x2d66   :  { %v2844_v22 = vpop.permute.xlu0 %2843 }
0x2d67   :  { %2849 = vst.msk [vmem:[#allocation2 + $0x1] sm:$0x1] %vm587_vm7, %v2844_v22  ;;  %v3074_v22 = vpack.c.bf16 %v3061_v63, %v3059_v7 }
0x2d68   :  { %2671 = vrot.lane.b32.xlu1 %v2668_v50, %s5990_s21  ;;  %v3058_v50 = vld [vmem:[%s7370_s10 + $0x20] sm:$0xff] }
0x2d69   :  { %v3073_v32 = vpack.c.bf16 %v3060_v0, %v3058_v50  ;;  %3096 = vmatprep.subr.bf16.mxu1 %v3074_v22 }
0x2d6b   :  { %3097 = vmatpush1.bf16.msra.mxu1 %v3073_v32 }
0x2d6c   :  { %2689 = vrot.lane.b32.xlu1 %v2686_v1, %s5989_s0  ;;  %v3063_v1 = vld [vmem:[%s7370_s10 + $0x48] sm:$0xff] }
0x2d70   :  { %2827 = vrot.lane.b32.xlu1 %v2824_v20, %s5990_s21  ;;  %v3076_v20 = vpack.c.bf16 %v3065_v6, %v3063_v1 }
0x2d72   :  { %3098 = vmatprep.subr.bf16.mxu1 %v3076_v20 }
0x2d74   :  { %2845 = vrot.lane.b32.xlu1 %v2842_v58, %s5989_s0  ;;  %v3062_v58 = vld [vmem:[%s7370_s10 + $0x40] sm:$0xff] }
0x2dae   :  { %v2947_v17 = vpop.permute.xlu1 %2946 }
0x2daf   :  { %v2949_v8 = vmul.f32 %v6832_v36, %v2947_v17  ;;  %v3064_v17 = vld [vmem:[%s7370_s10 + $0x50] sm:$0xff] }
0x2db1   :  { %v2957_v9 = vrot.slane %v2949_v8, %v6449_v37  ;;  %v3075_v8 = vpack.c.bf16 %v3064_v17, %v3062_v58 }
0x2db2   :  { %v1898_v10 = vpop.permute.xlu1 %1897 }
0x2db3   :  { %v2958_v19 = vcombine.high %v2957_v9, %v2957_v9  ;;  %v2965_v4 = vrot.slane %v2957_v9, %v6449_v37  ;;  %1902 = vst.msk [vmem:[#allocation2 + $0x8] sm:$0x1] %vm568_vm6, %v1898_v10  ;;  %3099 = vmatpush1.bf16.msra.mxu1 %v3075_v8  ;;  %v3067_v9 = vld [vmem:[%s7370_s10 + $0x68] sm:$0xff]  ;;  %v3069_v10 = vld [vmem:[%s7370_s10 + $0x78] sm:$0xff] }
0x2db5   :  { %v2972_v12 = vrot.slane %v2958_v19, %v6449_v37  ;;  %v2976_v13 = vrot.slane %v2965_v4, %v6288_v30  ;;  %v2989_v14 = vcombine.high %v2965_v4, %v2965_v4  ;;  %v3078_v19 = vpack.c.bf16 %v3069_v10, %v3067_v9  ;;  %v3066_v4 = vld [vmem:[%s7370_s10 + $0x60] sm:$0xff] }
0x2db6   :  { %v1916_v15 = vpop.permute.xlu1 %1915 }
0x2db7   :  { %v2990_v16 = vcombine.high %v2972_v12, %v2972_v12  ;;  %1920 = vst.msk [vmem:[#allocation2 + $0xf] sm:$0x1] %vm587_vm7, %v1916_v15  ;;  %2981 = vrot.lane.b32.xlu0 %v2976_v13, %s5990_s21  ;;  %v2980_v36 = vrot.slane %v2972_v12, %v6288_v30  ;;  %v2994_v18 = vrot.slane %v2989_v14, %v6288_v30  ;;  %v3068_v12 = vld [vmem:[%s7370_s10 + $0x70] sm:$0xff] }
0x2db8   :  { %v3077_v13 = vpack.c.bf16 %v3068_v12, %v3066_v4  ;;  %3100 = vmatprep.subr.bf16.mxu1 %v3078_v19 }
0x2db9   :  { %2983 = vrot.lane.b32.xlu1 %v2980_v36, %s5990_s21  ;;  %v2998_v37 = vrot.slane %v2990_v16, %v6288_v30 }
0x2dba   :  { %v2052_v21 = vpop.permute.xlu1 %2051  ;;  %3101 = vmatpush1.bf16.msra.mxu1 %v3077_v13 }
0x2dbb   :  { %2056 = vst.msk [vmem:[#allocation2 + $0x9] sm:$0x1] %vm568_vm6, %v2052_v21  ;;  %2999 = vrot.lane.b32.xlu0 %v2994_v18, %s5989_s0 }
0x2dbd   :  { %3001 = vrot.lane.b32.xlu1 %v2998_v37, %s5989_s0 }
0x2dbe   :  { %v2070_v25 = vpop.permute.xlu1 %2069 }
0x2dbf   :  { %2074 = vst.msk [vmem:[#allocation2 + $0xe] sm:$0x1] %vm587_vm7, %v2070_v25 }
0x2dc2   :  { %v2208_v41 = vpop.permute.xlu1 %2207 }
0x2dc3   :  { %2212 = vst.msk [vmem:[#allocation2 + $0xa] sm:$0x1] %vm568_vm6, %v2208_v41  ;;  %v4939_v41 = vld [vmem:[#allocation10] ss:$0 sm:$0xff] }
0x2dc6   :  { %v2226_v28 = vpop.permute.xlu1 %2225 }
0x2dc7   :  { %2230 = vst.msk [vmem:[#allocation2 + $0xd] sm:$0x1] %vm587_vm7, %v2226_v28 }
0x2dca   :  { %v2364_v31 = vpop.permute.xlu1 %2363 }
0x2dcb   :  { %2368 = vst.msk [vmem:[#allocation2 + $0xb] sm:$0x1] %vm568_vm6, %v2364_v31 }
0x2dce   :  { %v2382_v33 = vpop.permute.xlu1 %2381 }
0x2dcf   :  { %2386 = vst.msk [vmem:[#allocation2 + $0xc] sm:$0x1] %vm587_vm7, %v2382_v33 }
0x2dd2   :  { %v2518_v35 = vpop.permute.xlu1 %2517 }
0x2dd3   :  { %2522 = vst.msk [vmem:[#allocation2 + $0xc] sm:$0x1] %vm568_vm6, %v2518_v35  ;;  %v4940_v35 = vld [vmem:[#allocation11] ss:$0 sm:$0xff] }
0x2dd6   :  { %v2536_v43 = vpop.permute.xlu1 %2535 }
0x2dd7   :  { %2540 = vst.msk [vmem:[#allocation2 + $0xb] sm:$0x1] %vm587_vm7, %v2536_v43 }
0x2dda   :  { %v2672_v38 = vpop.permute.xlu1 %2671 }
0x2ddb   :  { %2676 = vst.msk [vmem:[#allocation2 + $0xd] sm:$0x1] %vm568_vm6, %v2672_v38 }
0x2dde   :  { %v2690_v34 = vpop.permute.xlu1 %2689 }
0x2ddf   :  { %2694 = vst.msk [vmem:[#allocation2 + $0xa] sm:$0x1] %vm587_vm7, %v2690_v34 }
0x2de2   :  { %v2828_v39 = vpop.permute.xlu1 %2827 }
0x2de3   :  { %2832 = vst.msk [vmem:[#allocation2 + $0xe] sm:$0x1] %vm568_vm6, %v2828_v39 }
0x2de6   :  { %v2846_v44 = vpop.permute.xlu1 %2845 }
0x2de7   :  { %2850 = vst.msk [vmem:[#allocation2 + $0x9] sm:$0x1] %vm587_vm7, %v2846_v44  ;;  %v5992_v44 = vmov 0.0  }
0x2de8   :  { %5059 = vmatprep.subr.bf16.mxu1 %v5992_v44  ;;  %5047 = vmatprep.subr.bf16.mxu0 %v5992_v44 }
0x2de9   :  { %5049 = vmatprep.mubr.msk.bf16.mxu0 %vm5993_vm9, %v5992_v44 }
0x2e29   :  { %v2982_v45 = vpop.permute.xlu0 %2981 }
0x2e2a   :  { %2987 = vst.msk [vmem:[#allocation2 + $0x7] sm:$0x1] %vm568_vm6, %v2982_v45  ;;  %v3079_v45 = vld [vmem:[#allocation13] sm:$0x3] }
0x2e2b   :  { %v2984_v40 = vpop.permute.xlu1 %2983 }
0x2e2c   :  { %2988 = vst.msk [vmem:[#allocation2 + $0xf] sm:$0x1] %vm568_vm6, %v2984_v40  ;;  %v3084_v40 = vrot.slane %v3079_v45, %v6288_v30 }
0x2e2d   :  { %v3000_v47 = vpop.permute.xlu0 %2999 }
0x2e2e   :  { %3005 = vst.msk [vmem:[#allocation2] sm:$0x1] %vm587_vm7, %v3000_v47  ;;  %v3088_v47 = vrot.slane %v3079_v45, %v6284_v27 }
0x2e2f   :  { %v3002_v42 = vpop.permute.xlu1 %3001 }
0x2e30   :  { %3006 = vst.msk [vmem:[#allocation2 + $0x8] sm:$0x1] %vm587_vm7, %v3002_v42 }
0x2e35   :  { %v3007_v46 = vld [vmem:[#allocation2] sm:$0xff] }
0x2e36   :  { %v3011_v49 = vsel %vm1723_vm8, %v3007_v46, 0.0 }
0x2e37   :  { %3012 = vadd.xlane.f32.xlu0 %v3011_v49  ;;  %v3008_v11 = vld [vmem:[#allocation2 + $0x8] sm:$0xff] }
0x2e38   :  { %v3014_v51 = vsel %vm1723_vm8, %v3008_v11, 0.0 }
0x2e39   :  { %3015 = vadd.xlane.f32.xlu1 %v3014_v51 }
0x2ec4   :  { %v3013_v52 = vpop.xlane.xlu0 %3012 }
0x2ec5   :  { %v3018_v5 = vmul.f32 0.015625, %v3013_v52 }
0x2ec6   :  { %v3016_v53 = vpop.xlane.xlu1 %3015 }
0x2ec7   :  { %v3020_v54 = vsub.f32 %v3007_v46, %v3018_v5  ;;  %v3019_v55 = vmul.f32 0.015625, %v3016_v53 }
0x2ec9   :  { %v3021_v48 = vsub.f32 %v3008_v11, %v3019_v55  ;;  %v3022_v2 = vmul.f32 %v3020_v54, %v3020_v54 }
0x2ecb   :  { %v3024_v56 = vsel %vm1723_vm8, %v3022_v2, 0.0  ;;  %v3023_v26 = vmul.f32 %v3021_v48, %v3021_v48 }
0x2ecc   :  { %3025 = vadd.xlane.f32.xlu0 %v3024_v56 }
0x2ecd   :  { %v3027_v57 = vsel %vm1723_vm8, %v3023_v26, 0.0 }
0x2ed0   :  { %3028 = vadd.xlane.f32.xlu0 %v3027_v57 }
0x2f59   :  { %v3026_v14 = vpop.xlane.xlu0 %3025 }
0x2f5a   :  { %v3030_v15 = vmul.f32 0.015625, %v3026_v14 }
0x2f5c   :  { %v3032_v16 = vadd.f32 1e-05, %v3030_v15 }
0x2f5d   :  { %v3029_v36 = vpop.xlane.xlu0 %3028 }
0x2f5e   :  { %5438 = vrsqrt.f32 %v3032_v16  ;;  %v3031_v18 = vmul.f32 0.015625, %v3029_v36 }
0x2f60   :  { %v3033_v21 = vadd.f32 1e-05, %v3031_v18 }
0x2f62   :  { %5440 = vrsqrt.f32 %v3033_v21 }
0x2f68   :  { %v5439_v37 = vpop.eup %5438 }
0x2f69   :  { %v3036_v25 = vmul.f32 %v5439_v37, %v3020_v54 }
0x2f6b   :  { %v3044_v31 = vmul.f32 %v4939_v41, %v3036_v25 }
0x2f6c   :  { %v5441_v28 = vpop.eup %5440 }
0x2f6d   :  { %v3037_v33 = vmul.f32 %v5441_v28, %v3021_v48  ;;  %v7018_v38 = vadd.f32 %v4940_v35, %v3044_v31 }
0x2f6f   :  { %v3045_v43 = vmul.f32 %v4939_v41, %v3037_v33 }
0x2f71   :  { %v7020_v34 = vadd.f32 %v4940_v35, %v3045_v43 }
0x2f73   :  { %v3070_v39 = vpack.c.bf16 %v7020_v34, %v7018_v38 }
0x2f75   :  { %4941 = vmatmul.mubr.msk.bf16.vlgmr.msra.gmra.mrb[36].mxu1 %vm1723_vm8, %v3070_v39 }
0x2f76   :  { %5061 = vmatprep.mubr.msk.bf16.mxu1 %vm5993_vm9, %v5992_v44 }
0x3048   :  { %v3128_v42 = vpop.f32.mrb[36].mxu1 }
0x3049   :  { %v3129_v46 = vadd.f32 %v3128_v42, %v3084_v40  ;;  %v3130_v49 = vpop.f32.mrb[37].mxu1 }
0x304a   :  { %v3131_v11 = vadd.f32 %v3130_v49, %v3088_v47  ;;  %v3132_v51 = vpop.f32.mrb[38].mxu1 }
0x304b   :  { %v7033_v52 = vpack.c.bf16 %v3129_v46, %v3129_v46  ;;  %v3133_v5 = vadd.f32 %v3132_v51, %v3084_v40  ;;  %v3134_v53 = vpop.f32.mrb[39].mxu1 }
0x304c   :  { %v7035_v54 = vpack.c.bf16 %v3131_v11, %v3131_v11  ;;  %v3135_v55 = vadd.f32 %v3134_v53, %v3088_v47 }
0x304d   :  { %v7037_v48 = vpack.c.bf16 %v3133_v5, %v3133_v5  ;;  %3142 = vrot.lane.b32.xlu1 %v7033_v52, %s5989_s0 }
0x304e   :  { %v3270_v2 = vsel %vm380_vm0, %v7035_v54, 0  ;;  %v7054_v29 = vpack.c.bf16 %v3135_v55, %v3135_v55 }
0x304f   :  { %3192 = vrot.lane.b32.xlu0 %v7037_v48, %s5989_s0  ;;  %5060 = vmatpush3.bf16.msra.mxu1 %v3270_v2 }
0x3050   :  { %5071 = vmatprep.subr.bf16.mxu1 %v5992_v44  ;;  %v3316_v60 = vsel %vm380_vm0, %v7054_v29, 0 }
0x30bf   :  { %v3143_v56 = vpop.permute.xlu1 %3142 }
0x30c0   :  { %v3149_v26 = vsel %vm3144_vm10, %v3143_v56, 0 }
0x30c1   :  { %5048 = vmatpush3.bf16.xpose.msra.mxu0 %v3149_v26  ;;  %v3193_v57 = vpop.permute.xlu0 %3192 }
0x30c2   :  { %5053 = vmatprep.subr.bf16.mxu0 %v5992_v44  ;;  %v3198_v59 = vsel %vm3144_vm10, %v3193_v57, 0 }
0x30c8   :  { %5050 = vmatmul.mubr.msk.bf16.vlgmr.msra.gmra.mrb[36].mxu0 %vm3144_vm10, %v7033_v52 }
0x30c9   :  { %5054 = vmatpush3.bf16.xpose.msra.mxu0 %v3198_v59  ;;  %5055 = vmatprep.mubr.msk.bf16.mxu0 %vm5993_vm9, %v5992_v44 }
0x30ca   :  { %5065 = vmatprep.subr.bf16.mxu0 %v5992_v44 }
0x30d0   :  { %5056 = vmatmul.mubr.msk.bf16.vlgmr.msra.gmra.mrb[40].mxu0 %vm3144_vm10, %v7037_v48 }
0x30d1   :  { %5066 = vmatpush3.bf16.msra.mxu0 %v3316_v60  ;;  %5067 = vmatprep.mubr.msk.bf16.mxu0 %vm5993_vm9, %v5992_v44 }
0x30d2   :  { %5077 = vmatprep.subr.bf16.mxu0 %v5992_v44 }
0x319b   :  { %v3185_v3 = vpop.f32.mrb[36].mxu0 }
0x319c   :  { %v3240_v61 = vmul.f32 0.25, %v3185_v3  ;;  %v5051_v62 = vpop.f32.mrb[37].mxu0 }
0x319d   :  { %v3188_v7 = vpop.f32.mrb[38].mxu0 }
0x319e   :  { %v5052_v63 = vpop.f32.mrb[39].mxu0  ;;  %v3242_v22 = vsel %vm376_vm1, %v3240_v61, -inf }
0x319f   :  { %3243 = vmax.xlane.f32.xlu1 %v3242_v22 }
0x31a3   :  { %v3234_v50 = vpop.f32.mrb[40].mxu0 }
0x31a4   :  { %v3241_v0 = vmul.f32 0.25, %v3234_v50  ;;  %v5057_v32 = vpop.f32.mrb[41].mxu0 }
0x31a5   :  { %v3237_v1 = vpop.f32.mrb[42].mxu0 }
0x31a6   :  { %v5058_v6 = vpop.f32.mrb[43].mxu0  ;;  %v3245_v20 = vsel %vm376_vm1, %v3241_v0, -inf }
0x31a7   :  { %3246 = vmax.xlane.f32.xlu0 %v3245_v20 }
0x31b0   :  { %3360 = vrot.lane.b32.xlu1 %v7033_v52, %s5994_s7 }
0x322c   :  { %v3244_v58 = vpop.xlane.xlu1 %3243 }
0x322d   :  { %v3248_v17 = vsub.f32 %v3240_v61, %v3244_v58 }
0x322f   :  { %v3250_v8 = vmul.f32 1.442695, %v3248_v17 }
0x3230   :  { %v3361_v15 = vpop.permute.xlu1 %3360 }
0x3231   :  { %5442 = vpow2.f32 %v3250_v8  ;;  %v3366_v25 = vsel %vm3144_vm10, %v3361_v15, 0 }
0x3234   :  { %v3247_v9 = vpop.xlane.xlu0 %3246 }
0x3235   :  { %v3249_v10 = vsub.f32 %v3241_v0, %v3247_v9 }
0x3237   :  { %v3252_v19 = vmul.f32 1.442695, %v3249_v10 }
0x3239   :  { %5444 = vpow2.f32 %v3252_v19 }
0x323b   :  { %v5443_v4 = vpop.eup %5442 }
0x323c   :  { %v3254_v12 = vsel %vm376_vm1, %v5443_v4, 0.0 }
0x323d   :  { %3255 = vadd.xlane.f32.xlu1 %v3254_v12 }
0x3243   :  { %v5445_v13 = vpop.eup %5444 }
0x3244   :  { %v3257_v14 = vsel %vm376_vm1, %v5445_v13, 0.0 }
0x3245   :  { %3258 = vadd.xlane.f32.xlu0 %v3257_v14 }
0x324e   :  { %3358 = vrot.lane.b32.xlu1 %v7033_v52, %s5995_s20 }
0x3252   :  { %3408 = vrot.lane.b32.xlu1 %v7037_v48, %s5995_s20 }
0x325b   :  { %3410 = vrot.lane.b32.xlu0 %v7037_v48, %s5994_s7 }
0x32ca   :  { %v3256_v16 = vpop.xlane.xlu1 %3255 }
0x32cb   :  { %5446 = vrcp.f32 %v3256_v16 }
0x32ce   :  { %v3359_v35 = vpop.permute.xlu1 %3358 }
0x32d2   :  { %v3259_v36 = vpop.xlane.xlu0 %3258  ;;  %v3409_v39 = vpop.permute.xlu1 %3408 }
0x32d3   :  { %5448 = vrcp.f32 %v3259_v36 }
0x32d5   :  { %v5447_v18 = vpop.eup %5446 }
0x32d6   :  { %v3262_v21 = vmul.f32 %v5447_v18, %v5443_v4  ;;  %v3411_v31 = vpop.permute.xlu0 %3410 }
0x32d7   :  { %v3416_v43 = vsel %vm3144_vm10, %v3411_v31, 0 }
0x32d8   :  { %v3264_v37 = vpack.c.bf16 %v3262_v21, %v3262_v21 }
0x32da   :  { %5062 = vmatmul.mubr.msk.bf16.vlgmr.msra.gmra.mrb[40].mxu1 %vm376_vm1, %v3264_v37 }
0x32db   :  { %5072 = vmatpush3.bf16.xpose.msra.mxu1 %v3366_v25  ;;  %5073 = vmatprep.mubr.msk.bf16.mxu1 %vm5993_vm9, %v5992_v44 }
0x32dc   :  { %5083 = vmatprep.subr.bf16.mxu1 %v5992_v44 }
0x32dd   :  { %v5449_v41 = vpop.eup %5448 }
0x32de   :  { %v3263_v28 = vmul.f32 %v5449_v41, %v5445_v13 }
0x32e0   :  { %v3265_v33 = vpack.c.bf16 %v3263_v28, %v3263_v28 }
0x32e2   :  { %5068 = vmatmul.mubr.msk.bf16.vlgmr.msra.gmra.mrb[44].mxu0 %vm376_vm1, %v3265_v33  ;;  %5074 = vmatmul.mubr.msk.bf16.vlgmr.msra.gmra.mrb[44].mxu1 %vm3144_vm10, %v3359_v35 }
0x32e3   :  { %5078 = vmatpush3.bf16.xpose.msra.mxu0 %v3416_v43  ;;  %5079 = vmatprep.mubr.msk.bf16.mxu0 %vm5993_vm9, %v5992_v44 }
0x32e4   :  { %5089 = vmatprep.subr.bf16.mxu0 %v5992_v44  ;;  %5085 = vmatprep.mubr.msk.bf16.mxu1 %vm5993_vm9, %v5992_v44 }
0x32ea   :  { %5080 = vmatmul.mubr.msk.bf16.vlgmr.msra.gmra.mrb[48].mxu0 %vm3144_vm10, %v3409_v39 }
0x32eb   :  { %5091 = vmatprep.mubr.msk.bf16.mxu0 %vm5993_vm9, %v5992_v44 }
0x33ad   :  { %v7091_v45 = vpop.f32.mrb[40].mxu1 }
0x33ae   :  { %v5063_v40 = vpop.f32.mrb[41].mxu1 }
0x33af   :  { %v3309_v47 = vpop.f32.mrb[42].mxu1 }
0x33b0   :  { %v5064_v42 = vpop.f32.mrb[43].mxu1 }
0x33b5   :  { %v7093_v46 = vpop.f32.mrb[44].mxu0  ;;  %v3402_v49 = vpop.f32.mrb[44].mxu1 }
0x33b6   :  { %v3458_v11 = vmul.f32 0.25, %v3402_v49  ;;  %v5069_v51 = vpop.f32.mrb[45].mxu0  ;;  %v5075_v5 = vpop.f32.mrb[45].mxu1 }
0x33b7   :  { %v3355_v53 = vpop.f32.mrb[46].mxu0  ;;  %v3405_v55 = vpop.f32.mrb[46].mxu1 }
0x33b8   :  { %v5070_v2 = vpop.f32.mrb[47].mxu0  ;;  %v5076_v56 = vpop.f32.mrb[47].mxu1  ;;  %v3460_v26 = vsel %vm376_vm1, %v3458_v11, -inf }
0x33b9   :  { %3461 = vmax.xlane.f32.xlu0 %v3460_v26 }
0x33bd   :  { %v3452_v57 = vpop.f32.mrb[48].mxu0 }
0x33be   :  { %v3459_v59 = vmul.f32 0.25, %v3452_v57  ;;  %v5081_v60 = vpop.f32.mrb[49].mxu0 }
0x33bf   :  { %v3455_v3 = vpop.f32.mrb[50].mxu0 }
0x33c0   :  { %v5082_v61 = vpop.f32.mrb[51].mxu0  ;;  %v3463_v62 = vsel %vm376_vm1, %v3459_v59, -inf }
0x33c1   :  { %3464 = vmax.xlane.f32.xlu1 %v3463_v62 }
0x33d2   :  { %3485 = vrot.lane.b32.xlu1 %v7035_v54, %s5995_s20 }
0x33d6   :  { %3584 = vrot.lane.b32.xlu1 %v7033_v52, %s5990_s21 }
0x33da   :  { %3634 = vrot.lane.b32.xlu1 %v7037_v48, %s5990_s21 }
0x33de   :  { %3632 = vrot.lane.b32.xlu1 %v7037_v48, %s5996_s5 }
0x3446   :  { %v3462_v7 = vpop.xlane.xlu0 %3461 }
0x3447   :  { %v3466_v63 = vsub.f32 %v3458_v11, %v3462_v7 }
0x3449   :  { %v3468_v22 = vmul.f32 1.442695, %v3466_v63 }
0x344b   :  { %5450 = vpow2.f32 %v3468_v22 }
0x344e   :  { %v3465_v50 = vpop.xlane.xlu1 %3464 }
0x344f   :  { %v3467_v0 = vsub.f32 %v3459_v59, %v3465_v50 }
0x3451   :  { %v3470_v32 = vmul.f32 1.442695, %v3467_v0 }
0x3452   :  { %v3486_v1 = vpop.permute.xlu1 %3485 }
0x3453   :  { %5452 = vpow2.f32 %v3470_v32  ;;  %v3491_v6 = vsel %vm380_vm0, %v3486_v1, 0 }
0x3454   :  { %5084 = vmatpush3.bf16.msra.mxu1 %v3491_v6 }
0x3455   :  { %v5451_v20 = vpop.eup %5450  ;;  %5095 = vmatprep.subr.bf16.mxu1 %v5992_v44 }
0x3456   :  { %v3472_v58 = vsel %vm376_vm1, %v5451_v20, 0.0  ;;  %v3585_v13 = vpop.permute.xlu1 %3584 }
0x3457   :  { %3473 = vadd.xlane.f32.xlu0 %v3472_v58  ;;  %v3590_v16 = vsel %vm3144_vm10, %v3585_v13, 0 }
0x345a   :  { %v3635_v21 = vpop.permute.xlu1 %3634 }
0x345b   :  { %v3640_v41 = vsel %vm3144_vm10, %v3635_v21, 0 }
0x345d   :  { %v5453_v17 = vpop.eup %5452 }
0x345e   :  { %v3475_v8 = vsel %vm376_vm1, %v5453_v17, 0.0  ;;  %v3633_v28 = vpop.permute.xlu1 %3632 }
0x345f   :  { %3476 = vadd.xlane.f32.xlu0 %v3475_v8 }
0x3475   :  { %3534 = vrot.lane.b32.xlu0 %v7054_v29, %s5995_s20 }
0x3479   :  { %3582 = vrot.lane.b32.xlu0 %v7033_v52, %s5996_s5 }
0x34e4   :  { %v3474_v9 = vpop.xlane.xlu0 %3473 }
0x34e5   :  { %5454 = vrcp.f32 %v3474_v9 }
0x34ec   :  { %v3477_v10 = vpop.xlane.xlu0 %3476 }
0x34ed   :  { %5456 = vrcp.f32 %v3477_v10 }
0x34ef   :  { %v5455_v19 = vpop.eup %5454 }
0x34f0   :  { %v3480_v4 = vmul.f32 %v5455_v19, %v5451_v20  ;;  %v3535_v12 = vpop.permute.xlu0 %3534 }
0x34f1   :  { %v3540_v14 = vsel %vm380_vm0, %v3535_v12, 0 }
0x34f2   :  { %5090 = vmatpush3.bf16.msra.mxu0 %v3540_v14  ;;  %v3482_v15 = vpack.c.bf16 %v3480_v4, %v3480_v4 }
0x34f3   :  { %5101 = vmatprep.subr.bf16.mxu0 %v5992_v44 }
0x34f4   :  { %5086 = vmatmul.mubr.msk.bf16.vlgmr.msra.gmra.mrb[48].mxu1 %vm376_vm1, %v3482_v15  ;;  %v3583_v25 = vpop.permute.xlu0 %3582 }
0x34f5   :  { %5096 = vmatpush3.bf16.xpose.msra.mxu1 %v3590_v16  ;;  %5097 = vmatprep.mubr.msk.bf16.mxu1 %vm5993_vm9, %v5992_v44 }
0x34f6   :  { %5107 = vmatprep.subr.bf16.mxu1 %v5992_v44 }
0x34f7   :  { %v5457_v36 = vpop.eup %5456 }
0x34f8   :  { %v3481_v18 = vmul.f32 %v5457_v36, %v5453_v17 }
0x34fa   :  { %v3483_v37 = vpack.c.bf16 %v3481_v18, %v3481_v18 }
0x34fc   :  { %5092 = vmatmul.mubr.msk.bf16.vlgmr.msra.gmra.mrb[52].mxu0 %vm376_vm1, %v3483_v37  ;;  %5098 = vmatmul.mubr.msk.bf16.vlgmr.msra.gmra.mrb[52].mxu1 %vm3144_vm10, %v3583_v25 }
0x34fd   :  { %5102 = vmatpush3.bf16.xpose.msra.mxu0 %v3640_v41  ;;  %5103 = vmatprep.mubr.msk.bf16.mxu0 %vm5993_vm9, %v5992_v44 }
0x34fe   :  { %5113 = vmatprep.subr.bf16.mxu0 %v5992_v44  ;;  %5109 = vmatprep.mubr.msk.bf16.mxu1 %vm5993_vm9, %v5992_v44 }
0x3504   :  { %5104 = vmatmul.mubr.msk.bf16.vlgmr.msra.gmra.mrb[56].mxu0 %vm3144_vm10, %v3633_v28 }
0x3505   :  { %5115 = vmatprep.mubr.msk.bf16.mxu0 %vm5993_vm9, %v5992_v44 }
0x35c7   :  { %v7131_v31 = vpop.f32.mrb[48].mxu1 }
0x35c8   :  { %v5087_v33 = vpop.f32.mrb[49].mxu1 }
0x35c9   :  { %v3530_v35 = vpop.f32.mrb[50].mxu1 }
0x35ca   :  { %v5088_v43 = vpop.f32.mrb[51].mxu1 }
0x35cf   :  { %v7133_v39 = vpop.f32.mrb[52].mxu0  ;;  %v3626_v40 = vpop.f32.mrb[52].mxu1 }
0x35d0   :  { %v5293_v47 = vpack.i.bf16 %v7133_v39, %v7131_v31  ;;  %v3682_v42 = vmul.f32 0.25, %v3626_v40  ;;  %v5093_v49 = vpop.f32.mrb[53].mxu0  ;;  %v5099_v11 = vpop.f32.mrb[53].mxu1 }
0x35d1   :  { %v3579_v51 = vpop.f32.mrb[54].mxu0  ;;  %v3629_v5 = vpop.f32.mrb[54].mxu1 }
0x35d2   :  { %v5094_v53 = vpop.f32.mrb[55].mxu0  ;;  %v5100_v55 = vpop.f32.mrb[55].mxu1  ;;  %v3684_v2 = vsel %vm376_vm1, %v3682_v42, -inf }
0x35d3   :  { %3685 = vmax.xlane.f32.xlu0 %v3684_v2 }
0x35d7   :  { %v3676_v56 = vpop.f32.mrb[56].mxu0 }
0x35d8   :  { %v3683_v26 = vmul.f32 0.25, %v3676_v56  ;;  %v5105_v57 = vpop.f32.mrb[57].mxu0 }
0x35d9   :  { %v3679_v59 = vpop.f32.mrb[58].mxu0 }
0x35da   :  { %v5106_v60 = vpop.f32.mrb[59].mxu0  ;;  %v3687_v3 = vsel %vm376_vm1, %v3683_v26, -inf }
0x35db   :  { %3688 = vmax.xlane.f32.xlu1 %v3687_v3 }
0x35ec   :  { %3708 = vrot.lane.b32.xlu1 %v7035_v54, %s5996_s5 }
0x35f0   :  { %3806 = vrot.lane.b32.xlu1 %v7033_v52, %s5997_s11 }
0x35f4   :  { %3856 = vrot.lane.b32.xlu1 %v7037_v48, %s5997_s11 }
0x35f8   :  { %3854 = vrot.lane.b32.xlu1 %v7037_v48, %s5998_s16 }
0x3660   :  { %v3686_v61 = vpop.xlane.xlu0 %3685 }
0x3661   :  { %v3690_v62 = vsub.f32 %v3682_v42, %v3686_v61 }
0x3663   :  { %v3692_v7 = vmul.f32 1.442695, %v3690_v62 }
0x3665   :  { %5458 = vpow2.f32 %v3692_v7 }
0x3668   :  { %v3689_v63 = vpop.xlane.xlu1 %3688 }
0x3669   :  { %v3691_v22 = vsub.f32 %v3683_v26, %v3689_v63 }
0x366b   :  { %v3694_v50 = vmul.f32 1.442695, %v3691_v22 }
0x366c   :  { %v3709_v0 = vpop.permute.xlu1 %3708 }
0x366d   :  { %5460 = vpow2.f32 %v3694_v50  ;;  %v3714_v32 = vsel %vm380_vm0, %v3709_v0, 0 }
0x366e   :  { %5108 = vmatpush3.bf16.msra.mxu1 %v3714_v32 }
0x366f   :  { %v5459_v1 = vpop.eup %5458  ;;  %5119 = vmatprep.subr.bf16.mxu1 %v5992_v44 }
0x3670   :  { %v3696_v6 = vsel %vm376_vm1, %v5459_v1, 0.0  ;;  %v3807_v19 = vpop.permute.xlu1 %3806 }
0x3671   :  { %3697 = vadd.xlane.f32.xlu0 %v3696_v6  ;;  %v3812_v13 = vsel %vm3144_vm10, %v3807_v19, 0  ;;  %v4058_v19 = vld [vmem:[%s7371_s12 + $0x8] sm:$0xff] }
0x3674   :  { %v3857_v15 = vpop.permute.xlu1 %3856 }
0x3675   :  { %v3862_v18 = vsel %vm3144_vm10, %v3857_v15, 0  ;;  %v4062_v15 = vld [vmem:[%s7371_s12 + $0x28] sm:$0xff] }
0x3677   :  { %v5461_v20 = vpop.eup %5460 }
0x3678   :  { %v3699_v48 = vsel %vm376_vm1, %v5461_v20, 0.0  ;;  %v3855_v21 = vpop.permute.xlu1 %3854 }
0x3679   :  { %3700 = vadd.xlane.f32.xlu0 %v3699_v48 }
0x368f   :  { %3756 = vrot.lane.b32.xlu0 %v7054_v29, %s5996_s5 }
0x3693   :  { %3804 = vrot.lane.b32.xlu0 %v7033_v52, %s5998_s16 }
0x36fe   :  { %v3698_v58 = vpop.xlane.xlu0 %3697 }
0x36ff   :  { %5462 = vrcp.f32 %v3698_v58 }
0x3706   :  { %v3701_v17 = vpop.xlane.xlu0 %3700 }
0x3707   :  { %5464 = vrcp.f32 %v3701_v17 }
0x3709   :  { %v5463_v8 = vpop.eup %5462 }
0x370a   :  { %v3704_v9 = vmul.f32 %v5463_v8, %v5459_v1  ;;  %v3757_v10 = vpop.permute.xlu0 %3756 }
0x370b   :  { %v3762_v4 = vsel %vm380_vm0, %v3757_v10, 0  ;;  %v4057_v10 = vld [vmem:[%s7371_s12] sm:$0xff] }
0x370c   :  { %5114 = vmatpush3.bf16.msra.mxu0 %v3762_v4  ;;  %v3706_v12 = vpack.c.bf16 %v3704_v9, %v3704_v9  ;;  %v4059_v4 = vld [vmem:[%s7371_s12 + $0x10] sm:$0xff] }
0x370d   :  { %5125 = vmatprep.subr.bf16.mxu0 %v5992_v44 }
0x370e   :  { %5110 = vmatmul.mubr.msk.bf16.vlgmr.msra.gmra.mrb[56].mxu1 %vm376_vm1, %v3706_v12  ;;  %v3805_v36 = vpop.permute.xlu0 %3804  ;;  %v4066_v12 = vpack.c.bf16 %v4058_v19, %v4057_v10  ;;  %v4168_v10 = vld [vmem:[#allocation19 + $0x8] sm:$0xff] }
0x370f   :  { %5120 = vmatpush3.bf16.xpose.msra.mxu1 %v3812_v13  ;;  %5121 = vmatprep.mubr.msk.bf16.mxu1 %vm5993_vm9, %v5992_v44  ;;  %v4060_v13 = vld [vmem:[%s7371_s12 + $0x18] sm:$0xff] }
0x3710   :  { %5131 = vmatprep.subr.bf16.mxu1 %v5992_v44 }
0x3711   :  { %v5465_v52 = vpop.eup %5464 }
0x3712   :  { %v3705_v14 = vmul.f32 %v5465_v52, %v5461_v20  ;;  %v4067_v52 = vpack.c.bf16 %v4060_v13, %v4059_v4  ;;  %v4169_v4 = vld [vmem:[#allocation19 + $0x10] sm:$0xff] }
0x3714   :  { %v3707_v16 = vpack.c.bf16 %v3705_v14, %v3705_v14  ;;  %v4061_v14 = vld [vmem:[%s7371_s12 + $0x20] sm:$0xff] }
0x3716   :  { %5116 = vmatmul.mubr.msk.bf16.vlgmr.msra.gmra.mrb[60].mxu0 %vm376_vm1, %v3707_v16  ;;  %5122 = vmatmul.mubr.msk.bf16.vlgmr.msra.gmra.mrb[60].mxu1 %vm3144_vm10, %v3805_v36  ;;  %v4068_v16 = vpack.c.bf16 %v4062_v15, %v4061_v14  ;;  %v4063_v36 = vld [vmem:[%s7371_s12 + $0x30] sm:$0xff]  ;;  %v4172_v14 = vld [vmem:[#allocation19 + $0x28] sm:$0xff] }
0x3717   :  { %5126 = vmatpush3.bf16.xpose.msra.mxu0 %v3862_v18  ;;  %5127 = vmatprep.mubr.msk.bf16.mxu0 %vm5993_vm9, %v5992_v44  ;;  %v4064_v18 = vld [vmem:[%s7371_s12 + $0x38] sm:$0xff] }
0x3718   :  { %5137 = vmatprep.subr.bf16.mxu0 %v5992_v44  ;;  %5133 = vmatprep.mubr.msk.bf16.mxu1 %vm5993_vm9, %v5992_v44 }
0x371e   :  { %5128 = vmatmul.mubr.msk.bf16.vlgmr.msra.gmra.mrb[64].mxu0 %vm3144_vm10, %v3855_v21  ;;  %v4069_v21 = vpack.c.bf16 %v4064_v18, %v4063_v36  ;;  %v4174_v36 = vld [vmem:[#allocation19 + $0x38] sm:$0xff] }
0x371f   :  { %5139 = vmatprep.mubr.msk.bf16.mxu0 %vm5993_vm9, %v5992_v44 }
0x37e1   :  { %v3750_v37 = vpop.f32.mrb[56].mxu1 }
0x37e2   :  { %v5111_v25 = vpop.f32.mrb[57].mxu1 }
0x37e3   :  { %v3753_v41 = vpop.f32.mrb[58].mxu1 }
0x37e4   :  { %v5112_v28 = vpop.f32.mrb[59].mxu1 }
0x37e9   :  { %v3798_v33 = vpop.f32.mrb[60].mxu0  ;;  %v3848_v35 = vpop.f32.mrb[60].mxu1 }
0x37ea   :  { %v5298_v43 = vpack.i.bf16 %v3798_v33, %v3750_v37  ;;  %v3904_v40 = vmul.f32 0.25, %v3848_v35  ;;  %v5117_v42 = vpop.f32.mrb[61].mxu0  ;;  %v5123_v49 = vpop.f32.mrb[61].mxu1 }
0x37eb   :  { %v3801_v11 = vpop.f32.mrb[62].mxu0  ;;  %v3851_v51 = vpop.f32.mrb[62].mxu1 }
0x37ec   :  { %v5118_v5 = vpop.f32.mrb[63].mxu0  ;;  %v5124_v53 = vpop.f32.mrb[63].mxu1  ;;  %v3906_v55 = vsel %vm376_vm1, %v3904_v40, -inf }
0x37ed   :  { %3907 = vmax.xlane.f32.xlu0 %v3906_v55 }
0x37f1   :  { %v3898_v2 = vpop.f32.mrb[64].mxu0 }
0x37f2   :  { %v3905_v56 = vmul.f32 0.25, %v3898_v2  ;;  %v5129_v26 = vpop.f32.mrb[65].mxu0 }
0x37f3   :  { %v3901_v57 = vpop.f32.mrb[66].mxu0 }
0x37f4   :  { %v5130_v59 = vpop.f32.mrb[67].mxu0  ;;  %v3909_v60 = vsel %vm376_vm1, %v3905_v56, -inf }
0x37f5   :  { %3910 = vmax.xlane.f32.xlu1 %v3909_v60 }
0x3806   :  { %3930 = vrot.lane.b32.xlu1 %v7035_v54, %s5998_s16 }
0x380a   :  { %5294 = vrot.lane.b32.xlu1 %v5293_v47, %s5997_s11 }
0x380e   :  { %5299 = vrot.lane.b32.xlu1 %v5298_v43, %s5990_s21 }
0x387a   :  { %v3908_v3 = vpop.xlane.xlu0 %3907 }
0x387b   :  { %v3912_v61 = vsub.f32 %v3904_v40, %v3908_v3 }
0x387d   :  { %v3914_v62 = vmul.f32 1.442695, %v3912_v61 }
0x387f   :  { %5466 = vpow2.f32 %v3914_v62 }
0x3882   :  { %v3911_v7 = vpop.xlane.xlu1 %3910 }
0x3883   :  { %v3913_v63 = vsub.f32 %v3905_v56, %v3911_v7 }
0x3885   :  { %v3916_v22 = vmul.f32 1.442695, %v3913_v63  ;;  %v4958_v63 = vld [vmem:[#allocation14] ss:$0 sm:$0xff] }
0x3886   :  { %v3931_v50 = vpop.permute.xlu1 %3930 }
0x3887   :  { %5468 = vpow2.f32 %v3916_v22  ;;  %v3936_v0 = vsel %vm380_vm0, %v3931_v50, 0 }
0x3888   :  { %5132 = vmatpush3.bf16.msra.mxu1 %v3936_v0 }
0x3889   :  { %v5467_v54 = vpop.eup %5466  ;;  %5143 = vmatprep.subr.bf16.mxu1 %v5992_v44 }
0x388a   :  { %v3918_v31 = vsel %vm376_vm1, %v5467_v54, 0.0  ;;  %v5295_v49 = vpop.permute.xlu1 %5294 }
0x388b   :  { %3919 = vadd.xlane.f32.xlu0 %v3918_v31  ;;  %v5297_v51 = vunpack.i.h.bf16 %v5295_v49  ;;  %v5296_v5 = vunpack.i.l.bf16 %v5295_v49 }
0x388d   :  { %v4051_v56 = vsel %vm3144_vm10, %v7093_v46, %v5297_v51  ;;  %v4050_v26 = vsel %vm3144_vm10, %v7091_v45, %v5296_v5  ;;  %v4961_v51 = vld [vmem:[#allocation17] ss:$0 sm:$0xff] }
0x388e   :  { %v5300_v11 = vpop.permute.xlu1 %5299 }
0x388f   :  { %v5302_v53 = vunpack.i.h.bf16 %v5300_v11  ;;  %v5301_v55 = vunpack.i.l.bf16 %v5300_v11 }
0x3891   :  { %v5469_v39 = vpop.eup %5468  ;;  %v4052_v60 = vsel %vm434_vm5, %v4050_v26, %v5301_v55  ;;  %v4053_v3 = vsel %vm434_vm5, %v4051_v56, %v5302_v53  ;;  %v4249_v56 = vld [vmem:[%s7372_s9] sm:$0xff]  ;;  %v4250_v26 = vld [vmem:[%s7372_s9 + $0x8] sm:$0xff] }
0x3892   :  { %v3921_v47 = vsel %vm376_vm1, %v5469_v39, 0.0 }
0x3893   :  { %3922 = vadd.xlane.f32.xlu0 %v3921_v47 }
0x38a9   :  { %3978 = vrot.lane.b32.xlu0 %v7054_v29, %s5998_s16 }
0x3918   :  { %v3920_v32 = vpop.xlane.xlu0 %3919 }
0x3919   :  { %5470 = vrcp.f32 %v3920_v32 }
0x3920   :  { %v3923_v1 = vpop.xlane.xlu0 %3922 }
0x3921   :  { %5472 = vrcp.f32 %v3923_v1 }
0x3923   :  { %v5471_v6 = vpop.eup %5470 }
0x3924   :  { %v3926_v20 = vmul.f32 %v5471_v6, %v5467_v54  ;;  %v3979_v48 = vpop.permute.xlu0 %3978 }
0x3925   :  { %v3984_v58 = vsel %vm380_vm0, %v3979_v48, 0 }
0x3926   :  { %5138 = vmatpush3.bf16.msra.mxu0 %v3984_v58  ;;  %v3928_v17 = vpack.c.bf16 %v3926_v20, %v3926_v20 }
0x3927   :  { %5155 = vmatprep.subr.bf16.mxu0 %v5992_v44 }
0x3928   :  { %5134 = vmatmul.mubr.msk.bf16.vlgmr.msra.gmra.mrb[64].mxu1 %vm376_vm1, %v3928_v17 }
0x3929   :  { %5151 = vmatprep.mubr.msk.bf16.mxu1 %vm5993_vm9, %v5992_v44  ;;  %5144 = vmatpush3.bf16.msra.mxu1 %v4066_v12  ;;  %v4170_v12 = vld [vmem:[#allocation19 + $0x18] sm:$0xff] }
0x392a   :  { %5145 = vmatprep.subr.bf16.mxu1 %v5992_v44  ;;  %v4177_v13 = vpack.c.bf16 %v4170_v12, %v4169_v4 }
0x392b   :  { %v5473_v29 = vpop.eup %5472 }
0x392c   :  { %v3927_v8 = vmul.f32 %v5473_v29, %v5469_v39 }
0x392d   :  { %5146 = vmatpush3.bf16.msra.mxu1 %v4067_v52  ;;  %v4171_v52 = vld [vmem:[#allocation19 + $0x20] sm:$0xff] }
0x392e   :  { %v3929_v9 = vpack.c.bf16 %v3927_v8, %v3927_v8  ;;  %5147 = vmatprep.subr.bf16.mxu1 %v5992_v44  ;;  %v4178_v15 = vpack.c.bf16 %v4172_v14, %v4171_v52 }
0x3930   :  { %5140 = vmatmul.mubr.msk.bf16.vlgmr.msra.gmra.mrb[68].mxu0 %vm376_vm1, %v3929_v9 }
0x3931   :  { %5163 = vmatprep.mubr.msk.bf16.mxu0 %vm5993_vm9, %v5992_v44  ;;  %5148 = vmatpush3.bf16.msra.mxu1 %v4068_v16  ;;  %v4173_v16 = vld [vmem:[#allocation19 + $0x30] sm:$0xff] }
0x3932   :  { %5149 = vmatprep.subr.bf16.mxu1 %v5992_v44  ;;  %v4179_v18 = vpack.c.bf16 %v4174_v36, %v4173_v16 }
0x3935   :  { %5150 = vmatpush3.bf16.msra.mxu1 %v4069_v21 }
0x3936   :  { %5167 = vmatprep.subr.bf16.mxu1 %v5992_v44 }
0x39fb   :  { %v3972_v37 = vpop.f32.mrb[64].mxu1 }
0x39fc   :  { %v5135_v25 = vpop.f32.mrb[65].mxu1 }
0x39fd   :  { %v3975_v41 = vpop.f32.mrb[66].mxu1 }
0x39fe   :  { %v5136_v28 = vpop.f32.mrb[67].mxu1 }
0x3a03   :  { %v4020_v33 = vpop.f32.mrb[68].mxu0 }
0x3a04   :  { %v5303_v35 = vpack.i.bf16 %v4020_v33, %v3972_v37  ;;  %v5141_v43 = vpop.f32.mrb[69].mxu0 }
0x3a05   :  { %v4023_v40 = vpop.f32.mrb[70].mxu0  ;;  %v4960_v43 = vld [vmem:[#allocation16] ss:$0 sm:$0xff] }
0x3a06   :  { %5304 = vrot.lane.b32.xlu0 %v5303_v35, %s5994_s7  ;;  %v5142_v42 = vpop.f32.mrb[71].mxu0 }
0x3a78   :  { %v5305_v2 = vpop.permute.xlu0 %5304 }
0x3a79   :  { %v5307_v57 = vunpack.i.h.bf16 %v5305_v2  ;;  %v5306_v59 = vunpack.i.l.bf16 %v5305_v2 }
0x3a7b   :  { %v4056_v61 = vsel %vm4054_vm11, %v4053_v3, %v5307_v57  ;;  %v4055_v62 = vsel %vm4054_vm11, %v4052_v60, %v5306_v59  ;;  %v4266_v57 = vpack.c.bf16 %v4250_v26, %v4249_v56  ;;  %v4251_v59 = vld [vmem:[%s7372_s9 + $0x10] sm:$0xff]  ;;  %v4252_v60 = vld [vmem:[%s7372_s9 + $0x18] sm:$0xff] }
0x3a7c   :  { %v4065_v7 = vpack.c.bf16 %v4056_v61, %v4055_v62  ;;  %v4267_v3 = vpack.c.bf16 %v4252_v60, %v4251_v59  ;;  %v4253_v61 = vld [vmem:[%s7372_s9 + $0x20] sm:$0xff]  ;;  %v4254_v62 = vld [vmem:[%s7372_s9 + $0x28] sm:$0xff] }
0x3a7e   :  { %5152 = vmatmul.mubr.msk.bf16.vlgmr.msra.gmra.mrb[68].mxu1 %vm1723_vm8, %v4065_v7  ;;  %v4268_v7 = vpack.c.bf16 %v4254_v62, %v4253_v61 }
0x3a7f   :  { %5183 = vmatprep.mubr.msk.bf16.mxu1 %vm5993_vm9, %v5992_v44  ;;  %5168 = vmatpush3.bf16.msra.mxu1 %v4266_v57 }
0x3a80   :  { %5169 = vmatprep.subr.bf16.mxu1 %v5992_v44 }
0x3a83   :  { %5170 = vmatpush3.bf16.msra.mxu1 %v4267_v3 }
0x3a84   :  { %5171 = vmatprep.subr.bf16.mxu1 %v5992_v44 }
0x3a87   :  { %5172 = vmatpush3.bf16.msra.mxu1 %v4268_v7 }
0x3a88   :  { %5173 = vmatprep.subr.bf16.mxu1 %v5992_v44 }
0x3b51   :  { %v4114_v22 = vpop.f32.mrb[68].mxu1 }
0x3b52   :  { %v4115_v46 = vadd.f32 %v4958_v63, %v4114_v22  ;;  %v5153_v50 = vpop.f32.mrb[69].mxu1  ;;  %v4256_v22 = vld [vmem:[%s7372_s9 + $0x38] sm:$0xff] }
0x3b53   :  { %v4117_v0 = vpop.f32.mrb[70].mxu1  ;;  %v4257_v50 = vld [vmem:[%s7372_s9 + $0x40] sm:$0xff] }
0x3b54   :  { %v4121_v45 = vadd.f32 %v4115_v46, %v7018_v38  ;;  %v4118_v54 = vadd.f32 %v4958_v63, %v4117_v0  ;;  %v5154_v31 = vpop.f32.mrb[71].mxu1  ;;  %v4255_v63 = vld [vmem:[%s7372_s9 + $0x30] sm:$0xff]  ;;  %v4258_v0 = vld [vmem:[%s7372_s9 + $0x48] sm:$0xff] }
0x3b55   :  { %v4269_v46 = vpack.c.bf16 %v4256_v22, %v4255_v63  ;;  %v4260_v31 = vld [vmem:[%s7372_s9 + $0x58] sm:$0xff] }
0x3b56   :  { %v4122_v39 = vadd.f32 %v4118_v54, %v7020_v34  ;;  %v4125_v47 = vsel %vm1723_vm8, %v4121_v45, 0.0  ;;  %v4167_v34 = vld [vmem:[#allocation19] sm:$0xff] }
0x3b57   :  { %4126 = vadd.xlane.f32.xlu1 %v4125_v47  ;;  %v4176_v19 = vpack.c.bf16 %v4168_v10, %v4167_v34  ;;  %5174 = vmatpush3.bf16.msra.mxu1 %v4269_v46  ;;  %v4259_v54 = vld [vmem:[%s7372_s9 + $0x50] sm:$0xff]  ;;  %v4261_v47 = vld [vmem:[%s7372_s9 + $0x60] sm:$0xff] }
0x3b58   :  { %v4128_v32 = vsel %vm1723_vm8, %v4122_v39, 0.0  ;;  %5175 = vmatprep.subr.bf16.mxu1 %v5992_v44 }
0x3b59   :  { %4129 = vadd.xlane.f32.xlu0 %v4128_v32  ;;  %5156 = vmatpush3.bf16.msra.mxu0 %v4176_v19  ;;  %v4262_v32 = vld [vmem:[%s7372_s9 + $0x68] sm:$0xff] }
0x3b5a   :  { %5157 = vmatprep.subr.bf16.mxu0 %v5992_v44 }
0x3b5d   :  { %5158 = vmatpush3.bf16.msra.mxu0 %v4177_v13 }
0x3b5e   :  { %5159 = vmatprep.subr.bf16.mxu0 %v5992_v44 }
0x3b61   :  { %5160 = vmatpush3.bf16.msra.mxu0 %v4178_v15 }
0x3b62   :  { %5161 = vmatprep.subr.bf16.mxu0 %v5992_v44 }
0x3b65   :  { %5162 = vmatpush3.bf16.msra.mxu0 %v4179_v18 }
0x3b66   :  { %5187 = vmatprep.subr.bf16.mxu0 %v5992_v44 }
0x3be4   :  { %v4127_v1 = vpop.xlane.xlu1 %4126 }
0x3be5   :  { %v4131_v6 = vmul.f32 0.015625, %v4127_v1  ;;  %v4272_v1 = vpack.c.bf16 %v4262_v32, %v4261_v47  ;;  %v4372_v47 = vld [vmem:[%s7373_s15 + $0x20] sm:$0xff]  ;;  %v4373_v32 = vld [vmem:[%s7373_s15 + $0x28] sm:$0xff] }
0x3be6   :  { %v4130_v20 = vpop.xlane.xlu0 %4129 }
0x3be7   :  { %v4133_v48 = vsub.f32 %v4121_v45, %v4131_v6  ;;  %v4132_v58 = vmul.f32 0.015625, %v4130_v20  ;;  %v4270_v45 = vpack.c.bf16 %v4258_v0, %v4257_v50  ;;  %v4263_v6 = vld [vmem:[%s7372_s9 + $0x70] sm:$0xff]  ;;  %v4264_v20 = vld [vmem:[%s7372_s9 + $0x78] sm:$0xff]  ;;  %v4368_v50 = vld [vmem:[%s7373_s15] sm:$0xff] }
0x3be8   :  { %v4369_v0 = vld [vmem:[%s7373_s15 + $0x8] sm:$0xff] }
0x3be9   :  { %v4134_v17 = vsub.f32 %v4122_v39, %v4132_v58  ;;  %v4135_v29 = vmul.f32 %v4133_v48, %v4133_v48  ;;  %5176 = vmatpush3.bf16.msra.mxu1 %v4270_v45  ;;  %v4271_v39 = vpack.c.bf16 %v4260_v31, %v4259_v54  ;;  %v4962_v58 = vld [vmem:[#allocation20] ss:$0 sm:$0xff]  ;;  %v4377_v45 = vpack.c.bf16 %v4369_v0, %v4368_v50  ;;  %v4371_v31 = vld [vmem:[%s7373_s15 + $0x18] sm:$0xff] }
0x3bea   :  { %5177 = vmatprep.subr.bf16.mxu1 %v5992_v44  ;;  %v4370_v54 = vld [vmem:[%s7373_s15 + $0x10] sm:$0xff] }
0x3beb   :  { %v4137_v8 = vsel %vm1723_vm8, %v4135_v29, 0.0  ;;  %v4136_v38 = vmul.f32 %v4134_v17, %v4134_v17 }
0x3bec   :  { %4138 = vadd.xlane.f32.xlu0 %v4137_v8 }
0x3bed   :  { %v4140_v9 = vsel %vm1723_vm8, %v4136_v38, 0.0  ;;  %5178 = vmatpush3.bf16.msra.mxu1 %v4271_v39  ;;  %v4378_v39 = vpack.c.bf16 %v4371_v31, %v4370_v54 }
0x3bee   :  { %4141 = vadd.xlane.f32.xlu1 %v4140_v9  ;;  %5179 = vmatprep.subr.bf16.mxu1 %v5992_v44 }
0x3bf1   :  { %5180 = vmatpush3.bf16.msra.mxu1 %v4272_v1  ;;  %v4379_v1 = vpack.c.bf16 %v4373_v32, %v4372_v47 }
0x3bf2   :  { %5181 = vmatprep.subr.bf16.mxu1 %v5992_v44 }
0x3c79   :  { %v4139_v21 = vpop.xlane.xlu0 %4138 }
0x3c7a   :  { %v4143_v37 = vmul.f32 0.015625, %v4139_v21 }
0x3c7b   :  { %v4142_v25 = vpop.xlane.xlu1 %4141 }
0x3c7c   :  { %v4145_v41 = vadd.f32 1e-05, %v4143_v37  ;;  %v4144_v28 = vmul.f32 0.015625, %v4142_v25 }
0x3c7e   :  { %5474 = vrsqrt.f32 %v4145_v41  ;;  %v4146_v33 = vadd.f32 1e-05, %v4144_v28 }
0x3c80   :  { %5476 = vrsqrt.f32 %v4146_v33 }
0x3c88   :  { %v5475_v35 = vpop.eup %5474 }
0x3c89   :  { %v4149_v40 = vmul.f32 %v5475_v35, %v4133_v48  ;;  %v4273_v48 = vpack.c.bf16 %v4264_v20, %v4263_v6  ;;  %v4374_v6 = vld [vmem:[%s7373_s15 + $0x30] sm:$0xff]  ;;  %v4375_v20 = vld [vmem:[%s7373_s15 + $0x38] sm:$0xff] }
0x3c8a   :  { %v5477_v42 = vpop.eup %5476 }
0x3c8b   :  { %v4157_v49 = vmul.f32 %v4960_v43, %v4149_v40  ;;  %v4150_v11 = vmul.f32 %v5477_v42, %v4134_v17  ;;  %5182 = vmatpush3.bf16.msra.mxu1 %v4273_v48  ;;  %v4964_v40 = vld [vmem:[#allocation22] ss:$0 sm:$0xff]  ;;  %v4380_v48 = vpack.c.bf16 %v4375_v20, %v4374_v6 }
0x3c8c   :  { %5221 = vmatprep.subr.bf16.mxu1 %v5992_v44 }
0x3c8d   :  { %v4158_v5 = vmul.f32 %v4960_v43, %v4150_v11  ;;  %v7228_v53 = vadd.f32 %v4961_v51, %v4157_v49 }
0x3c8f   :  { %v7230_v55 = vadd.f32 %v4961_v51, %v4158_v5 }
0x3c91   :  { %v4175_v2 = vpack.c.bf16 %v7230_v55, %v7228_v53 }
0x3c93   :  { %5164 = vmatmul.mubr.msk.bf16.vlgmr.msra.gmra.mrb[72].mxu0 %vm1723_vm8, %v4175_v2 }
0x3c94   :  { %5195 = vmatprep.mubr.msk.bf16.mxu0 %vm5993_vm9, %v5992_v44  ;;  %5188 = vmatpush3.bf16.msra.mxu0 %v4377_v45 }
0x3c95   :  { %5189 = vmatprep.subr.bf16.mxu0 %v5992_v44 }
0x3c98   :  { %5190 = vmatpush3.bf16.msra.mxu0 %v4378_v39 }
0x3c99   :  { %5191 = vmatprep.subr.bf16.mxu0 %v5992_v44 }
0x3c9c   :  { %5192 = vmatpush3.bf16.msra.mxu0 %v4379_v1 }
0x3c9d   :  { %5193 = vmatprep.subr.bf16.mxu0 %v5992_v44 }
0x3ca0   :  { %5194 = vmatpush3.bf16.msra.mxu0 %v4380_v48 }
0x3ca1   :  { %5199 = vmatprep.subr.mxu0 %v5992_v44 }
0x3d66   :  { %v4224_v17 = vpop.f32.mrb[72].mxu0 }
0x3d67   :  { %v4225_v29 = vadd.f32 %v4962_v58, %v4224_v17  ;;  %v5165_v8 = vpop.f32.mrb[73].mxu0 }
0x3d68   :  { %v4227_v38 = vpop.f32.mrb[74].mxu0 }
0x3d69   :  { %v4231_v9 = vmul.f32 %v4225_v29, %v4225_v29  ;;  %v4228_v34 = vadd.f32 %v4962_v58, %v4227_v38  ;;  %v5166_v10 = vpop.f32.mrb[75].mxu0 }
0x3d6a   :  { %v4965_v10 = vld [vmem:[#allocation23] ss:$0 sm:$0xff] }
0x3d6b   :  { %v4233_v19 = vmul.f32 %v4231_v9, %v4225_v29  ;;  %v4232_v4 = vmul.f32 %v4228_v34, %v4228_v34 }
0x3d6d   :  { %v4235_v12 = vmul.f32 0.044715, %v4233_v19  ;;  %v4234_v13 = vmul.f32 %v4232_v4, %v4228_v34 }
0x3d6f   :  { %v4237_v52 = vadd.f32 %v4235_v12, %v4225_v29  ;;  %v4236_v14 = vmul.f32 0.044715, %v4234_v13 }
0x3d71   :  { %v4239_v15 = vmul.f32 0.7978846, %v4237_v52  ;;  %v4238_v16 = vadd.f32 %v4236_v14, %v4228_v34  ;;  %v4966_v52 = vld [vmem:[#allocation25] ss:$0 sm:$0xff] }
0x3d73   :  { %5478 = vtanh.f32 %v4239_v15  ;;  %v4240_v36 = vmul.f32 0.7978846, %v4238_v16 }
0x3d75   :  { %5480 = vtanh.f32 %v4240_v36 }
0x3d7d   :  { %v5479_v18 = vpop.eup %5478 }
0x3d7e   :  { %v4243_v21 = vadd.f32 1.0, %v5479_v18  ;;  %v4967_v18 = vld [vmem:[#allocation26] ss:$0 sm:$0xff] }
0x3d7f   :  { %v5481_v37 = vpop.eup %5480 }
0x3d80   :  { %v4245_v25 = vmul.f32 0.5, %v4243_v21  ;;  %v4244_v41 = vadd.f32 1.0, %v5481_v37 }
0x3d82   :  { %v4246_v28 = vmul.f32 0.5, %v4244_v41  ;;  %v4247_v33 = vmul.f32 %v4245_v25, %v4225_v29 }
0x3d84   :  { %v4248_v35 = vmul.f32 %v4246_v28, %v4228_v34 }
0x3d86   :  { %v4265_v43 = vpack.c.bf16 %v4248_v35, %v4247_v33  ;;  %v4969_v35 = vld [vmem:[#allocation28] ss:$0 sm:$0xff] }
0x3d88   :  { %5184 = vmatmul.mubr.bf16.vlgmr.msra.gmra.mrb[72].mxu1 %v4265_v43 }
0x3d89   :  { %5225 = vmatprep.mubr.msk.bf16.mxu1 %vm5993_vm9, %v5992_v44 }
0x3e5b   :  { %v4315_v42 = vpop.f32.mrb[72].mxu1 }
0x3e5c   :  { %v4316_v49 = vadd.f32 %v4964_v40, %v4315_v42  ;;  %v5185_v11 = vpop.f32.mrb[73].mxu1 }
0x3e5d   :  { %v4318_v51 = vpop.f32.mrb[74].mxu1 }
0x3e5e   :  { %v4322_v5 = vadd.f32 %v4316_v49, %v7228_v53  ;;  %v4319_v2 = vadd.f32 %v4964_v40, %v4318_v51  ;;  %v5186_v56 = vpop.f32.mrb[75].mxu1 }
0x3e60   :  { %v4323_v26 = vadd.f32 %v4319_v2, %v7230_v55  ;;  %v4326_v57 = vsel %vm1723_vm8, %v4322_v5, 0.0  ;;  %v4464_v2 = vand.u32 127, %v366_v23 }
0x3e61   :  { %4327 = vadd.xlane.f32.xlu0 %v4326_v57 }
0x3e62   :  { %v4329_v59 = vsel %vm1723_vm8, %v4323_v26, 0.0 }
0x3e63   :  { %4330 = vadd.xlane.f32.xlu1 %v4329_v59 }
0x3eee   :  { %v4328_v60 = vpop.xlane.xlu0 %4327 }
0x3eef   :  { %v4332_v3 = vmul.f32 0.015625, %v4328_v60 }
0x3ef0   :  { %v4331_v61 = vpop.xlane.xlu1 %4330 }
0x3ef1   :  { %v4334_v62 = vsub.f32 %v4322_v5, %v4332_v3  ;;  %v4333_v7 = vmul.f32 0.015625, %v4331_v61  ;;  %v4970_v5 = vld [vmem:[#allocation3] ss:$0 sm:$0xff] }
0x3ef3   :  { %v4335_v53 = vsub.f32 %v4323_v26, %v4333_v7  ;;  %v4336_v63 = vmul.f32 %v4334_v62, %v4334_v62  ;;  %v4467_v26 = vsub.s32 %v4464_v2, %v6281_v24  ;;  %v4768_v2 = vld [vmem:[%s7375_s18 + $0x10] sm:$0xff] }
0x3ef5   :  { %v4338_v55 = vsel %vm1723_vm8, %v4336_v63, 0.0  ;;  %v4337_v22 = vmul.f32 %v4335_v53, %v4335_v53 }
0x3ef6   :  { %4339 = vadd.xlane.f32.xlu0 %v4338_v55 }
0x3ef7   :  { %v4341_v46 = vsel %vm1723_vm8, %v4337_v22, 0.0 }
0x3ef8   :  { %4342 = vadd.xlane.f32.xlu1 %v4341_v46 }
0x3f83   :  { %v4340_v58 = vpop.xlane.xlu0 %4339 }
0x3f84   :  { %v4344_v17 = vmul.f32 0.015625, %v4340_v58 }
0x3f85   :  { %v4343_v29 = vpop.xlane.xlu1 %4342 }
0x3f86   :  { %v4346_v8 = vadd.f32 1e-05, %v4344_v17  ;;  %v4345_v38 = vmul.f32 0.015625, %v4343_v29 }
0x3f88   :  { %5482 = vrsqrt.f32 %v4346_v8  ;;  %v4347_v9 = vadd.f32 1e-05, %v4345_v38 }
0x3f8a   :  { %5484 = vrsqrt.f32 %v4347_v9  ;;  %v4694_v9 = vld [vmem:[%s7374_s29] sm:$0xff] }
0x3f92   :  { %v5483_v34 = vpop.eup %5482 }
0x3f93   :  { %v4350_v19 = vmul.f32 %v5483_v34, %v4334_v62  ;;  %v4695_v34 = vld [vmem:[%s7374_s29 + $0x8] sm:$0xff] }
0x3f94   :  { %v5485_v4 = vpop.eup %5484 }
0x3f95   :  { %v4358_v12 = vmul.f32 %v4965_v10, %v4350_v19  ;;  %v4351_v13 = vmul.f32 %v5485_v4, %v4335_v53  ;;  %v4696_v4 = vld [vmem:[%s7374_s29 + $0x10] sm:$0xff] }
0x3f97   :  { %v4359_v14 = vmul.f32 %v4965_v10, %v4351_v13  ;;  %v4366_v15 = vadd.f32 %v4966_v52, %v4358_v12  ;;  %v4697_v12 = vld [vmem:[%s7374_s29 + $0x18] sm:$0xff] }
0x3f98   :  { %v4705_v13 = vpack.c.bf16 %v4697_v12, %v4696_v4 }
0x3f99   :  { %v7281_v16 = vadd.f32 %v4966_v52, %v4359_v14  ;;  %v4698_v52 = vld [vmem:[%s7374_s29 + $0x20] sm:$0xff]  ;;  %v4699_v14 = vld [vmem:[%s7374_s29 + $0x28] sm:$0xff] }
0x3f9b   :  { %v4376_v36 = vpack.c.bf16 %v7281_v16, %v4366_v15 }
0x3f9d   :  { %5196 = vmatmul.mubr.msk.bf16.vlgmr.msra.gmra.mrb[76].mxu0 %vm1723_vm8, %v4376_v36  ;;  %v4701_v36 = vld [vmem:[%s7374_s29 + $0x38] sm:$0xff] }
0x3f9e   :  { %5200 = vmatpush3.msra.mxu0 %v4366_v15  ;;  %5201 = vmatprep.mubr.msk.f32.mxu0 %vm5993_vm9, %v5992_v44  ;;  %v4706_v15 = vpack.c.bf16 %v4699_v14, %v4698_v52 }
0x3f9f   :  { %5204 = vmatprep.subr.mxu0 %v5992_v44 }
0x4070   :  { %v4425_v21 = vpop.f32.mrb[76].mxu0 }
0x4071   :  { %v4426_v37 = vadd.f32 %v4967_v18, %v4425_v21  ;;  %v5197_v25 = vpop.f32.mrb[77].mxu0 }
0x4072   :  { %v4428_v41 = vpop.f32.mrb[78].mxu0 }
0x4073   :  { %5486 = vtanh.f32 %v4426_v37  ;;  %v4429_v28 = vadd.f32 %v4967_v18, %v4428_v41  ;;  %v5198_v33 = vpop.f32.mrb[79].mxu0 }
0x4075   :  { %5488 = vtanh.f32 %v4429_v28 }
0x407d   :  { %v5487_v43 = vpop.eup %5486 }
0x407e   :  { %v4441_v40 = vmul.f32 %v5487_v43, %v4969_v35 }
0x407f   :  { %v5489_v42 = vpop.eup %5488 }
0x4080   :  { %v4443_v49 = vsel %vm434_vm5, %v4441_v40, 0.0  ;;  %v4442_v11 = vmul.f32 %v5489_v42, %v4969_v35 }
0x4081   :  { %4444 = vadd.xlane.f32.xlu0 %v4443_v49 }
0x4082   :  { %v4446_v51 = vsel %vm434_vm5, %v4442_v11, 0.0  ;;  %v4766_v11 = vld [vmem:[%s7375_s18] sm:$0xff] }
0x4083   :  { %4447 = vadd.xlane.f32.xlu1 %v4446_v51  ;;  %v4767_v51 = vld [vmem:[%s7375_s18 + $0x8] sm:$0xff] }
0x4097   :  { %4456 = vperm.xlu0 %5308, %v4970_v5   ;;  %v4771_v5 = vpack.c.bf16 %v4767_v51, %v4766_v11 }
0x4099   :  { %5222 = vmatpush3.bf16.msra.mxu1 %v4771_v5 }
0x409a   :  { %5223 = vmatprep.subr.bf16.mxu1 %v5992_v44 }
0x410e   :  { %v4445_v56 = vpop.xlane.xlu0 %4444 }
0x4110   :  { %v4448_v57 = vpop.xlane.xlu1 %4447 }
0x4116   :  { %v4457_v59 = vpop.permute.xlu0 %4456 }
0x4117   :  { %v4459_v60 = vadd.f32 %v4457_v59, %v4445_v56  ;;  %v4460_v3 = vadd.f32 %v4457_v59, %v4448_v57  ;;  %v4769_v56 = vld [vmem:[%s7375_s18 + $0x18] sm:$0xff] }
0x4118   :  { %v4973_v57 = vld [vmem:[#allocation29] ss:$0 sm:$0xff] }
0x4119   :  { %v4468_v61 = vrot.slane %v4459_v60, %v4467_v26  ;;  %v4472_v62 = vrot.slane %v4460_v3, %v4467_v26 }
0x411b   :  { %v4473_v7 = vsel %vm495_vm2, %v4472_v62, %v4468_v61 }
0x411c   :  { %v4476_v53 = vsel %vm4475_vm12, %v4473_v7, -inf }
0x411d   :  { %4477 = vmax.xlane.f32.xlu1 %v4476_v53 }
0x41aa   :  { %v4478_v63 = vpop.xlane.xlu1 %4477 }
0x41ab   :  { %v4483_v55 = vrot.slane %v4478_v63, %v6288_v30  ;;  %v4487_v23 = vrot.slane %v4478_v63, %v6284_v27  ;;  %v4975_v63 = vld [vmem:[#allocation31] ss:$0 sm:$0xff] }
0x41ad   :  { %v4490_v22 = vsub.f32 %v4459_v60, %v4483_v55  ;;  %v4491_v46 = vsub.f32 %v4460_v3, %v4487_v23 }
0x41af   :  { %v4492_v24 = vmul.f32 1.442695, %v4490_v22  ;;  %v4494_v50 = vmul.f32 1.442695, %v4491_v46  ;;  %v4977_v46 = vld [vmem:[#allocation32] ss:$0 sm:$0xff] }
0x41b1   :  { %5490 = vpow2.f32 %v4492_v24 }
0x41b2   :  { %5492 = vpow2.f32 %v4494_v50 }
0x41bb   :  { %v5491_v0 = vpop.eup %5490 }
0x41bc   :  { %4499 = vperm.xlu1 %5309, %v5491_v0   ;;  %v5493_v45 = vpop.eup %5492 }
0x41c0   :  { %4502 = vperm.xlu1 %5309, %v5493_v45  }
0x423b   :  { %v4500_v54 = vpop.permute.xlu1 %4499 }
0x423c   :  { %v4507_v39 = vrot.slane %v4500_v54, %v4467_v26 }
0x423f   :  { %v4503_v31 = vpop.permute.xlu1 %4502 }
0x4240   :  { %v4511_v47 = vrot.slane %v4503_v31, %v4467_v26 }
0x4242   :  { %v4512_v32 = vsel %vm495_vm2, %v4511_v47, %v4507_v39 }
0x4243   :  { %v4514_v1 = vsel %vm4475_vm12, %v4512_v32, 0.0 }
0x4244   :  { %4515 = vadd.xlane.f32.xlu1 %v4514_v1 }
0x42d1   :  { %v4516_v6 = vpop.xlane.xlu1 %4515 }
0x42d2   :  { %5494 = vrcp.f32 %v4516_v6 }
0x42dc   :  { %v5495_v20 = vpop.eup %5494 }
0x42dd   :  { %v4522_v48 = vrot.slane %v5495_v20, %v6288_v30  ;;  %v4526_v17 = vrot.slane %v5495_v20, %v6284_v27  ;;  %v4704_v27 = vpack.c.bf16 %v4695_v34, %v4694_v9 }
0x42df   :  { %v4529_v58 = vmul.f32 %v5491_v0, %v4522_v48  ;;  %v4530_v29 = vmul.f32 %v5493_v45, %v4526_v17 }
0x42e1   :  { %4534 = vperm.xlu0 %5308, %v4529_v58  }
0x42e5   :  { %4537 = vperm.xlu0 %5308, %v4530_v29  }
0x4360   :  { %v4535_v8 = vpop.permute.xlu0 %4534 }
0x4361   :  { %v4542_v38 = vrot.slane %v4535_v8, %v4467_v26 }
0x4363   :  { %5202 = vmatmul.mubr.msk.f32.vlgmr.msra.gmra.mrb[80].mxu0 %vm376_vm1, %v4542_v38 }
0x4364   :  { %5205 = vmatpush3.msra.mxu0 %v7281_v16  ;;  %v4538_v10 = vpop.permute.xlu0 %4537  ;;  %5206 = vmatprep.mubr.msk.f32.mxu0 %vm5993_vm9, %v5992_v44  ;;  %v4700_v16 = vld [vmem:[%s7374_s29 + $0x30] sm:$0xff] }
0x4365   :  { %v4546_v30 = vrot.slane %v4538_v10, %v4467_v26  ;;  %5209 = vmatprep.subr.bf16.mxu0 %v5992_v44  ;;  %v4707_v18 = vpack.c.bf16 %v4701_v36, %v4700_v16  ;;  %v4772_v26 = vpack.c.bf16 %v4769_v56, %v4768_v2 }
0x4367   :  { %5207 = vmatmul.mubr.msk.f32.vlgmr.msra.gmra.mrb[82].mxu0 %vm376_vm1, %v4546_v30  ;;  %v4547_v19 = vsel %vm495_vm2, %v4546_v30, %v4542_v38  ;;  %5224 = vmatpush3.bf16.msra.mxu1 %v4772_v26 }
0x4368   :  { %5210 = vmatpush3.bf16.msra.mxu0 %v4704_v27  ;;  %5217 = vmatprep.mubr.msk.bf16.mxu0 %vm5993_vm9, %v5992_v44  ;;  %4549 = vst.msk [vmem:[#allocation34] sm:$0x3] %vm4475_vm12, %v4547_v19 }
0x4369   :  { %5211 = vmatprep.subr.bf16.mxu0 %v5992_v44 }
0x436c   :  { %5212 = vmatpush3.bf16.msra.mxu0 %v4705_v13 }
0x436d   :  { %5213 = vmatprep.subr.bf16.mxu0 %v5992_v44 }
0x4370   :  { %5214 = vmatpush3.bf16.msra.mxu0 %v4706_v15 }
0x4371   :  { %5215 = vmatprep.subr.bf16.mxu0 %v5992_v44 }
0x4374   :  { %5216 = vmatpush3.bf16.msra.mxu0 %v4707_v18 }
0x4436   :  { %v4618_v21 = vpop.f32.mrb[80].mxu0 }
0x4437   :  { %v5203_v37 = vpop.f32.mrb[81].mxu0  ;;  %v4702_v41 = vpack.c.bf16 %v4618_v21, %v4618_v21 }
0x4439   :  { %v4717_v43 = vunpack.c.l.b16 %v4702_v41 }
0x443a   :  { %v4690_v25 = vpop.f32.mrb[82].mxu0 }
0x443b   :  { %v4703_v28 = vpack.c.bf16 %v4690_v25, %v4690_v25  ;;  %v5208_v33 = vpop.f32.mrb[83].mxu0 }
0x443d   :  { %v4718_v35 = vunpack.c.l.b16 %v4703_v28 }
0x443f   :  { %v4719_v40 = vrot.slane %v4718_v35, 7 }
0x4441   :  { %v4720_v42 = vsel %vm495_vm2, %v4719_v40, %v4717_v43 }
0x4442   :  { %v4721_v49 = vpack.c.b16 %v4720_v42, %v4720_v42 }
0x4444   :  { %5218 = vmatmul.mubr.msk.bf16.vlgmr.msra.gmra.mrb[84].mxu0 %vm1723_vm8, %v4721_v49 }
0x4517   :  { %v4759_v59 = vpop.f32.mrb[84].mxu0 }
0x4518   :  { %v4760_v60 = vadd.f32 %v4973_v57, %v4759_v59  ;;  %v5219_v3 = vpop.f32.mrb[85].mxu0 }
0x4519   :  { %v4762_v61 = vpop.f32.mrb[86].mxu0 }
0x451a   :  { %v4765_v62 = vmax.f32 %v4760_v60, 0.0  ;;  %v5220_v7 = vpop.f32.mrb[87].mxu0 }
0x451c   :  { %v4770_v53 = vpack.c.bf16 %v4765_v62, %v4765_v62 }
0x451e   :  { %5226 = vmatmul.mubr.msk.bf16.vlgmr.msra.gmra.mrb[76].mxu1 %vm434_vm5, %v4770_v53 }
0x45f1   :  { %v4817_v55 = vpop.f32.mrb[76].mxu1 }
0x45f2   :  { %v4818_v23 = vadd.f32 %v4975_v63, %v4817_v55  ;;  %v5227_v22 = vpop.f32.mrb[77].mxu1 }
0x45f3   :  { %v4820_v44 = vpop.f32.mrb[78].mxu1 }
0x45f4   :  { %v4823_v24 = vmax.f32 %v4818_v23, 0.0  ;;  %v5228_v50 = vpop.f32.mrb[79].mxu1 }
0x45f6   :  { %v4831_v0 = vmul.f32 %v4977_v46, %v4823_v24 }
0x45f8   :  { %v4833_v45 = vsel %vm4832_vm13, %v4831_v0, 0.0 }
0x45f9   :  { %4834 = vadd.xlane.f32.xlu0 %v4833_v45 }
0x45fa   :  { %5903 = shalt.err (!%p5900_p8)
}
0x45fb   :  { %s5904_s26 = scalar_lea.hbm %s6161_s22, 32 }
0x45fc   :  { %p5905_p9 = scmp.ne.s32.totalorder %s6161_s22, %s5904_s26  ;;  %p5908_p10 = scmp.lt.u32.totalorder %s5904_s26, %s6161_s22 }
0x45fe   :  { %p5910_p11 = pnand %p5908_p10, %p5905_p9 }
0x4600   :  { %5913 = shalt.err (!%p5910_p11)
}
0x4601   :  { %4857 = dma.vmem_to_hbm [thread:$0]  %s4855_s3, 32, %s6161_s22, [#allocation7]   ;;  %v4978_v54 = vld [vmem:[#allocation4] ss:$0 sm:$0xff]  ;;  %vm4844_vm14 = vcmask 1024  }
0x4686   :  { %v4835_v31 = vpop.xlane.xlu0 %4834 }
0x4687   :  { %v4843_v39 = vadd.f32 %v4978_v54, %v4835_v31 }
0x4689   :  { %4845 = vst.msk [vmem:[%s6156_s24] sm:$0x3] %vm4844_vm14, %v4843_v39 }
0x468a   :  { %5934 = dma.done.wait [#allocation7], 32  }
0x468b   :  { %5935 = vsyncadd [#allocation7], 4294967264 }
0x468c   :  { %4863 = vsyncpa [#allocation6], 1 }
0x468d   :  { %4864 = vsyncpa [#allocation9], 1 }
0x468e   :  { %4865 = vsyncpa [#allocation12], 1 }
0x468f   :  { %4866 = vsyncpa [#allocation15], 1 }
0x4690   :  { %4867 = vsyncpa [#allocation18], 1 }
0x4691   :  { %4868 = vsyncpa [#allocation21], 1 }
0x4692   :  { %4869 = vsyncpa [#allocation24], 1 }
0x4693   :  { %4870 = vsyncpa [#allocation27], 1 }
0x4694   :  { %4871 = vsyncpa [#allocation30], 1 }
0x4695   :  { %4872 = vsyncpa [#allocation33], 1 }
0x4696   :  { %4873 = vsyncpa [#allocation7], 1 }

</bundles_post_ra>
